<compile_context>
chip_gen: v6e
topology: v6e:2x2x1
jax: 0.10.0
libtpu: 0.0.40
codegen_flags: <defaults>
</compile_context>

<pallas_src>
import jax
import jax.numpy as jnp
from jax import lax
from jax.experimental import pallas as pl
from jax.experimental.pallas import tpu as pltpu


def _make_kernel(num_layers, seq_len, pred_len, hidden_dim, b_pad):
    H = hidden_dim
    L = num_layers
    T = seq_len
    P = pred_len

    def kernel(*refs):
        x2d_ref, wih0_ref, whh0_ref, b0_ref = refs[0:4]
        n_up = 3 * (L - 1)
        up_refs = refs[4:4 + n_up]
        fcw_ref = refs[4 + n_up]
        fcb_ref = refs[5 + n_up]
        out_ref = refs[6 + n_up]
        gx_sc = refs[7 + n_up]

        # Hoisted layer-0 input projection: one dense matmul, cached in VMEM
        # scratch and re-sliced by every pass over the (identical) sequence.
        gx_sc[...] = (jnp.dot(x2d_ref[...], wih0_ref[...],
                              preferred_element_type=jnp.float32)
                      + b0_ref[...])

        whh0 = whh0_ref[...]                                   # (H, 4H)
        wih_u = [up_refs[3 * i + 0][...] for i in range(L - 1)]  # (H, 4H)
        whh_u = [up_refs[3 * i + 1][...] for i in range(L - 1)]  # (H, 4H)
        b_u = [up_refs[3 * i + 2][...] for i in range(L - 1)]    # (1, 4H)
        fcw = fcw_ref[...]
        fcb = fcb_ref[...]

        def cell(gates, h_prev, c_prev):
            # g-gate pre-activations were pre-scaled by 2 in the wrapper, so a
            # single full-width (4H-lane) sigmoid gives i/f/o directly and
            # tanh(g) via the identity tanh(x) = 2*sigmoid(2x) - 1 (VPU only).
            s = jax.nn.sigmoid(gates)
            i_g = s[:, 0:H]
            f_g = s[:, H:2 * H]
            g_g = 2.0 * s[:, 2 * H:3 * H] - 1.0
            o_g = s[:, 3 * H:4 * H]
            c_new = f_g * c_prev + i_g * g_g
            h_new = o_g * jnp.tanh(c_new)
            return h_new, c_new

        def lstm_pass(carry):
            """One full pass of the stacked LSTM over the cached sequence."""
            def step(t, carry):
                hs, cs = list(carry[0]), list(carry[1])
                row = pl.multiple_of(t * b_pad, b_pad)
                # Layer 0: cached x-projection + recurrent dot.
                gates = gx_sc[pl.ds(row, b_pad), :] + jnp.dot(
                    hs[0], whh0, preferred_element_type=jnp.float32)
                hs[0], cs[0] = cell(gates, hs[0], cs[0])
                for l in range(1, L):
                    # Un-fused input/recurrent matmuls: the whh dot depends
                    # only on the previous step's h[l] and can issue while
                    # layer l-1 is still computing its nonlinearities.
                    gates = (jnp.dot(hs[l - 1], wih_u[l - 1],
                                     preferred_element_type=jnp.float32)
                             + jnp.dot(hs[l], whh_u[l - 1],
                                       preferred_element_type=jnp.float32)
                             + b_u[l - 1])
                    hs[l], cs[l] = cell(gates, hs[l], cs[l])
                return (tuple(hs), tuple(cs))

            return lax.fori_loop(0, T, step, carry, unroll=True)

        zeros = jnp.zeros((b_pad, H), jnp.float32)
        carry = (tuple([zeros] * L), tuple([zeros] * L))
        # Initial pass from zero state: output discarded, (h, c) carried.
        carry = lstm_pass(carry)

        def pred_step(p, carry):
            carry = lstm_pass(carry)
            h_top = carry[0][L - 1]
            # Linear head on the top layer's last-time-step output;
            # lane-dense (b_pad, 128k) store.
            y = jnp.dot(h_top, fcw, preferred_element_type=jnp.float32) + fcb
            out_ref[p] = y.astype(out_ref.dtype)
            return carry

        lax.fori_loop(0, P, pred_step, carry)

    return kernel


def _scale_g_cols(w, H):
    # Bake the factor 2 of tanh(x) = 2*sigmoid(2x) - 1 into the g-gate columns.
    return w.at[..., 2 * H:3 * H].multiply(2.0)


def lstm_oneshot_forward(x, params, prediction_length):
    B, T, D = x.shape
    L = len(params["layers"])
    H = params["layers"][0]["whh"].shape[0]
    O = params["fc_w"].shape[1]
    P = int(prediction_length)

    B_pad = ((max(B, 1) + 7) // 8) * 8          # pad batch onto sublanes
    O_pad = ((max(O, 1) + 127) // 128) * 128    # lane-dense output head

    # Time-major, batch-padded x flattened to (T*B_pad, D) so the layer-0
    # projection is a single 2-D matmul in the kernel.
    x_pad = jnp.zeros((B_pad, T, D), jnp.float32).at[:B].set(
        x.astype(jnp.float32))
    x2d = jnp.transpose(x_pad, (1, 0, 2)).reshape(T * B_pad, D)

    wih0 = _scale_g_cols(params["layers"][0]["wih"].astype(jnp.float32), H)
    whh0 = _scale_g_cols(params["layers"][0]["whh"].astype(jnp.float32), H)
    b0 = _scale_g_cols(params["layers"][0]["b"].astype(jnp.float32), H)

    upper = []
    for l in range(1, L):
        lp = params["layers"][l]
        upper += [_scale_g_cols(lp["wih"].astype(jnp.float32), H),
                  _scale_g_cols(lp["whh"].astype(jnp.float32), H),
                  _scale_g_cols(lp["b"].astype(jnp.float32), H)]

    fcw_pad = jnp.zeros((H, O_pad), jnp.float32).at[:, :O].set(params["fc_w"])
    fcb_pad = jnp.zeros((1, O_pad), jnp.float32).at[:, :O].set(params["fc_b"])

    flat_inputs = [x2d, wih0, whh0, b0] + upper + [fcw_pad, fcb_pad]

    # VMEM budget: no grid -> no double-buffering.  Clamp the request to the
    # device's physical VMEM (v7x: 64 MiB) rather than a fixed 100 MiB cap.
    in_bytes = sum(int(a.size) * 4 for a in flat_inputs)
    out_bytes = P * B_pad * O_pad * 4
    scratch_bytes = T * B_pad * 4 * H * 4
    try:
        vmem_cap = int(pltpu.get_tpu_info().vmem_capacity_bytes)
    except Exception:
        vmem_cap = 64 * 2 ** 20
    vmem_limit = int(min(vmem_cap * 3 // 4,
                         max(4 * 2 ** 20,
                             2 * (in_bytes + out_bytes + scratch_bytes))))

    kernel = _make_kernel(L, T, P, H, B_pad)
    vmem_spec = pl.BlockSpec(memory_space=pltpu.MemorySpace.VMEM)

    out = pl.pallas_call(
        kernel,
        out_shape=jax.ShapeDtypeStruct((P, B_pad, O_pad), jnp.float32),
        in_specs=[vmem_spec] * len(flat_inputs),
        out_specs=vmem_spec,
        scratch_shapes=[pltpu.VMEM((T * B_pad, 4 * H), jnp.float32)],
        compiler_params=pltpu.CompilerParams(vmem_limit_bytes=vmem_limit),
    )(*flat_inputs)

    return jnp.transpose(out[:, :B, :O], (1, 0, 2))   # (B, P, O)


def init_params(key, input_dim, hidden_dim, num_layers, output_dim):
    """Deterministic synthetic params, PyTorch-style U(-1/sqrt(H), 1/sqrt(H))."""
    bound = 1.0 / (hidden_dim ** 0.5)
    layers = []
    for l in range(num_layers):
        d_in = input_dim if l == 0 else hidden_dim
        key, k1, k2, k3, k4 = jax.random.split(key, 5)
        wih = jax.random.uniform(k1, (d_in, 4 * hidden_dim), jnp.float32, -bound, bound)
        whh = jax.random.uniform(k2, (hidden_dim, 4 * hidden_dim), jnp.float32, -bound, bound)
        b_ih = jax.random.uniform(k3, (4 * hidden_dim,), jnp.float32, -bound, bound)
        b_hh = jax.random.uniform(k4, (4 * hidden_dim,), jnp.float32, -bound, bound)
        layers.append({"wih": wih, "whh": whh, "b": (b_ih + b_hh)[None, :]})
    key, k5, k6 = jax.random.split(key, 3)
    fc_w = jax.random.uniform(k5, (hidden_dim, output_dim), jnp.float32, -bound, bound)
    fc_b = jax.random.uniform(k6, (1, output_dim), jnp.float32, -bound, bound)
    return {"layers": layers, "fc_w": fc_w, "fc_b": fc_b}


def reference_forward(x, params, prediction_length):
    """Pure-JAX reference mirroring the PyTorch module's forward."""
    B, T, _ = x.shape
    L = len(params["layers"])
    H = params["layers"][0]["whh"].shape[0]
    h = [jnp.zeros((B, H), jnp.float32) for _ in range(L)]
    c = [jnp.zeros((B, H), jnp.float32) for _ in range(L)]

    def run_seq(h, c):
        h, c = list(h), list(c)
        last = None
        for t in range(T):
            inp = x[:, t, :]
            for l in range(L):
                lp = params["layers"][l]
                gates = inp @ lp["wih"] + h[l] @ lp["whh"] + lp["b"][0]
                i_g = jax.nn.sigmoid(gates[:, 0:H])
                f_g = jax.nn.sigmoid(gates[:, H:2 * H])
                g_g = jnp.tanh(gates[:, 2 * H:3 * H])
                o_g = jax.nn.sigmoid(gates[:, 3 * H:4 * H])
                c[l] = f_g * c[l] + i_g * g_g
                h[l] = o_g * jnp.tanh(c[l])
                inp = h[l]
            last = inp
        return h, c, last

    h, c, _ = run_seq(h, c)
    preds = []
    for _ in range(prediction_length):
        h, c, last = run_seq(h, c)
        preds.append(last @ params["fc_w"] + params["fc_b"][0])
    return jnp.stack(preds, axis=1)


if __name__ == "__main__":
    # batch=2, seq=8, input_dim=8, hidden_dim=32, num_layers=2, output_dim=4,
    # prediction_length=4.
    B, T, D, H, L, O, P = 2, 8, 8, 32, 2, 4, 4

    key = jax.random.PRNGKey(0)
    kx, kp = jax.random.split(key)
    x = jax.random.normal(kx, (B, T, D), jnp.float32)
    params = init_params(kp, D, H, L, O)

    out = lstm_oneshot_forward(x, params, P)
    out = jax.block_until_ready(out)

    ref = reference_forward(x, params, P)
    assert out.shape == (B, P, O)
    assert bool(jnp.allclose(out, ref, atol=1e-4, rtol=1e-4)), "mismatch vs pure-JAX reference"
    print("KERNEL_OK")
</pallas_src>

<mosaic_0001>
module attributes {stable_mosaic.version = 11 : i64} {
  func.func @kernel(%arg0: memref<64x8xf32, #tpu.memory_space<vmem>>, %arg1: memref<8x128xf32, #tpu.memory_space<vmem>>, %arg2: memref<32x128xf32, #tpu.memory_space<vmem>>, %arg3: memref<1x128xf32, #tpu.memory_space<vmem>>, %arg4: memref<32x128xf32, #tpu.memory_space<vmem>>, %arg5: memref<32x128xf32, #tpu.memory_space<vmem>>, %arg6: memref<1x128xf32, #tpu.memory_space<vmem>>, %arg7: memref<32x128xf32, #tpu.memory_space<vmem>>, %arg8: memref<1x128xf32, #tpu.memory_space<vmem>>, %arg9: memref<4x8x128xf32, #tpu.memory_space<vmem>>, %arg10: memref<64x128xf32, #tpu.memory_space<vmem>>) attributes {dimension_semantics = [], scalar_prefetch = 0 : i64, scratch_operands = 1 : i64, tpu.core_type = #tpu.core_type<tc>} {
    %c0 = arith.constant 0 : index
    %c0_0 = arith.constant 0 : index
    %0 = vector.load %arg0[%c0, %c0_0] : memref<64x8xf32, #tpu.memory_space<vmem>>, vector<64x8xf32>
    %c0_1 = arith.constant 0 : index
    %c0_2 = arith.constant 0 : index
    %1 = vector.load %arg1[%c0_1, %c0_2] : memref<8x128xf32, #tpu.memory_space<vmem>>, vector<8x128xf32>
    %cst = arith.constant dense<0.000000e+00> : vector<64x128xf32>
    %2 = tpu.matmul %0, %1, %cst {dimension_numbers = #tpu.dot_dimension_numbers<[1], [0], [0], [1], [0, 0, 1, 1], [], []>} : vector<64x8xf32>, vector<8x128xf32>, vector<64x128xf32> -> vector<64x128xf32>
    %c0_3 = arith.constant 0 : index
    %c0_4 = arith.constant 0 : index
    %3 = vector.load %arg3[%c0_3, %c0_4] : memref<1x128xf32, #tpu.memory_space<vmem>>, vector<1x128xf32>
    %4 = vector.broadcast %3 : vector<1x128xf32> to vector<64x128xf32>
    %5 = arith.addf %2, %4 : vector<64x128xf32>
    %c0_5 = arith.constant 0 : index
    %c0_6 = arith.constant 0 : index
    %6 = vector.load %arg10[%c0_5, %c0_6] : memref<64x128xf32, #tpu.memory_space<vmem>>, vector<64x128xf32>
    tpu.vector_store %arg10[%c0_5, %c0_6], %5 {strides = array<i32>} : memref<64x128xf32, #tpu.memory_space<vmem>>, vector<64x128xf32>,
    %c0_7 = arith.constant 0 : index
    %c0_8 = arith.constant 0 : index
    %7 = vector.load %arg2[%c0_7, %c0_8] : memref<32x128xf32, #tpu.memory_space<vmem>>, vector<32x128xf32>
    %c0_9 = arith.constant 0 : index
    %c0_10 = arith.constant 0 : index
    %8 = vector.load %arg4[%c0_9, %c0_10] : memref<32x128xf32, #tpu.memory_space<vmem>>, vector<32x128xf32>
    %c0_11 = arith.constant 0 : index
    %c0_12 = arith.constant 0 : index
    %9 = vector.load %arg5[%c0_11, %c0_12] : memref<32x128xf32, #tpu.memory_space<vmem>>, vector<32x128xf32>
    %c0_13 = arith.constant 0 : index
    %c0_14 = arith.constant 0 : index
    %10 = vector.load %arg6[%c0_13, %c0_14] : memref<1x128xf32, #tpu.memory_space<vmem>>, vector<1x128xf32>
    %c0_15 = arith.constant 0 : index
    %c0_16 = arith.constant 0 : index
    %11 = vector.load %arg7[%c0_15, %c0_16] : memref<32x128xf32, #tpu.memory_space<vmem>>, vector<32x128xf32>
    %c0_17 = arith.constant 0 : index
    %c0_18 = arith.constant 0 : index
    %12 = vector.load %arg8[%c0_17, %c0_18] : memref<1x128xf32, #tpu.memory_space<vmem>>, vector<1x128xf32>
    %cst_19 = arith.constant 0.000000e+00 : f32
    %13 = vector.broadcast %cst_19 : f32 to vector<8x32xf32>
    %c0_i32 = arith.constant 0 : i32
    %c8_i32 = arith.constant 8 : i32
    %14 = arith.muli %c0_i32, %c8_i32 : i32
    %15 = tpu.assume_multiple %14, 8 : i32
    %16 = arith.index_cast %15 : i32 to index
    %c0_20 = arith.constant 0 : index
    %17 = vector.load %arg10[%16, %c0_20] : memref<64x128xf32, #tpu.memory_space<vmem>>, vector<8x128xf32>
    %cst_21 = arith.constant dense<0.000000e+00> : vector<8x128xf32>
    %18 = tpu.matmul %13, %7, %cst_21 {dimension_numbers = #tpu.dot_dimension_numbers<[1], [0], [0], [1], [0, 0, 1, 1], [], []>} : vector<8x32xf32>, vector<32x128xf32>, vector<8x128xf32> -> vector<8x128xf32>
    %19 = arith.addf %17, %18 : vector<8x128xf32>
    %20 = arith.negf %19 : vector<8x128xf32>
    %21 = math.exp %20 : vector<8x128xf32>
    %cst_22 = arith.constant 1.000000e+00 : f32
    %22 = vector.broadcast %cst_22 : f32 to vector<8x128xf32>
    %23 = arith.addf %22, %21 : vector<8x128xf32>
    %24 = arith.divf %22, %23 : vector<8x128xf32>
    %25 = vector.extract_strided_slice %24 {offsets = [0, 0], sizes = [8, 32], strides = [1, 1]} : vector<8x128xf32> to vector<8x32xf32>
    %26 = vector.extract_strided_slice %24 {offsets = [0, 32], sizes = [8, 32], strides = [1, 1]} : vector<8x128xf32> to vector<8x32xf32>
    %27 = vector.extract_strided_slice %24 {offsets = [0, 64], sizes = [8, 32], strides = [1, 1]} : vector<8x128xf32> to vector<8x32xf32>
    %cst_23 = arith.constant 2.000000e+00 : f32
    %28 = vector.broadcast %cst_23 : f32 to vector<8x32xf32>
    %29 = arith.mulf %28, %27 : vector<8x32xf32>
    %cst_24 = arith.constant 1.000000e+00 : f32
    %30 = vector.broadcast %cst_24 : f32 to vector<8x32xf32>
    %31 = arith.subf %29, %30 : vector<8x32xf32>
    %32 = vector.extract_strided_slice %24 {offsets = [0, 96], sizes = [8, 32], strides = [1, 1]} : vector<8x128xf32> to vector<8x32xf32>
    %33 = arith.mulf %26, %13 : vector<8x32xf32>
    %34 = arith.mulf %25, %31 : vector<8x32xf32>
    %35 = arith.addf %33, %34 : vector<8x32xf32>
    %36 = math.tanh %35 : vector<8x32xf32>
    %37 = arith.mulf %32, %36 : vector<8x32xf32>
    %cst_25 = arith.constant dense<0.000000e+00> : vector<8x128xf32>
    %38 = tpu.matmul %37, %8, %cst_25 {dimension_numbers = #tpu.dot_dimension_numbers<[1], [0], [0], [1], [0, 0, 1, 1], [], []>} : vector<8x32xf32>, vector<32x128xf32>, vector<8x128xf32> -> vector<8x128xf32>
    %cst_26 = arith.constant dense<0.000000e+00> : vector<8x128xf32>
    %39 = tpu.matmul %13, %9, %cst_26 {dimension_numbers = #tpu.dot_dimension_numbers<[1], [0], [0], [1], [0, 0, 1, 1], [], []>} : vector<8x32xf32>, vector<32x128xf32>, vector<8x128xf32> -> vector<8x128xf32>
    %40 = arith.addf %38, %39 : vector<8x128xf32>
    %41 = vector.broadcast %10 : vector<1x128xf32> to vector<8x128xf32>
    %42 = arith.addf %40, %41 : vector<8x128xf32>
    %43 = arith.negf %42 : vector<8x128xf32>
    %44 = math.exp %43 : vector<8x128xf32>
    %cst_27 = arith.constant 1.000000e+00 : f32
    %45 = vector.broadcast %cst_27 : f32 to vector<8x128xf32>
    %46 = arith.addf %45, %44 : vector<8x128xf32>
    %47 = arith.divf %45, %46 : vector<8x128xf32>
    %48 = vector.extract_strided_slice %47 {offsets = [0, 0], sizes = [8, 32], strides = [1, 1]} : vector<8x128xf32> to vector<8x32xf32>
    %49 = vector.extract_strided_slice %47 {offsets = [0, 32], sizes = [8, 32], strides = [1, 1]} : vector<8x128xf32> to vector<8x32xf32>
    %50 = vector.extract_strided_slice %47 {offsets = [0, 64], sizes = [8, 32], strides = [1, 1]} : vector<8x128xf32> to vector<8x32xf32>
    %cst_28 = arith.constant 2.000000e+00 : f32
    %51 = vector.broadcast %cst_28 : f32 to vector<8x32xf32>
    %52 = arith.mulf %51, %50 : vector<8x32xf32>
    %cst_29 = arith.constant 1.000000e+00 : f32
    %53 = vector.broadcast %cst_29 : f32 to vector<8x32xf32>
    %54 = arith.subf %52, %53 : vector<8x32xf32>
    %55 = vector.extract_strided_slice %47 {offsets = [0, 96], sizes = [8, 32], strides = [1, 1]} : vector<8x128xf32> to vector<8x32xf32>
    %56 = arith.mulf %49, %13 : vector<8x32xf32>
    %57 = arith.mulf %48, %54 : vector<8x32xf32>
    %58 = arith.addf %56, %57 : vector<8x32xf32>
    %59 = math.tanh %58 : vector<8x32xf32>
    %60 = arith.mulf %55, %59 : vector<8x32xf32>
    %c1_i32 = arith.constant 1 : i32
    %c8_i32_30 = arith.constant 8 : i32
    %61 = arith.muli %c1_i32, %c8_i32_30 : i32
    %62 = tpu.assume_multiple %61, 8 : i32
    %63 = arith.index_cast %62 : i32 to index
    %c0_31 = arith.constant 0 : index
    %64 = vector.load %arg10[%63, %c0_31] : memref<64x128xf32, #tpu.memory_space<vmem>>, vector<8x128xf32>
    %cst_32 = arith.constant dense<0.000000e+00> : vector<8x128xf32>
    %65 = tpu.matmul %37, %7, %cst_32 {dimension_numbers = #tpu.dot_dimension_numbers<[1], [0], [0], [1], [0, 0, 1, 1], [], []>} : vector<8x32xf32>, vector<32x128xf32>, vector<8x128xf32> -> vector<8x128xf32>
    %66 = arith.addf %64, %65 : vector<8x128xf32>
    %67 = arith.negf %66 : vector<8x128xf32>
    %68 = math.exp %67 : vector<8x128xf32>
    %cst_33 = arith.constant 1.000000e+00 : f32
    %69 = vector.broadcast %cst_33 : f32 to vector<8x128xf32>
    %70 = arith.addf %69, %68 : vector<8x128xf32>
    %71 = arith.divf %69, %70 : vector<8x128xf32>
    %72 = vector.extract_strided_slice %71 {offsets = [0, 0], sizes = [8, 32], strides = [1, 1]} : vector<8x128xf32> to vector<8x32xf32>
    %73 = vector.extract_strided_slice %71 {offsets = [0, 32], sizes = [8, 32], strides = [1, 1]} : vector<8x128xf32> to vector<8x32xf32>
    %74 = vector.extract_strided_slice %71 {offsets = [0, 64], sizes = [8, 32], strides = [1, 1]} : vector<8x128xf32> to vector<8x32xf32>
    %cst_34 = arith.constant 2.000000e+00 : f32
    %75 = vector.broadcast %cst_34 : f32 to vector<8x32xf32>
    %76 = arith.mulf %75, %74 : vector<8x32xf32>
    %cst_35 = arith.constant 1.000000e+00 : f32
    %77 = vector.broadcast %cst_35 : f32 to vector<8x32xf32>
    %78 = arith.subf %76, %77 : vector<8x32xf32>
    %79 = vector.extract_strided_slice %71 {offsets = [0, 96], sizes = [8, 32], strides = [1, 1]} : vector<8x128xf32> to vector<8x32xf32>
    %80 = arith.mulf %73, %35 : vector<8x32xf32>
    %81 = arith.mulf %72, %78 : vector<8x32xf32>
    %82 = arith.addf %80, %81 : vector<8x32xf32>
    %83 = math.tanh %82 : vector<8x32xf32>
    %84 = arith.mulf %79, %83 : vector<8x32xf32>
    %cst_36 = arith.constant dense<0.000000e+00> : vector<8x128xf32>
    %85 = tpu.matmul %84, %8, %cst_36 {dimension_numbers = #tpu.dot_dimension_numbers<[1], [0], [0], [1], [0, 0, 1, 1], [], []>} : vector<8x32xf32>, vector<32x128xf32>, vector<8x128xf32> -> vector<8x128xf32>
    %cst_37 = arith.constant dense<0.000000e+00> : vector<8x128xf32>
    %86 = tpu.matmul %60, %9, %cst_37 {dimension_numbers = #tpu.dot_dimension_numbers<[1], [0], [0], [1], [0, 0, 1, 1], [], []>} : vector<8x32xf32>, vector<32x128xf32>, vector<8x128xf32> -> vector<8x128xf32>
    %87 = arith.addf %85, %86 : vector<8x128xf32>
    %88 = vector.broadcast %10 : vector<1x128xf32> to vector<8x128xf32>
    %89 = arith.addf %87, %88 : vector<8x128xf32>
    %90 = arith.negf %89 : vector<8x128xf32>
    %91 = math.exp %90 : vector<8x128xf32>
    %cst_38 = arith.constant 1.000000e+00 : f32
    %92 = vector.broadcast %cst_38 : f32 to vector<8x128xf32>
    %93 = arith.addf %92, %91 : vector<8x128xf32>
    %94 = arith.divf %92, %93 : vector<8x128xf32>
    %95 = vector.extract_strided_slice %94 {offsets = [0, 0], sizes = [8, 32], strides = [1, 1]} : vector<8x128xf32> to vector<8x32xf32>
    %96 = vector.extract_strided_slice %94 {offsets = [0, 32], sizes = [8, 32], strides = [1, 1]} : vector<8x128xf32> to vector<8x32xf32>
    %97 = vector.extract_strided_slice %94 {offsets = [0, 64], sizes = [8, 32], strides = [1, 1]} : vector<8x128xf32> to vector<8x32xf32>
    %cst_39 = arith.constant 2.000000e+00 : f32
    %98 = vector.broadcast %cst_39 : f32 to vector<8x32xf32>
    %99 = arith.mulf %98, %97 : vector<8x32xf32>
    %cst_40 = arith.constant 1.000000e+00 : f32
    %100 = vector.broadcast %cst_40 : f32 to vector<8x32xf32>
    %101 = arith.subf %99, %100 : vector<8x32xf32>
    %102 = vector.extract_strided_slice %94 {offsets = [0, 96], sizes = [8, 32], strides = [1, 1]} : vector<8x128xf32> to vector<8x32xf32>
    %103 = arith.mulf %96, %58 : vector<8x32xf32>
    %104 = arith.mulf %95, %101 : vector<8x32xf32>
    %105 = arith.addf %103, %104 : vector<8x32xf32>
    %106 = math.tanh %105 : vector<8x32xf32>
    %107 = arith.mulf %102, %106 : vector<8x32xf32>
    %c2_i32 = arith.constant 2 : i32
    %c8_i32_41 = arith.constant 8 : i32
    %108 = arith.muli %c2_i32, %c8_i32_41 : i32
    %109 = tpu.assume_multiple %108, 8 : i32
    %110 = arith.index_cast %109 : i32 to index
    %c0_42 = arith.constant 0 : index
    %111 = vector.load %arg10[%110, %c0_42] : memref<64x128xf32, #tpu.memory_space<vmem>>, vector<8x128xf32>
    %cst_43 = arith.constant dense<0.000000e+00> : vector<8x128xf32>
    %112 = tpu.matmul %84, %7, %cst_43 {dimension_numbers = #tpu.dot_dimension_numbers<[1], [0], [0], [1], [0, 0, 1, 1], [], []>} : vector<8x32xf32>, vector<32x128xf32>, vector<8x128xf32> -> vector<8x128xf32>
    %113 = arith.addf %111, %112 : vector<8x128xf32>
    %114 = arith.negf %113 : vector<8x128xf32>
    %115 = math.exp %114 : vector<8x128xf32>
    %cst_44 = arith.constant 1.000000e+00 : f32
    %116 = vector.broadcast %cst_44 : f32 to vector<8x128xf32>
    %117 = arith.addf %116, %115 : vector<8x128xf32>
    %118 = arith.divf %116, %117 : vector<8x128xf32>
    %119 = vector.extract_strided_slice %118 {offsets = [0, 0], sizes = [8, 32], strides = [1, 1]} : vector<8x128xf32> to vector<8x32xf32>
    %120 = vector.extract_strided_slice %118 {offsets = [0, 32], sizes = [8, 32], strides = [1, 1]} : vector<8x128xf32> to vector<8x32xf32>
    %121 = vector.extract_strided_slice %118 {offsets = [0, 64], sizes = [8, 32], strides = [1, 1]} : vector<8x128xf32> to vector<8x32xf32>
    %cst_45 = arith.constant 2.000000e+00 : f32
    %122 = vector.broadcast %cst_45 : f32 to vector<8x32xf32>
    %123 = arith.mulf %122, %121 : vector<8x32xf32>
    %cst_46 = arith.constant 1.000000e+00 : f32
    %124 = vector.broadcast %cst_46 : f32 to vector<8x32xf32>
    %125 = arith.subf %123, %124 : vector<8x32xf32>
    %126 = vector.extract_strided_slice %118 {offsets = [0, 96], sizes = [8, 32], strides = [1, 1]} : vector<8x128xf32> to vector<8x32xf32>
    %127 = arith.mulf %120, %82 : vector<8x32xf32>
    %128 = arith.mulf %119, %125 : vector<8x32xf32>
    %129 = arith.addf %127, %128 : vector<8x32xf32>
    %130 = math.tanh %129 : vector<8x32xf32>
    %131 = arith.mulf %126, %130 : vector<8x32xf32>
    %cst_47 = arith.constant dense<0.000000e+00> : vector<8x128xf32>
    %132 = tpu.matmul %131, %8, %cst_47 {dimension_numbers = #tpu.dot_dimension_numbers<[1], [0], [0], [1], [0, 0, 1, 1], [], []>} : vector<8x32xf32>, vector<32x128xf32>, vector<8x128xf32> -> vector<8x128xf32>
    %cst_48 = arith.constant dense<0.000000e+00> : vector<8x128xf32>
    %133 = tpu.matmul %107, %9, %cst_48 {dimension_numbers = #tpu.dot_dimension_numbers<[1], [0], [0], [1], [0, 0, 1, 1], [], []>} : vector<8x32xf32>, vector<32x128xf32>, vector<8x128xf32> -> vector<8x128xf32>
    %134 = arith.addf %132, %133 : vector<8x128xf32>
    %135 = vector.broadcast %10 : vector<1x128xf32> to vector<8x128xf32>
    %136 = arith.addf %134, %135 : vector<8x128xf32>
    %137 = arith.negf %136 : vector<8x128xf32>
    %138 = math.exp %137 : vector<8x128xf32>
    %cst_49 = arith.constant 1.000000e+00 : f32
    %139 = vector.broadcast %cst_49 : f32 to vector<8x128xf32>
    %140 = arith.addf %139, %138 : vector<8x128xf32>
    %141 = arith.divf %139, %140 : vector<8x128xf32>
    %142 = vector.extract_strided_slice %141 {offsets = [0, 0], sizes = [8, 32], strides = [1, 1]} : vector<8x128xf32> to vector<8x32xf32>
    %143 = vector.extract_strided_slice %141 {offsets = [0, 32], sizes = [8, 32], strides = [1, 1]} : vector<8x128xf32> to vector<8x32xf32>
    %144 = vector.extract_strided_slice %141 {offsets = [0, 64], sizes = [8, 32], strides = [1, 1]} : vector<8x128xf32> to vector<8x32xf32>
    %cst_50 = arith.constant 2.000000e+00 : f32
    %145 = vector.broadcast %cst_50 : f32 to vector<8x32xf32>
    %146 = arith.mulf %145, %144 : vector<8x32xf32>
    %cst_51 = arith.constant 1.000000e+00 : f32
    %147 = vector.broadcast %cst_51 : f32 to vector<8x32xf32>
    %148 = arith.subf %146, %147 : vector<8x32xf32>
    %149 = vector.extract_strided_slice %141 {offsets = [0, 96], sizes = [8, 32], strides = [1, 1]} : vector<8x128xf32> to vector<8x32xf32>
    %150 = arith.mulf %143, %105 : vector<8x32xf32>
    %151 = arith.mulf %142, %148 : vector<8x32xf32>
    %152 = arith.addf %150, %151 : vector<8x32xf32>
    %153 = math.tanh %152 : vector<8x32xf32>
    %154 = arith.mulf %149, %153 : vector<8x32xf32>
    %c3_i32 = arith.constant 3 : i32
    %c8_i32_52 = arith.constant 8 : i32
    %155 = arith.muli %c3_i32, %c8_i32_52 : i32
    %156 = tpu.assume_multiple %155, 8 : i32
    %157 = arith.index_cast %156 : i32 to index
    %c0_53 = arith.constant 0 : index
    %158 = vector.load %arg10[%157, %c0_53] : memref<64x128xf32, #tpu.memory_space<vmem>>, vector<8x128xf32>
    %cst_54 = arith.constant dense<0.000000e+00> : vector<8x128xf32>
    %159 = tpu.matmul %131, %7, %cst_54 {dimension_numbers = #tpu.dot_dimension_numbers<[1], [0], [0], [1], [0, 0, 1, 1], [], []>} : vector<8x32xf32>, vector<32x128xf32>, vector<8x128xf32> -> vector<8x128xf32>
    %160 = arith.addf %158, %159 : vector<8x128xf32>
    %161 = arith.negf %160 : vector<8x128xf32>
    %162 = math.exp %161 : vector<8x128xf32>
    %cst_55 = arith.constant 1.000000e+00 : f32
    %163 = vector.broadcast %cst_55 : f32 to vector<8x128xf32>
    %164 = arith.addf %163, %162 : vector<8x128xf32>
    %165 = arith.divf %163, %164 : vector<8x128xf32>
    %166 = vector.extract_strided_slice %165 {offsets = [0, 0], sizes = [8, 32], strides = [1, 1]} : vector<8x128xf32> to vector<8x32xf32>
    %167 = vector.extract_strided_slice %165 {offsets = [0, 32], sizes = [8, 32], strides = [1, 1]} : vector<8x128xf32> to vector<8x32xf32>
    %168 = vector.extract_strided_slice %165 {offsets = [0, 64], sizes = [8, 32], strides = [1, 1]} : vector<8x128xf32> to vector<8x32xf32>
    %cst_56 = arith.constant 2.000000e+00 : f32
    %169 = vector.broadcast %cst_56 : f32 to vector<8x32xf32>
    %170 = arith.mulf %169, %168 : vector<8x32xf32>
    %cst_57 = arith.constant 1.000000e+00 : f32
    %171 = vector.broadcast %cst_57 : f32 to vector<8x32xf32>
    %172 = arith.subf %170, %171 : vector<8x32xf32>
    %173 = vector.extract_strided_slice %165 {offsets = [0, 96], sizes = [8, 32], strides = [1, 1]} : vector<8x128xf32> to vector<8x32xf32>
    %174 = arith.mulf %167, %129 : vector<8x32xf32>
    %175 = arith.mulf %166, %172 : vector<8x32xf32>
    %176 = arith.addf %174, %175 : vector<8x32xf32>
    %177 = math.tanh %176 : vector<8x32xf32>
    %178 = arith.mulf %173, %177 : vector<8x32xf32>
    %cst_58 = arith.constant dense<0.000000e+00> : vector<8x128xf32>
    %179 = tpu.matmul %178, %8, %cst_58 {dimension_numbers = #tpu.dot_dimension_numbers<[1], [0], [0], [1], [0, 0, 1, 1], [], []>} : vector<8x32xf32>, vector<32x128xf32>, vector<8x128xf32> -> vector<8x128xf32>
    %cst_59 = arith.constant dense<0.000000e+00> : vector<8x128xf32>
    %180 = tpu.matmul %154, %9, %cst_59 {dimension_numbers = #tpu.dot_dimension_numbers<[1], [0], [0], [1], [0, 0, 1, 1], [], []>} : vector<8x32xf32>, vector<32x128xf32>, vector<8x128xf32> -> vector<8x128xf32>
    %181 = arith.addf %179, %180 : vector<8x128xf32>
    %182 = vector.broadcast %10 : vector<1x128xf32> to vector<8x128xf32>
    %183 = arith.addf %181, %182 : vector<8x128xf32>
    %184 = arith.negf %183 : vector<8x128xf32>
    %185 = math.exp %184 : vector<8x128xf32>
    %cst_60 = arith.constant 1.000000e+00 : f32
    %186 = vector.broadcast %cst_60 : f32 to vector<8x128xf32>
    %187 = arith.addf %186, %185 : vector<8x128xf32>
    %188 = arith.divf %186, %187 : vector<8x128xf32>
    %189 = vector.extract_strided_slice %188 {offsets = [0, 0], sizes = [8, 32], strides = [1, 1]} : vector<8x128xf32> to vector<8x32xf32>
    %190 = vector.extract_strided_slice %188 {offsets = [0, 32], sizes = [8, 32], strides = [1, 1]} : vector<8x128xf32> to vector<8x32xf32>
    %191 = vector.extract_strided_slice %188 {offsets = [0, 64], sizes = [8, 32], strides = [1, 1]} : vector<8x128xf32> to vector<8x32xf32>
    %cst_61 = arith.constant 2.000000e+00 : f32
    %192 = vector.broadcast %cst_61 : f32 to vector<8x32xf32>
    %193 = arith.mulf %192, %191 : vector<8x32xf32>
    %cst_62 = arith.constant 1.000000e+00 : f32
    %194 = vector.broadcast %cst_62 : f32 to vector<8x32xf32>
    %195 = arith.subf %193, %194 : vector<8x32xf32>
    %196 = vector.extract_strided_slice %188 {offsets = [0, 96], sizes = [8, 32], strides = [1, 1]} : vector<8x128xf32> to vector<8x32xf32>
    %197 = arith.mulf %190, %152 : vector<8x32xf32>
    %198 = arith.mulf %189, %195 : vector<8x32xf32>
    %199 = arith.addf %197, %198 : vector<8x32xf32>
    %200 = math.tanh %199 : vector<8x32xf32>
    %201 = arith.mulf %196, %200 : vector<8x32xf32>
    %c4_i32 = arith.constant 4 : i32
    %c8_i32_63 = arith.constant 8 : i32
    %202 = arith.muli %c4_i32, %c8_i32_63 : i32
    %203 = tpu.assume_multiple %202, 8 : i32
    %204 = arith.index_cast %203 : i32 to index
    %c0_64 = arith.constant 0 : index
    %205 = vector.load %arg10[%204, %c0_64] : memref<64x128xf32, #tpu.memory_space<vmem>>, vector<8x128xf32>
    %cst_65 = arith.constant dense<0.000000e+00> : vector<8x128xf32>
    %206 = tpu.matmul %178, %7, %cst_65 {dimension_numbers = #tpu.dot_dimension_numbers<[1], [0], [0], [1], [0, 0, 1, 1], [], []>} : vector<8x32xf32>, vector<32x128xf32>, vector<8x128xf32> -> vector<8x128xf32>
    %207 = arith.addf %205, %206 : vector<8x128xf32>
    %208 = arith.negf %207 : vector<8x128xf32>
    %209 = math.exp %208 : vector<8x128xf32>
    %cst_66 = arith.constant 1.000000e+00 : f32
    %210 = vector.broadcast %cst_66 : f32 to vector<8x128xf32>
    %211 = arith.addf %210, %209 : vector<8x128xf32>
    %212 = arith.divf %210, %211 : vector<8x128xf32>
    %213 = vector.extract_strided_slice %212 {offsets = [0, 0], sizes = [8, 32], strides = [1, 1]} : vector<8x128xf32> to vector<8x32xf32>
    %214 = vector.extract_strided_slice %212 {offsets = [0, 32], sizes = [8, 32], strides = [1, 1]} : vector<8x128xf32> to vector<8x32xf32>
    %215 = vector.extract_strided_slice %212 {offsets = [0, 64], sizes = [8, 32], strides = [1, 1]} : vector<8x128xf32> to vector<8x32xf32>
    %cst_67 = arith.constant 2.000000e+00 : f32
    %216 = vector.broadcast %cst_67 : f32 to vector<8x32xf32>
    %217 = arith.mulf %216, %215 : vector<8x32xf32>
    %cst_68 = arith.constant 1.000000e+00 : f32
    %218 = vector.broadcast %cst_68 : f32 to vector<8x32xf32>
    %219 = arith.subf %217, %218 : vector<8x32xf32>
    %220 = vector.extract_strided_slice %212 {offsets = [0, 96], sizes = [8, 32], strides = [1, 1]} : vector<8x128xf32> to vector<8x32xf32>
    %221 = arith.mulf %214, %176 : vector<8x32xf32>
    %222 = arith.mulf %213, %219 : vector<8x32xf32>
    %223 = arith.addf %221, %222 : vector<8x32xf32>
    %224 = math.tanh %223 : vector<8x32xf32>
    %225 = arith.mulf %220, %224 : vector<8x32xf32>
    %cst_69 = arith.constant dense<0.000000e+00> : vector<8x128xf32>
    %226 = tpu.matmul %225, %8, %cst_69 {dimension_numbers = #tpu.dot_dimension_numbers<[1], [0], [0], [1], [0, 0, 1, 1], [], []>} : vector<8x32xf32>, vector<32x128xf32>, vector<8x128xf32> -> vector<8x128xf32>
    %cst_70 = arith.constant dense<0.000000e+00> : vector<8x128xf32>
    %227 = tpu.matmul %201, %9, %cst_70 {dimension_numbers = #tpu.dot_dimension_numbers<[1], [0], [0], [1], [0, 0, 1, 1], [], []>} : vector<8x32xf32>, vector<32x128xf32>, vector<8x128xf32> -> vector<8x128xf32>
    %228 = arith.addf %226, %227 : vector<8x128xf32>
    %229 = vector.broadcast %10 : vector<1x128xf32> to vector<8x128xf32>
    %230 = arith.addf %228, %229 : vector<8x128xf32>
    %231 = arith.negf %230 : vector<8x128xf32>
    %232 = math.exp %231 : vector<8x128xf32>
    %cst_71 = arith.constant 1.000000e+00 : f32
    %233 = vector.broadcast %cst_71 : f32 to vector<8x128xf32>
    %234 = arith.addf %233, %232 : vector<8x128xf32>
    %235 = arith.divf %233, %234 : vector<8x128xf32>
    %236 = vector.extract_strided_slice %235 {offsets = [0, 0], sizes = [8, 32], strides = [1, 1]} : vector<8x128xf32> to vector<8x32xf32>
    %237 = vector.extract_strided_slice %235 {offsets = [0, 32], sizes = [8, 32], strides = [1, 1]} : vector<8x128xf32> to vector<8x32xf32>
    %238 = vector.extract_strided_slice %235 {offsets = [0, 64], sizes = [8, 32], strides = [1, 1]} : vector<8x128xf32> to vector<8x32xf32>
    %cst_72 = arith.constant 2.000000e+00 : f32
    %239 = vector.broadcast %cst_72 : f32 to vector<8x32xf32>
    %240 = arith.mulf %239, %238 : vector<8x32xf32>
    %cst_73 = arith.constant 1.000000e+00 : f32
    %241 = vector.broadcast %cst_73 : f32 to vector<8x32xf32>
    %242 = arith.subf %240, %241 : vector<8x32xf32>
    %243 = vector.extract_strided_slice %235 {offsets = [0, 96], sizes = [8, 32], strides = [1, 1]} : vector<8x128xf32> to vector<8x32xf32>
    %244 = arith.mulf %237, %199 : vector<8x32xf32>
    %245 = arith.mulf %236, %242 : vector<8x32xf32>
    %246 = arith.addf %244, %245 : vector<8x32xf32>
    %247 = math.tanh %246 : vector<8x32xf32>
    %248 = arith.mulf %243, %247 : vector<8x32xf32>
    %c5_i32 = arith.constant 5 : i32
    %c8_i32_74 = arith.constant 8 : i32
    %249 = arith.muli %c5_i32, %c8_i32_74 : i32
    %250 = tpu.assume_multiple %249, 8 : i32
    %251 = arith.index_cast %250 : i32 to index
    %c0_75 = arith.constant 0 : index
    %252 = vector.load %arg10[%251, %c0_75] : memref<64x128xf32, #tpu.memory_space<vmem>>, vector<8x128xf32>
    %cst_76 = arith.constant dense<0.000000e+00> : vector<8x128xf32>
    %253 = tpu.matmul %225, %7, %cst_76 {dimension_numbers = #tpu.dot_dimension_numbers<[1], [0], [0], [1], [0, 0, 1, 1], [], []>} : vector<8x32xf32>, vector<32x128xf32>, vector<8x128xf32> -> vector<8x128xf32>
    %254 = arith.addf %252, %253 : vector<8x128xf32>
    %255 = arith.negf %254 : vector<8x128xf32>
    %256 = math.exp %255 : vector<8x128xf32>
    %cst_77 = arith.constant 1.000000e+00 : f32
    %257 = vector.broadcast %cst_77 : f32 to vector<8x128xf32>
    %258 = arith.addf %257, %256 : vector<8x128xf32>
    %259 = arith.divf %257, %258 : vector<8x128xf32>
    %260 = vector.extract_strided_slice %259 {offsets = [0, 0], sizes = [8, 32], strides = [1, 1]} : vector<8x128xf32> to vector<8x32xf32>
    %261 = vector.extract_strided_slice %259 {offsets = [0, 32], sizes = [8, 32], strides = [1, 1]} : vector<8x128xf32> to vector<8x32xf32>
    %262 = vector.extract_strided_slice %259 {offsets = [0, 64], sizes = [8, 32], strides = [1, 1]} : vector<8x128xf32> to vector<8x32xf32>
    %cst_78 = arith.constant 2.000000e+00 : f32
    %263 = vector.broadcast %cst_78 : f32 to vector<8x32xf32>
    %264 = arith.mulf %263, %262 : vector<8x32xf32>
    %cst_79 = arith.constant 1.000000e+00 : f32
    %265 = vector.broadcast %cst_79 : f32 to vector<8x32xf32>
    %266 = arith.subf %264, %265 : vector<8x32xf32>
    %267 = vector.extract_strided_slice %259 {offsets = [0, 96], sizes = [8, 32], strides = [1, 1]} : vector<8x128xf32> to vector<8x32xf32>
    %268 = arith.mulf %261, %223 : vector<8x32xf32>
    %269 = arith.mulf %260, %266 : vector<8x32xf32>
    %270 = arith.addf %268, %269 : vector<8x32xf32>
    %271 = math.tanh %270 : vector<8x32xf32>
    %272 = arith.mulf %267, %271 : vector<8x32xf32>
    %cst_80 = arith.constant dense<0.000000e+00> : vector<8x128xf32>
    %273 = tpu.matmul %272, %8, %cst_80 {dimension_numbers = #tpu.dot_dimension_numbers<[1], [0], [0], [1], [0, 0, 1, 1], [], []>} : vector<8x32xf32>, vector<32x128xf32>, vector<8x128xf32> -> vector<8x128xf32>
    %cst_81 = arith.constant dense<0.000000e+00> : vector<8x128xf32>
    %274 = tpu.matmul %248, %9, %cst_81 {dimension_numbers = #tpu.dot_dimension_numbers<[1], [0], [0], [1], [0, 0, 1, 1], [], []>} : vector<8x32xf32>, vector<32x128xf32>, vector<8x128xf32> -> vector<8x128xf32>
    %275 = arith.addf %273, %274 : vector<8x128xf32>
    %276 = vector.broadcast %10 : vector<1x128xf32> to vector<8x128xf32>
    %277 = arith.addf %275, %276 : vector<8x128xf32>
    %278 = arith.negf %277 : vector<8x128xf32>
    %279 = math.exp %278 : vector<8x128xf32>
    %cst_82 = arith.constant 1.000000e+00 : f32
    %280 = vector.broadcast %cst_82 : f32 to vector<8x128xf32>
    %281 = arith.addf %280, %279 : vector<8x128xf32>
    %282 = arith.divf %280, %281 : vector<8x128xf32>
    %283 = vector.extract_strided_slice %282 {offsets = [0, 0], sizes = [8, 32], strides = [1, 1]} : vector<8x128xf32> to vector<8x32xf32>
    %284 = vector.extract_strided_slice %282 {offsets = [0, 32], sizes = [8, 32], strides = [1, 1]} : vector<8x128xf32> to vector<8x32xf32>
    %285 = vector.extract_strided_slice %282 {offsets = [0, 64], sizes = [8, 32], strides = [1, 1]} : vector<8x128xf32> to vector<8x32xf32>
    %cst_83 = arith.constant 2.000000e+00 : f32
    %286 = vector.broadcast %cst_83 : f32 to vector<8x32xf32>
    %287 = arith.mulf %286, %285 : vector<8x32xf32>
    %cst_84 = arith.constant 1.000000e+00 : f32
    %288 = vector.broadcast %cst_84 : f32 to vector<8x32xf32>
    %289 = arith.subf %287, %288 : vector<8x32xf32>
    %290 = vector.extract_strided_slice %282 {offsets = [0, 96], sizes = [8, 32], strides = [1, 1]} : vector<8x128xf32> to vector<8x32xf32>
    %291 = arith.mulf %284, %246 : vector<8x32xf32>
    %292 = arith.mulf %283, %289 : vector<8x32xf32>
    %293 = arith.addf %291, %292 : vector<8x32xf32>
    %294 = math.tanh %293 : vector<8x32xf32>
    %295 = arith.mulf %290, %294 : vector<8x32xf32>
    %c6_i32 = arith.constant 6 : i32
    %c8_i32_85 = arith.constant 8 : i32
    %296 = arith.muli %c6_i32, %c8_i32_85 : i32
    %297 = tpu.assume_multiple %296, 8 : i32
    %298 = arith.index_cast %297 : i32 to index
    %c0_86 = arith.constant 0 : index
    %299 = vector.load %arg10[%298, %c0_86] : memref<64x128xf32, #tpu.memory_space<vmem>>, vector<8x128xf32>
    %cst_87 = arith.constant dense<0.000000e+00> : vector<8x128xf32>
    %300 = tpu.matmul %272, %7, %cst_87 {dimension_numbers = #tpu.dot_dimension_numbers<[1], [0], [0], [1], [0, 0, 1, 1], [], []>} : vector<8x32xf32>, vector<32x128xf32>, vector<8x128xf32> -> vector<8x128xf32>
    %301 = arith.addf %299, %300 : vector<8x128xf32>
    %302 = arith.negf %301 : vector<8x128xf32>
    %303 = math.exp %302 : vector<8x128xf32>
    %cst_88 = arith.constant 1.000000e+00 : f32
    %304 = vector.broadcast %cst_88 : f32 to vector<8x128xf32>
    %305 = arith.addf %304, %303 : vector<8x128xf32>
    %306 = arith.divf %304, %305 : vector<8x128xf32>
    %307 = vector.extract_strided_slice %306 {offsets = [0, 0], sizes = [8, 32], strides = [1, 1]} : vector<8x128xf32> to vector<8x32xf32>
    %308 = vector.extract_strided_slice %306 {offsets = [0, 32], sizes = [8, 32], strides = [1, 1]} : vector<8x128xf32> to vector<8x32xf32>
    %309 = vector.extract_strided_slice %306 {offsets = [0, 64], sizes = [8, 32], strides = [1, 1]} : vector<8x128xf32> to vector<8x32xf32>
    %cst_89 = arith.constant 2.000000e+00 : f32
    %310 = vector.broadcast %cst_89 : f32 to vector<8x32xf32>
    %311 = arith.mulf %310, %309 : vector<8x32xf32>
    %cst_90 = arith.constant 1.000000e+00 : f32
    %312 = vector.broadcast %cst_90 : f32 to vector<8x32xf32>
    %313 = arith.subf %311, %312 : vector<8x32xf32>
    %314 = vector.extract_strided_slice %306 {offsets = [0, 96], sizes = [8, 32], strides = [1, 1]} : vector<8x128xf32> to vector<8x32xf32>
    %315 = arith.mulf %308, %270 : vector<8x32xf32>
    %316 = arith.mulf %307, %313 : vector<8x32xf32>
    %317 = arith.addf %315, %316 : vector<8x32xf32>
    %318 = math.tanh %317 : vector<8x32xf32>
    %319 = arith.mulf %314, %318 : vector<8x32xf32>
    %cst_91 = arith.constant dense<0.000000e+00> : vector<8x128xf32>
    %320 = tpu.matmul %319, %8, %cst_91 {dimension_numbers = #tpu.dot_dimension_numbers<[1], [0], [0], [1], [0, 0, 1, 1], [], []>} : vector<8x32xf32>, vector<32x128xf32>, vector<8x128xf32> -> vector<8x128xf32>
    %cst_92 = arith.constant dense<0.000000e+00> : vector<8x128xf32>
    %321 = tpu.matmul %295, %9, %cst_92 {dimension_numbers = #tpu.dot_dimension_numbers<[1], [0], [0], [1], [0, 0, 1, 1], [], []>} : vector<8x32xf32>, vector<32x128xf32>, vector<8x128xf32> -> vector<8x128xf32>
    %322 = arith.addf %320, %321 : vector<8x128xf32>
    %323 = vector.broadcast %10 : vector<1x128xf32> to vector<8x128xf32>
    %324 = arith.addf %322, %323 : vector<8x128xf32>
    %325 = arith.negf %324 : vector<8x128xf32>
    %326 = math.exp %325 : vector<8x128xf32>
    %cst_93 = arith.constant 1.000000e+00 : f32
    %327 = vector.broadcast %cst_93 : f32 to vector<8x128xf32>
    %328 = arith.addf %327, %326 : vector<8x128xf32>
    %329 = arith.divf %327, %328 : vector<8x128xf32>
    %330 = vector.extract_strided_slice %329 {offsets = [0, 0], sizes = [8, 32], strides = [1, 1]} : vector<8x128xf32> to vector<8x32xf32>
    %331 = vector.extract_strided_slice %329 {offsets = [0, 32], sizes = [8, 32], strides = [1, 1]} : vector<8x128xf32> to vector<8x32xf32>
    %332 = vector.extract_strided_slice %329 {offsets = [0, 64], sizes = [8, 32], strides = [1, 1]} : vector<8x128xf32> to vector<8x32xf32>
    %cst_94 = arith.constant 2.000000e+00 : f32
    %333 = vector.broadcast %cst_94 : f32 to vector<8x32xf32>
    %334 = arith.mulf %333, %332 : vector<8x32xf32>
    %cst_95 = arith.constant 1.000000e+00 : f32
    %335 = vector.broadcast %cst_95 : f32 to vector<8x32xf32>
    %336 = arith.subf %334, %335 : vector<8x32xf32>
    %337 = vector.extract_strided_slice %329 {offsets = [0, 96], sizes = [8, 32], strides = [1, 1]} : vector<8x128xf32> to vector<8x32xf32>
    %338 = arith.mulf %331, %293 : vector<8x32xf32>
    %339 = arith.mulf %330, %336 : vector<8x32xf32>
    %340 = arith.addf %338, %339 : vector<8x32xf32>
    %341 = math.tanh %340 : vector<8x32xf32>
    %342 = arith.mulf %337, %341 : vector<8x32xf32>
    %c7_i32 = arith.constant 7 : i32
    %c8_i32_96 = arith.constant 8 : i32
    %343 = arith.muli %c7_i32, %c8_i32_96 : i32
    %344 = tpu.assume_multiple %343, 8 : i32
    %345 = arith.index_cast %344 : i32 to index
    %c0_97 = arith.constant 0 : index
    %346 = vector.load %arg10[%345, %c0_97] : memref<64x128xf32, #tpu.memory_space<vmem>>, vector<8x128xf32>
    %cst_98 = arith.constant dense<0.000000e+00> : vector<8x128xf32>
    %347 = tpu.matmul %319, %7, %cst_98 {dimension_numbers = #tpu.dot_dimension_numbers<[1], [0], [0], [1], [0, 0, 1, 1], [], []>} : vector<8x32xf32>, vector<32x128xf32>, vector<8x128xf32> -> vector<8x128xf32>
    %348 = arith.addf %346, %347 : vector<8x128xf32>
    %349 = arith.negf %348 : vector<8x128xf32>
    %350 = math.exp %349 : vector<8x128xf32>
    %cst_99 = arith.constant 1.000000e+00 : f32
    %351 = vector.broadcast %cst_99 : f32 to vector<8x128xf32>
    %352 = arith.addf %351, %350 : vector<8x128xf32>
    %353 = arith.divf %351, %352 : vector<8x128xf32>
    %354 = vector.extract_strided_slice %353 {offsets = [0, 0], sizes = [8, 32], strides = [1, 1]} : vector<8x128xf32> to vector<8x32xf32>
    %355 = vector.extract_strided_slice %353 {offsets = [0, 32], sizes = [8, 32], strides = [1, 1]} : vector<8x128xf32> to vector<8x32xf32>
    %356 = vector.extract_strided_slice %353 {offsets = [0, 64], sizes = [8, 32], strides = [1, 1]} : vector<8x128xf32> to vector<8x32xf32>
    %cst_100 = arith.constant 2.000000e+00 : f32
    %357 = vector.broadcast %cst_100 : f32 to vector<8x32xf32>
    %358 = arith.mulf %357, %356 : vector<8x32xf32>
    %cst_101 = arith.constant 1.000000e+00 : f32
    %359 = vector.broadcast %cst_101 : f32 to vector<8x32xf32>
    %360 = arith.subf %358, %359 : vector<8x32xf32>
    %361 = vector.extract_strided_slice %353 {offsets = [0, 96], sizes = [8, 32], strides = [1, 1]} : vector<8x128xf32> to vector<8x32xf32>
    %362 = arith.mulf %355, %317 : vector<8x32xf32>
    %363 = arith.mulf %354, %360 : vector<8x32xf32>
    %364 = arith.addf %362, %363 : vector<8x32xf32>
    %365 = math.tanh %364 : vector<8x32xf32>
    %366 = arith.mulf %361, %365 : vector<8x32xf32>
    %cst_102 = arith.constant dense<0.000000e+00> : vector<8x128xf32>
    %367 = tpu.matmul %366, %8, %cst_102 {dimension_numbers = #tpu.dot_dimension_numbers<[1], [0], [0], [1], [0, 0, 1, 1], [], []>} : vector<8x32xf32>, vector<32x128xf32>, vector<8x128xf32> -> vector<8x128xf32>
    %cst_103 = arith.constant dense<0.000000e+00> : vector<8x128xf32>
    %368 = tpu.matmul %342, %9, %cst_103 {dimension_numbers = #tpu.dot_dimension_numbers<[1], [0], [0], [1], [0, 0, 1, 1], [], []>} : vector<8x32xf32>, vector<32x128xf32>, vector<8x128xf32> -> vector<8x128xf32>
    %369 = arith.addf %367, %368 : vector<8x128xf32>
    %370 = vector.broadcast %10 : vector<1x128xf32> to vector<8x128xf32>
    %371 = arith.addf %369, %370 : vector<8x128xf32>
    %372 = arith.negf %371 : vector<8x128xf32>
    %373 = math.exp %372 : vector<8x128xf32>
    %cst_104 = arith.constant 1.000000e+00 : f32
    %374 = vector.broadcast %cst_104 : f32 to vector<8x128xf32>
    %375 = arith.addf %374, %373 : vector<8x128xf32>
    %376 = arith.divf %374, %375 : vector<8x128xf32>
    %377 = vector.extract_strided_slice %376 {offsets = [0, 0], sizes = [8, 32], strides = [1, 1]} : vector<8x128xf32> to vector<8x32xf32>
    %378 = vector.extract_strided_slice %376 {offsets = [0, 32], sizes = [8, 32], strides = [1, 1]} : vector<8x128xf32> to vector<8x32xf32>
    %379 = vector.extract_strided_slice %376 {offsets = [0, 64], sizes = [8, 32], strides = [1, 1]} : vector<8x128xf32> to vector<8x32xf32>
    %cst_105 = arith.constant 2.000000e+00 : f32
    %380 = vector.broadcast %cst_105 : f32 to vector<8x32xf32>
    %381 = arith.mulf %380, %379 : vector<8x32xf32>
    %cst_106 = arith.constant 1.000000e+00 : f32
    %382 = vector.broadcast %cst_106 : f32 to vector<8x32xf32>
    %383 = arith.subf %381, %382 : vector<8x32xf32>
    %384 = vector.extract_strided_slice %376 {offsets = [0, 96], sizes = [8, 32], strides = [1, 1]} : vector<8x128xf32> to vector<8x32xf32>
    %385 = arith.mulf %378, %340 : vector<8x32xf32>
    %386 = arith.mulf %377, %383 : vector<8x32xf32>
    %387 = arith.addf %385, %386 : vector<8x32xf32>
    %388 = math.tanh %387 : vector<8x32xf32>
    %389 = arith.mulf %384, %388 : vector<8x32xf32>
    %c8_i32_107 = arith.constant 8 : i32
    %c0_i32_108 = arith.constant 0 : i32
    %c4_i32_109 = arith.constant 4 : i32
    %390 = arith.addi %c0_i32_108, %c4_i32_109 : i32
    %c1_i32_110 = arith.constant 1 : i32
    %391:4 = scf.for %arg11 = %c0_i32_108 to %390 step %c1_i32_110 iter_args(%arg12 = %366, %arg13 = %389, %arg14 = %364, %arg15 = %387) -> (vector<8x32xf32>, vector<8x32xf32>, vector<8x32xf32>, vector<8x32xf32>)  : i32 {
      %c0_i32_112 = arith.constant 0 : i32
      %c8_i32_113 = arith.constant 8 : i32
      %392 = arith.muli %c0_i32_112, %c8_i32_113 : i32
      %393 = tpu.assume_multiple %392, 8 : i32
      %394 = arith.index_cast %393 : i32 to index
      %c0_114 = arith.constant 0 : index
      %395 = vector.load %arg10[%394, %c0_114] : memref<64x128xf32, #tpu.memory_space<vmem>>, vector<8x128xf32>
      %cst_115 = arith.constant dense<0.000000e+00> : vector<8x128xf32>
      %396 = tpu.matmul %arg12, %7, %cst_115 {dimension_numbers = #tpu.dot_dimension_numbers<[1], [0], [0], [1], [0, 0, 1, 1], [], []>} : vector<8x32xf32>, vector<32x128xf32>, vector<8x128xf32> -> vector<8x128xf32>
      %397 = arith.addf %395, %396 : vector<8x128xf32>
      %398 = arith.negf %397 : vector<8x128xf32>
      %399 = math.exp %398 : vector<8x128xf32>
      %cst_116 = arith.constant 1.000000e+00 : f32
      %400 = vector.broadcast %cst_116 : f32 to vector<8x128xf32>
      %401 = arith.addf %400, %399 : vector<8x128xf32>
      %402 = arith.divf %400, %401 : vector<8x128xf32>
      %403 = vector.extract_strided_slice %402 {offsets = [0, 0], sizes = [8, 32], strides = [1, 1]} : vector<8x128xf32> to vector<8x32xf32>
      %404 = vector.extract_strided_slice %402 {offsets = [0, 32], sizes = [8, 32], strides = [1, 1]} : vector<8x128xf32> to vector<8x32xf32>
      %405 = vector.extract_strided_slice %402 {offsets = [0, 64], sizes = [8, 32], strides = [1, 1]} : vector<8x128xf32> to vector<8x32xf32>
      %cst_117 = arith.constant 2.000000e+00 : f32
      %406 = vector.broadcast %cst_117 : f32 to vector<8x32xf32>
      %407 = arith.mulf %406, %405 : vector<8x32xf32>
      %cst_118 = arith.constant 1.000000e+00 : f32
      %408 = vector.broadcast %cst_118 : f32 to vector<8x32xf32>
      %409 = arith.subf %407, %408 : vector<8x32xf32>
      %410 = vector.extract_strided_slice %402 {offsets = [0, 96], sizes = [8, 32], strides = [1, 1]} : vector<8x128xf32> to vector<8x32xf32>
      %411 = arith.mulf %404, %arg14 : vector<8x32xf32>
      %412 = arith.mulf %403, %409 : vector<8x32xf32>
      %413 = arith.addf %411, %412 : vector<8x32xf32>
      %414 = math.tanh %413 : vector<8x32xf32>
      %415 = arith.mulf %410, %414 : vector<8x32xf32>
      %cst_119 = arith.constant dense<0.000000e+00> : vector<8x128xf32>
      %416 = tpu.matmul %415, %8, %cst_119 {dimension_numbers = #tpu.dot_dimension_numbers<[1], [0], [0], [1], [0, 0, 1, 1], [], []>} : vector<8x32xf32>, vector<32x128xf32>, vector<8x128xf32> -> vector<8x128xf32>
      %cst_120 = arith.constant dense<0.000000e+00> : vector<8x128xf32>
      %417 = tpu.matmul %arg13, %9, %cst_120 {dimension_numbers = #tpu.dot_dimension_numbers<[1], [0], [0], [1], [0, 0, 1, 1], [], []>} : vector<8x32xf32>, vector<32x128xf32>, vector<8x128xf32> -> vector<8x128xf32>
      %418 = arith.addf %416, %417 : vector<8x128xf32>
      %419 = vector.broadcast %10 : vector<1x128xf32> to vector<8x128xf32>
      %420 = arith.addf %418, %419 : vector<8x128xf32>
      %421 = arith.negf %420 : vector<8x128xf32>
      %422 = math.exp %421 : vector<8x128xf32>
      %cst_121 = arith.constant 1.000000e+00 : f32
      %423 = vector.broadcast %cst_121 : f32 to vector<8x128xf32>
      %424 = arith.addf %423, %422 : vector<8x128xf32>
      %425 = arith.divf %423, %424 : vector<8x128xf32>
      %426 = vector.extract_strided_slice %425 {offsets = [0, 0], sizes = [8, 32], strides = [1, 1]} : vector<8x128xf32> to vector<8x32xf32>
      %427 = vector.extract_strided_slice %425 {offsets = [0, 32], sizes = [8, 32], strides = [1, 1]} : vector<8x128xf32> to vector<8x32xf32>
      %428 = vector.extract_strided_slice %425 {offsets = [0, 64], sizes = [8, 32], strides = [1, 1]} : vector<8x128xf32> to vector<8x32xf32>
      %cst_122 = arith.constant 2.000000e+00 : f32
      %429 = vector.broadcast %cst_122 : f32 to vector<8x32xf32>
      %430 = arith.mulf %429, %428 : vector<8x32xf32>
      %cst_123 = arith.constant 1.000000e+00 : f32
      %431 = vector.broadcast %cst_123 : f32 to vector<8x32xf32>
      %432 = arith.subf %430, %431 : vector<8x32xf32>
      %433 = vector.extract_strided_slice %425 {offsets = [0, 96], sizes = [8, 32], strides = [1, 1]} : vector<8x128xf32> to vector<8x32xf32>
      %434 = arith.mulf %427, %arg15 : vector<8x32xf32>
      %435 = arith.mulf %426, %432 : vector<8x32xf32>
      %436 = arith.addf %434, %435 : vector<8x32xf32>
      %437 = math.tanh %436 : vector<8x32xf32>
      %438 = arith.mulf %433, %437 : vector<8x32xf32>
      %c1_i32_124 = arith.constant 1 : i32
      %c8_i32_125 = arith.constant 8 : i32
      %439 = arith.muli %c1_i32_124, %c8_i32_125 : i32
      %440 = tpu.assume_multiple %439, 8 : i32
      %441 = arith.index_cast %440 : i32 to index
      %c0_126 = arith.constant 0 : index
      %442 = vector.load %arg10[%441, %c0_126] : memref<64x128xf32, #tpu.memory_space<vmem>>, vector<8x128xf32>
      %cst_127 = arith.constant dense<0.000000e+00> : vector<8x128xf32>
      %443 = tpu.matmul %415, %7, %cst_127 {dimension_numbers = #tpu.dot_dimension_numbers<[1], [0], [0], [1], [0, 0, 1, 1], [], []>} : vector<8x32xf32>, vector<32x128xf32>, vector<8x128xf32> -> vector<8x128xf32>
      %444 = arith.addf %442, %443 : vector<8x128xf32>
      %445 = arith.negf %444 : vector<8x128xf32>
      %446 = math.exp %445 : vector<8x128xf32>
      %cst_128 = arith.constant 1.000000e+00 : f32
      %447 = vector.broadcast %cst_128 : f32 to vector<8x128xf32>
      %448 = arith.addf %447, %446 : vector<8x128xf32>
      %449 = arith.divf %447, %448 : vector<8x128xf32>
      %450 = vector.extract_strided_slice %449 {offsets = [0, 0], sizes = [8, 32], strides = [1, 1]} : vector<8x128xf32> to vector<8x32xf32>
      %451 = vector.extract_strided_slice %449 {offsets = [0, 32], sizes = [8, 32], strides = [1, 1]} : vector<8x128xf32> to vector<8x32xf32>
      %452 = vector.extract_strided_slice %449 {offsets = [0, 64], sizes = [8, 32], strides = [1, 1]} : vector<8x128xf32> to vector<8x32xf32>
      %cst_129 = arith.constant 2.000000e+00 : f32
      %453 = vector.broadcast %cst_129 : f32 to vector<8x32xf32>
      %454 = arith.mulf %453, %452 : vector<8x32xf32>
      %cst_130 = arith.constant 1.000000e+00 : f32
      %455 = vector.broadcast %cst_130 : f32 to vector<8x32xf32>
      %456 = arith.subf %454, %455 : vector<8x32xf32>
      %457 = vector.extract_strided_slice %449 {offsets = [0, 96], sizes = [8, 32], strides = [1, 1]} : vector<8x128xf32> to vector<8x32xf32>
      %458 = arith.mulf %451, %413 : vector<8x32xf32>
      %459 = arith.mulf %450, %456 : vector<8x32xf32>
      %460 = arith.addf %458, %459 : vector<8x32xf32>
      %461 = math.tanh %460 : vector<8x32xf32>
      %462 = arith.mulf %457, %461 : vector<8x32xf32>
      %cst_131 = arith.constant dense<0.000000e+00> : vector<8x128xf32>
      %463 = tpu.matmul %462, %8, %cst_131 {dimension_numbers = #tpu.dot_dimension_numbers<[1], [0], [0], [1], [0, 0, 1, 1], [], []>} : vector<8x32xf32>, vector<32x128xf32>, vector<8x128xf32> -> vector<8x128xf32>
      %cst_132 = arith.constant dense<0.000000e+00> : vector<8x128xf32>
      %464 = tpu.matmul %438, %9, %cst_132 {dimension_numbers = #tpu.dot_dimension_numbers<[1], [0], [0], [1], [0, 0, 1, 1], [], []>} : vector<8x32xf32>, vector<32x128xf32>, vector<8x128xf32> -> vector<8x128xf32>
      %465 = arith.addf %463, %464 : vector<8x128xf32>
      %466 = vector.broadcast %10 : vector<1x128xf32> to vector<8x128xf32>
      %467 = arith.addf %465, %466 : vector<8x128xf32>
      %468 = arith.negf %467 : vector<8x128xf32>
      %469 = math.exp %468 : vector<8x128xf32>
      %cst_133 = arith.constant 1.000000e+00 : f32
      %470 = vector.broadcast %cst_133 : f32 to vector<8x128xf32>
      %471 = arith.addf %470, %469 : vector<8x128xf32>
      %472 = arith.divf %470, %471 : vector<8x128xf32>
      %473 = vector.extract_strided_slice %472 {offsets = [0, 0], sizes = [8, 32], strides = [1, 1]} : vector<8x128xf32> to vector<8x32xf32>
      %474 = vector.extract_strided_slice %472 {offsets = [0, 32], sizes = [8, 32], strides = [1, 1]} : vector<8x128xf32> to vector<8x32xf32>
      %475 = vector.extract_strided_slice %472 {offsets = [0, 64], sizes = [8, 32], strides = [1, 1]} : vector<8x128xf32> to vector<8x32xf32>
      %cst_134 = arith.constant 2.000000e+00 : f32
      %476 = vector.broadcast %cst_134 : f32 to vector<8x32xf32>
      %477 = arith.mulf %476, %475 : vector<8x32xf32>
      %cst_135 = arith.constant 1.000000e+00 : f32
      %478 = vector.broadcast %cst_135 : f32 to vector<8x32xf32>
      %479 = arith.subf %477, %478 : vector<8x32xf32>
      %480 = vector.extract_strided_slice %472 {offsets = [0, 96], sizes = [8, 32], strides = [1, 1]} : vector<8x128xf32> to vector<8x32xf32>
      %481 = arith.mulf %474, %436 : vector<8x32xf32>
      %482 = arith.mulf %473, %479 : vector<8x32xf32>
      %483 = arith.addf %481, %482 : vector<8x32xf32>
      %484 = math.tanh %483 : vector<8x32xf32>
      %485 = arith.mulf %480, %484 : vector<8x32xf32>
      %c2_i32_136 = arith.constant 2 : i32
      %c8_i32_137 = arith.constant 8 : i32
      %486 = arith.muli %c2_i32_136, %c8_i32_137 : i32
      %487 = tpu.assume_multiple %486, 8 : i32
      %488 = arith.index_cast %487 : i32 to index
      %c0_138 = arith.constant 0 : index
      %489 = vector.load %arg10[%488, %c0_138] : memref<64x128xf32, #tpu.memory_space<vmem>>, vector<8x128xf32>
      %cst_139 = arith.constant dense<0.000000e+00> : vector<8x128xf32>
      %490 = tpu.matmul %462, %7, %cst_139 {dimension_numbers = #tpu.dot_dimension_numbers<[1], [0], [0], [1], [0, 0, 1, 1], [], []>} : vector<8x32xf32>, vector<32x128xf32>, vector<8x128xf32> -> vector<8x128xf32>
      %491 = arith.addf %489, %490 : vector<8x128xf32>
      %492 = arith.negf %491 : vector<8x128xf32>
      %493 = math.exp %492 : vector<8x128xf32>
      %cst_140 = arith.constant 1.000000e+00 : f32
      %494 = vector.broadcast %cst_140 : f32 to vector<8x128xf32>
      %495 = arith.addf %494, %493 : vector<8x128xf32>
      %496 = arith.divf %494, %495 : vector<8x128xf32>
      %497 = vector.extract_strided_slice %496 {offsets = [0, 0], sizes = [8, 32], strides = [1, 1]} : vector<8x128xf32> to vector<8x32xf32>
      %498 = vector.extract_strided_slice %496 {offsets = [0, 32], sizes = [8, 32], strides = [1, 1]} : vector<8x128xf32> to vector<8x32xf32>
      %499 = vector.extract_strided_slice %496 {offsets = [0, 64], sizes = [8, 32], strides = [1, 1]} : vector<8x128xf32> to vector<8x32xf32>
      %cst_141 = arith.constant 2.000000e+00 : f32
      %500 = vector.broadcast %cst_141 : f32 to vector<8x32xf32>
      %501 = arith.mulf %500, %499 : vector<8x32xf32>
      %cst_142 = arith.constant 1.000000e+00 : f32
      %502 = vector.broadcast %cst_142 : f32 to vector<8x32xf32>
      %503 = arith.subf %501, %502 : vector<8x32xf32>
      %504 = vector.extract_strided_slice %496 {offsets = [0, 96], sizes = [8, 32], strides = [1, 1]} : vector<8x128xf32> to vector<8x32xf32>
      %505 = arith.mulf %498, %460 : vector<8x32xf32>
      %506 = arith.mulf %497, %503 : vector<8x32xf32>
      %507 = arith.addf %505, %506 : vector<8x32xf32>
      %508 = math.tanh %507 : vector<8x32xf32>
      %509 = arith.mulf %504, %508 : vector<8x32xf32>
      %cst_143 = arith.constant dense<0.000000e+00> : vector<8x128xf32>
      %510 = tpu.matmul %509, %8, %cst_143 {dimension_numbers = #tpu.dot_dimension_numbers<[1], [0], [0], [1], [0, 0, 1, 1], [], []>} : vector<8x32xf32>, vector<32x128xf32>, vector<8x128xf32> -> vector<8x128xf32>
      %cst_144 = arith.constant dense<0.000000e+00> : vector<8x128xf32>
      %511 = tpu.matmul %485, %9, %cst_144 {dimension_numbers = #tpu.dot_dimension_numbers<[1], [0], [0], [1], [0, 0, 1, 1], [], []>} : vector<8x32xf32>, vector<32x128xf32>, vector<8x128xf32> -> vector<8x128xf32>
      %512 = arith.addf %510, %511 : vector<8x128xf32>
      %513 = vector.broadcast %10 : vector<1x128xf32> to vector<8x128xf32>
      %514 = arith.addf %512, %513 : vector<8x128xf32>
      %515 = arith.negf %514 : vector<8x128xf32>
      %516 = math.exp %515 : vector<8x128xf32>
      %cst_145 = arith.constant 1.000000e+00 : f32
      %517 = vector.broadcast %cst_145 : f32 to vector<8x128xf32>
      %518 = arith.addf %517, %516 : vector<8x128xf32>
      %519 = arith.divf %517, %518 : vector<8x128xf32>
      %520 = vector.extract_strided_slice %519 {offsets = [0, 0], sizes = [8, 32], strides = [1, 1]} : vector<8x128xf32> to vector<8x32xf32>
      %521 = vector.extract_strided_slice %519 {offsets = [0, 32], sizes = [8, 32], strides = [1, 1]} : vector<8x128xf32> to vector<8x32xf32>
      %522 = vector.extract_strided_slice %519 {offsets = [0, 64], sizes = [8, 32], strides = [1, 1]} : vector<8x128xf32> to vector<8x32xf32>
      %cst_146 = arith.constant 2.000000e+00 : f32
      %523 = vector.broadcast %cst_146 : f32 to vector<8x32xf32>
      %524 = arith.mulf %523, %522 : vector<8x32xf32>
      %cst_147 = arith.constant 1.000000e+00 : f32
      %525 = vector.broadcast %cst_147 : f32 to vector<8x32xf32>
      %526 = arith.subf %524, %525 : vector<8x32xf32>
      %527 = vector.extract_strided_slice %519 {offsets = [0, 96], sizes = [8, 32], strides = [1, 1]} : vector<8x128xf32> to vector<8x32xf32>
      %528 = arith.mulf %521, %483 : vector<8x32xf32>
      %529 = arith.mulf %520, %526 : vector<8x32xf32>
      %530 = arith.addf %528, %529 : vector<8x32xf32>
      %531 = math.tanh %530 : vector<8x32xf32>
      %532 = arith.mulf %527, %531 : vector<8x32xf32>
      %c3_i32_148 = arith.constant 3 : i32
      %c8_i32_149 = arith.constant 8 : i32
      %533 = arith.muli %c3_i32_148, %c8_i32_149 : i32
      %534 = tpu.assume_multiple %533, 8 : i32
      %535 = arith.index_cast %534 : i32 to index
      %c0_150 = arith.constant 0 : index
      %536 = vector.load %arg10[%535, %c0_150] : memref<64x128xf32, #tpu.memory_space<vmem>>, vector<8x128xf32>
      %cst_151 = arith.constant dense<0.000000e+00> : vector<8x128xf32>
      %537 = tpu.matmul %509, %7, %cst_151 {dimension_numbers = #tpu.dot_dimension_numbers<[1], [0], [0], [1], [0, 0, 1, 1], [], []>} : vector<8x32xf32>, vector<32x128xf32>, vector<8x128xf32> -> vector<8x128xf32>
      %538 = arith.addf %536, %537 : vector<8x128xf32>
      %539 = arith.negf %538 : vector<8x128xf32>
      %540 = math.exp %539 : vector<8x128xf32>
      %cst_152 = arith.constant 1.000000e+00 : f32
      %541 = vector.broadcast %cst_152 : f32 to vector<8x128xf32>
      %542 = arith.addf %541, %540 : vector<8x128xf32>
      %543 = arith.divf %541, %542 : vector<8x128xf32>
      %544 = vector.extract_strided_slice %543 {offsets = [0, 0], sizes = [8, 32], strides = [1, 1]} : vector<8x128xf32> to vector<8x32xf32>
      %545 = vector.extract_strided_slice %543 {offsets = [0, 32], sizes = [8, 32], strides = [1, 1]} : vector<8x128xf32> to vector<8x32xf32>
      %546 = vector.extract_strided_slice %543 {offsets = [0, 64], sizes = [8, 32], strides = [1, 1]} : vector<8x128xf32> to vector<8x32xf32>
      %cst_153 = arith.constant 2.000000e+00 : f32
      %547 = vector.broadcast %cst_153 : f32 to vector<8x32xf32>
      %548 = arith.mulf %547, %546 : vector<8x32xf32>
      %cst_154 = arith.constant 1.000000e+00 : f32
      %549 = vector.broadcast %cst_154 : f32 to vector<8x32xf32>
      %550 = arith.subf %548, %549 : vector<8x32xf32>
      %551 = vector.extract_strided_slice %543 {offsets = [0, 96], sizes = [8, 32], strides = [1, 1]} : vector<8x128xf32> to vector<8x32xf32>
      %552 = arith.mulf %545, %507 : vector<8x32xf32>
      %553 = arith.mulf %544, %550 : vector<8x32xf32>
      %554 = arith.addf %552, %553 : vector<8x32xf32>
      %555 = math.tanh %554 : vector<8x32xf32>
      %556 = arith.mulf %551, %555 : vector<8x32xf32>
      %cst_155 = arith.constant dense<0.000000e+00> : vector<8x128xf32>
      %557 = tpu.matmul %556, %8, %cst_155 {dimension_numbers = #tpu.dot_dimension_numbers<[1], [0], [0], [1], [0, 0, 1, 1], [], []>} : vector<8x32xf32>, vector<32x128xf32>, vector<8x128xf32> -> vector<8x128xf32>
      %cst_156 = arith.constant dense<0.000000e+00> : vector<8x128xf32>
      %558 = tpu.matmul %532, %9, %cst_156 {dimension_numbers = #tpu.dot_dimension_numbers<[1], [0], [0], [1], [0, 0, 1, 1], [], []>} : vector<8x32xf32>, vector<32x128xf32>, vector<8x128xf32> -> vector<8x128xf32>
      %559 = arith.addf %557, %558 : vector<8x128xf32>
      %560 = vector.broadcast %10 : vector<1x128xf32> to vector<8x128xf32>
      %561 = arith.addf %559, %560 : vector<8x128xf32>
      %562 = arith.negf %561 : vector<8x128xf32>
      %563 = math.exp %562 : vector<8x128xf32>
      %cst_157 = arith.constant 1.000000e+00 : f32
      %564 = vector.broadcast %cst_157 : f32 to vector<8x128xf32>
      %565 = arith.addf %564, %563 : vector<8x128xf32>
      %566 = arith.divf %564, %565 : vector<8x128xf32>
      %567 = vector.extract_strided_slice %566 {offsets = [0, 0], sizes = [8, 32], strides = [1, 1]} : vector<8x128xf32> to vector<8x32xf32>
      %568 = vector.extract_strided_slice %566 {offsets = [0, 32], sizes = [8, 32], strides = [1, 1]} : vector<8x128xf32> to vector<8x32xf32>
      %569 = vector.extract_strided_slice %566 {offsets = [0, 64], sizes = [8, 32], strides = [1, 1]} : vector<8x128xf32> to vector<8x32xf32>
      %cst_158 = arith.constant 2.000000e+00 : f32
      %570 = vector.broadcast %cst_158 : f32 to vector<8x32xf32>
      %571 = arith.mulf %570, %569 : vector<8x32xf32>
      %cst_159 = arith.constant 1.000000e+00 : f32
      %572 = vector.broadcast %cst_159 : f32 to vector<8x32xf32>
      %573 = arith.subf %571, %572 : vector<8x32xf32>
      %574 = vector.extract_strided_slice %566 {offsets = [0, 96], sizes = [8, 32], strides = [1, 1]} : vector<8x128xf32> to vector<8x32xf32>
      %575 = arith.mulf %568, %530 : vector<8x32xf32>
      %576 = arith.mulf %567, %573 : vector<8x32xf32>
      %577 = arith.addf %575, %576 : vector<8x32xf32>
      %578 = math.tanh %577 : vector<8x32xf32>
      %579 = arith.mulf %574, %578 : vector<8x32xf32>
      %c4_i32_160 = arith.constant 4 : i32
      %c8_i32_161 = arith.constant 8 : i32
      %580 = arith.muli %c4_i32_160, %c8_i32_161 : i32
      %581 = tpu.assume_multiple %580, 8 : i32
      %582 = arith.index_cast %581 : i32 to index
      %c0_162 = arith.constant 0 : index
      %583 = vector.load %arg10[%582, %c0_162] : memref<64x128xf32, #tpu.memory_space<vmem>>, vector<8x128xf32>
      %cst_163 = arith.constant dense<0.000000e+00> : vector<8x128xf32>
      %584 = tpu.matmul %556, %7, %cst_163 {dimension_numbers = #tpu.dot_dimension_numbers<[1], [0], [0], [1], [0, 0, 1, 1], [], []>} : vector<8x32xf32>, vector<32x128xf32>, vector<8x128xf32> -> vector<8x128xf32>
      %585 = arith.addf %583, %584 : vector<8x128xf32>
      %586 = arith.negf %585 : vector<8x128xf32>
      %587 = math.exp %586 : vector<8x128xf32>
      %cst_164 = arith.constant 1.000000e+00 : f32
      %588 = vector.broadcast %cst_164 : f32 to vector<8x128xf32>
      %589 = arith.addf %588, %587 : vector<8x128xf32>
      %590 = arith.divf %588, %589 : vector<8x128xf32>
      %591 = vector.extract_strided_slice %590 {offsets = [0, 0], sizes = [8, 32], strides = [1, 1]} : vector<8x128xf32> to vector<8x32xf32>
      %592 = vector.extract_strided_slice %590 {offsets = [0, 32], sizes = [8, 32], strides = [1, 1]} : vector<8x128xf32> to vector<8x32xf32>
      %593 = vector.extract_strided_slice %590 {offsets = [0, 64], sizes = [8, 32], strides = [1, 1]} : vector<8x128xf32> to vector<8x32xf32>
      %cst_165 = arith.constant 2.000000e+00 : f32
      %594 = vector.broadcast %cst_165 : f32 to vector<8x32xf32>
      %595 = arith.mulf %594, %593 : vector<8x32xf32>
      %cst_166 = arith.constant 1.000000e+00 : f32
      %596 = vector.broadcast %cst_166 : f32 to vector<8x32xf32>
      %597 = arith.subf %595, %596 : vector<8x32xf32>
      %598 = vector.extract_strided_slice %590 {offsets = [0, 96], sizes = [8, 32], strides = [1, 1]} : vector<8x128xf32> to vector<8x32xf32>
      %599 = arith.mulf %592, %554 : vector<8x32xf32>
      %600 = arith.mulf %591, %597 : vector<8x32xf32>
      %601 = arith.addf %599, %600 : vector<8x32xf32>
      %602 = math.tanh %601 : vector<8x32xf32>
      %603 = arith.mulf %598, %602 : vector<8x32xf32>
      %cst_167 = arith.constant dense<0.000000e+00> : vector<8x128xf32>
      %604 = tpu.matmul %603, %8, %cst_167 {dimension_numbers = #tpu.dot_dimension_numbers<[1], [0], [0], [1], [0, 0, 1, 1], [], []>} : vector<8x32xf32>, vector<32x128xf32>, vector<8x128xf32> -> vector<8x128xf32>
      %cst_168 = arith.constant dense<0.000000e+00> : vector<8x128xf32>
      %605 = tpu.matmul %579, %9, %cst_168 {dimension_numbers = #tpu.dot_dimension_numbers<[1], [0], [0], [1], [0, 0, 1, 1], [], []>} : vector<8x32xf32>, vector<32x128xf32>, vector<8x128xf32> -> vector<8x128xf32>
      %606 = arith.addf %604, %605 : vector<8x128xf32>
      %607 = vector.broadcast %10 : vector<1x128xf32> to vector<8x128xf32>
      %608 = arith.addf %606, %607 : vector<8x128xf32>
      %609 = arith.negf %608 : vector<8x128xf32>
      %610 = math.exp %609 : vector<8x128xf32>
      %cst_169 = arith.constant 1.000000e+00 : f32
      %611 = vector.broadcast %cst_169 : f32 to vector<8x128xf32>
      %612 = arith.addf %611, %610 : vector<8x128xf32>
      %613 = arith.divf %611, %612 : vector<8x128xf32>
      %614 = vector.extract_strided_slice %613 {offsets = [0, 0], sizes = [8, 32], strides = [1, 1]} : vector<8x128xf32> to vector<8x32xf32>
      %615 = vector.extract_strided_slice %613 {offsets = [0, 32], sizes = [8, 32], strides = [1, 1]} : vector<8x128xf32> to vector<8x32xf32>
      %616 = vector.extract_strided_slice %613 {offsets = [0, 64], sizes = [8, 32], strides = [1, 1]} : vector<8x128xf32> to vector<8x32xf32>
      %cst_170 = arith.constant 2.000000e+00 : f32
      %617 = vector.broadcast %cst_170 : f32 to vector<8x32xf32>
      %618 = arith.mulf %617, %616 : vector<8x32xf32>
      %cst_171 = arith.constant 1.000000e+00 : f32
      %619 = vector.broadcast %cst_171 : f32 to vector<8x32xf32>
      %620 = arith.subf %618, %619 : vector<8x32xf32>
      %621 = vector.extract_strided_slice %613 {offsets = [0, 96], sizes = [8, 32], strides = [1, 1]} : vector<8x128xf32> to vector<8x32xf32>
      %622 = arith.mulf %615, %577 : vector<8x32xf32>
      %623 = arith.mulf %614, %620 : vector<8x32xf32>
      %624 = arith.addf %622, %623 : vector<8x32xf32>
      %625 = math.tanh %624 : vector<8x32xf32>
      %626 = arith.mulf %621, %625 : vector<8x32xf32>
      %c5_i32_172 = arith.constant 5 : i32
      %c8_i32_173 = arith.constant 8 : i32
      %627 = arith.muli %c5_i32_172, %c8_i32_173 : i32
      %628 = tpu.assume_multiple %627, 8 : i32
      %629 = arith.index_cast %628 : i32 to index
      %c0_174 = arith.constant 0 : index
      %630 = vector.load %arg10[%629, %c0_174] : memref<64x128xf32, #tpu.memory_space<vmem>>, vector<8x128xf32>
      %cst_175 = arith.constant dense<0.000000e+00> : vector<8x128xf32>
      %631 = tpu.matmul %603, %7, %cst_175 {dimension_numbers = #tpu.dot_dimension_numbers<[1], [0], [0], [1], [0, 0, 1, 1], [], []>} : vector<8x32xf32>, vector<32x128xf32>, vector<8x128xf32> -> vector<8x128xf32>
      %632 = arith.addf %630, %631 : vector<8x128xf32>
      %633 = arith.negf %632 : vector<8x128xf32>
      %634 = math.exp %633 : vector<8x128xf32>
      %cst_176 = arith.constant 1.000000e+00 : f32
      %635 = vector.broadcast %cst_176 : f32 to vector<8x128xf32>
      %636 = arith.addf %635, %634 : vector<8x128xf32>
      %637 = arith.divf %635, %636 : vector<8x128xf32>
      %638 = vector.extract_strided_slice %637 {offsets = [0, 0], sizes = [8, 32], strides = [1, 1]} : vector<8x128xf32> to vector<8x32xf32>
      %639 = vector.extract_strided_slice %637 {offsets = [0, 32], sizes = [8, 32], strides = [1, 1]} : vector<8x128xf32> to vector<8x32xf32>
      %640 = vector.extract_strided_slice %637 {offsets = [0, 64], sizes = [8, 32], strides = [1, 1]} : vector<8x128xf32> to vector<8x32xf32>
      %cst_177 = arith.constant 2.000000e+00 : f32
      %641 = vector.broadcast %cst_177 : f32 to vector<8x32xf32>
      %642 = arith.mulf %641, %640 : vector<8x32xf32>
      %cst_178 = arith.constant 1.000000e+00 : f32
      %643 = vector.broadcast %cst_178 : f32 to vector<8x32xf32>
      %644 = arith.subf %642, %643 : vector<8x32xf32>
      %645 = vector.extract_strided_slice %637 {offsets = [0, 96], sizes = [8, 32], strides = [1, 1]} : vector<8x128xf32> to vector<8x32xf32>
      %646 = arith.mulf %639, %601 : vector<8x32xf32>
      %647 = arith.mulf %638, %644 : vector<8x32xf32>
      %648 = arith.addf %646, %647 : vector<8x32xf32>
      %649 = math.tanh %648 : vector<8x32xf32>
      %650 = arith.mulf %645, %649 : vector<8x32xf32>
      %cst_179 = arith.constant dense<0.000000e+00> : vector<8x128xf32>
      %651 = tpu.matmul %650, %8, %cst_179 {dimension_numbers = #tpu.dot_dimension_numbers<[1], [0], [0], [1], [0, 0, 1, 1], [], []>} : vector<8x32xf32>, vector<32x128xf32>, vector<8x128xf32> -> vector<8x128xf32>
      %cst_180 = arith.constant dense<0.000000e+00> : vector<8x128xf32>
      %652 = tpu.matmul %626, %9, %cst_180 {dimension_numbers = #tpu.dot_dimension_numbers<[1], [0], [0], [1], [0, 0, 1, 1], [], []>} : vector<8x32xf32>, vector<32x128xf32>, vector<8x128xf32> -> vector<8x128xf32>
      %653 = arith.addf %651, %652 : vector<8x128xf32>
      %654 = vector.broadcast %10 : vector<1x128xf32> to vector<8x128xf32>
      %655 = arith.addf %653, %654 : vector<8x128xf32>
      %656 = arith.negf %655 : vector<8x128xf32>
      %657 = math.exp %656 : vector<8x128xf32>
      %cst_181 = arith.constant 1.000000e+00 : f32
      %658 = vector.broadcast %cst_181 : f32 to vector<8x128xf32>
      %659 = arith.addf %658, %657 : vector<8x128xf32>
      %660 = arith.divf %658, %659 : vector<8x128xf32>
      %661 = vector.extract_strided_slice %660 {offsets = [0, 0], sizes = [8, 32], strides = [1, 1]} : vector<8x128xf32> to vector<8x32xf32>
      %662 = vector.extract_strided_slice %660 {offsets = [0, 32], sizes = [8, 32], strides = [1, 1]} : vector<8x128xf32> to vector<8x32xf32>
      %663 = vector.extract_strided_slice %660 {offsets = [0, 64], sizes = [8, 32], strides = [1, 1]} : vector<8x128xf32> to vector<8x32xf32>
      %cst_182 = arith.constant 2.000000e+00 : f32
      %664 = vector.broadcast %cst_182 : f32 to vector<8x32xf32>
      %665 = arith.mulf %664, %663 : vector<8x32xf32>
      %cst_183 = arith.constant 1.000000e+00 : f32
      %666 = vector.broadcast %cst_183 : f32 to vector<8x32xf32>
      %667 = arith.subf %665, %666 : vector<8x32xf32>
      %668 = vector.extract_strided_slice %660 {offsets = [0, 96], sizes = [8, 32], strides = [1, 1]} : vector<8x128xf32> to vector<8x32xf32>
      %669 = arith.mulf %662, %624 : vector<8x32xf32>
      %670 = arith.mulf %661, %667 : vector<8x32xf32>
      %671 = arith.addf %669, %670 : vector<8x32xf32>
      %672 = math.tanh %671 : vector<8x32xf32>
      %673 = arith.mulf %668, %672 : vector<8x32xf32>
      %c6_i32_184 = arith.constant 6 : i32
      %c8_i32_185 = arith.constant 8 : i32
      %674 = arith.muli %c6_i32_184, %c8_i32_185 : i32
      %675 = tpu.assume_multiple %674, 8 : i32
      %676 = arith.index_cast %675 : i32 to index
      %c0_186 = arith.constant 0 : index
      %677 = vector.load %arg10[%676, %c0_186] : memref<64x128xf32, #tpu.memory_space<vmem>>, vector<8x128xf32>
      %cst_187 = arith.constant dense<0.000000e+00> : vector<8x128xf32>
      %678 = tpu.matmul %650, %7, %cst_187 {dimension_numbers = #tpu.dot_dimension_numbers<[1], [0], [0], [1], [0, 0, 1, 1], [], []>} : vector<8x32xf32>, vector<32x128xf32>, vector<8x128xf32> -> vector<8x128xf32>
      %679 = arith.addf %677, %678 : vector<8x128xf32>
      %680 = arith.negf %679 : vector<8x128xf32>
      %681 = math.exp %680 : vector<8x128xf32>
      %cst_188 = arith.constant 1.000000e+00 : f32
      %682 = vector.broadcast %cst_188 : f32 to vector<8x128xf32>
      %683 = arith.addf %682, %681 : vector<8x128xf32>
      %684 = arith.divf %682, %683 : vector<8x128xf32>
      %685 = vector.extract_strided_slice %684 {offsets = [0, 0], sizes = [8, 32], strides = [1, 1]} : vector<8x128xf32> to vector<8x32xf32>
      %686 = vector.extract_strided_slice %684 {offsets = [0, 32], sizes = [8, 32], strides = [1, 1]} : vector<8x128xf32> to vector<8x32xf32>
      %687 = vector.extract_strided_slice %684 {offsets = [0, 64], sizes = [8, 32], strides = [1, 1]} : vector<8x128xf32> to vector<8x32xf32>
      %cst_189 = arith.constant 2.000000e+00 : f32
      %688 = vector.broadcast %cst_189 : f32 to vector<8x32xf32>
      %689 = arith.mulf %688, %687 : vector<8x32xf32>
      %cst_190 = arith.constant 1.000000e+00 : f32
      %690 = vector.broadcast %cst_190 : f32 to vector<8x32xf32>
      %691 = arith.subf %689, %690 : vector<8x32xf32>
      %692 = vector.extract_strided_slice %684 {offsets = [0, 96], sizes = [8, 32], strides = [1, 1]} : vector<8x128xf32> to vector<8x32xf32>
      %693 = arith.mulf %686, %648 : vector<8x32xf32>
      %694 = arith.mulf %685, %691 : vector<8x32xf32>
      %695 = arith.addf %693, %694 : vector<8x32xf32>
      %696 = math.tanh %695 : vector<8x32xf32>
      %697 = arith.mulf %692, %696 : vector<8x32xf32>
      %cst_191 = arith.constant dense<0.000000e+00> : vector<8x128xf32>
      %698 = tpu.matmul %697, %8, %cst_191 {dimension_numbers = #tpu.dot_dimension_numbers<[1], [0], [0], [1], [0, 0, 1, 1], [], []>} : vector<8x32xf32>, vector<32x128xf32>, vector<8x128xf32> -> vector<8x128xf32>
      %cst_192 = arith.constant dense<0.000000e+00> : vector<8x128xf32>
      %699 = tpu.matmul %673, %9, %cst_192 {dimension_numbers = #tpu.dot_dimension_numbers<[1], [0], [0], [1], [0, 0, 1, 1], [], []>} : vector<8x32xf32>, vector<32x128xf32>, vector<8x128xf32> -> vector<8x128xf32>
      %700 = arith.addf %698, %699 : vector<8x128xf32>
      %701 = vector.broadcast %10 : vector<1x128xf32> to vector<8x128xf32>
      %702 = arith.addf %700, %701 : vector<8x128xf32>
      %703 = arith.negf %702 : vector<8x128xf32>
      %704 = math.exp %703 : vector<8x128xf32>
      %cst_193 = arith.constant 1.000000e+00 : f32
      %705 = vector.broadcast %cst_193 : f32 to vector<8x128xf32>
      %706 = arith.addf %705, %704 : vector<8x128xf32>
      %707 = arith.divf %705, %706 : vector<8x128xf32>
      %708 = vector.extract_strided_slice %707 {offsets = [0, 0], sizes = [8, 32], strides = [1, 1]} : vector<8x128xf32> to vector<8x32xf32>
      %709 = vector.extract_strided_slice %707 {offsets = [0, 32], sizes = [8, 32], strides = [1, 1]} : vector<8x128xf32> to vector<8x32xf32>
      %710 = vector.extract_strided_slice %707 {offsets = [0, 64], sizes = [8, 32], strides = [1, 1]} : vector<8x128xf32> to vector<8x32xf32>
      %cst_194 = arith.constant 2.000000e+00 : f32
      %711 = vector.broadcast %cst_194 : f32 to vector<8x32xf32>
      %712 = arith.mulf %711, %710 : vector<8x32xf32>
      %cst_195 = arith.constant 1.000000e+00 : f32
      %713 = vector.broadcast %cst_195 : f32 to vector<8x32xf32>
      %714 = arith.subf %712, %713 : vector<8x32xf32>
      %715 = vector.extract_strided_slice %707 {offsets = [0, 96], sizes = [8, 32], strides = [1, 1]} : vector<8x128xf32> to vector<8x32xf32>
      %716 = arith.mulf %709, %671 : vector<8x32xf32>
      %717 = arith.mulf %708, %714 : vector<8x32xf32>
      %718 = arith.addf %716, %717 : vector<8x32xf32>
      %719 = math.tanh %718 : vector<8x32xf32>
      %720 = arith.mulf %715, %719 : vector<8x32xf32>
      %c7_i32_196 = arith.constant 7 : i32
      %c8_i32_197 = arith.constant 8 : i32
      %721 = arith.muli %c7_i32_196, %c8_i32_197 : i32
      %722 = tpu.assume_multiple %721, 8 : i32
      %723 = arith.index_cast %722 : i32 to index
      %c0_198 = arith.constant 0 : index
      %724 = vector.load %arg10[%723, %c0_198] : memref<64x128xf32, #tpu.memory_space<vmem>>, vector<8x128xf32>
      %cst_199 = arith.constant dense<0.000000e+00> : vector<8x128xf32>
      %725 = tpu.matmul %697, %7, %cst_199 {dimension_numbers = #tpu.dot_dimension_numbers<[1], [0], [0], [1], [0, 0, 1, 1], [], []>} : vector<8x32xf32>, vector<32x128xf32>, vector<8x128xf32> -> vector<8x128xf32>
      %726 = arith.addf %724, %725 : vector<8x128xf32>
      %727 = arith.negf %726 : vector<8x128xf32>
      %728 = math.exp %727 : vector<8x128xf32>
      %cst_200 = arith.constant 1.000000e+00 : f32
      %729 = vector.broadcast %cst_200 : f32 to vector<8x128xf32>
      %730 = arith.addf %729, %728 : vector<8x128xf32>
      %731 = arith.divf %729, %730 : vector<8x128xf32>
      %732 = vector.extract_strided_slice %731 {offsets = [0, 0], sizes = [8, 32], strides = [1, 1]} : vector<8x128xf32> to vector<8x32xf32>
      %733 = vector.extract_strided_slice %731 {offsets = [0, 32], sizes = [8, 32], strides = [1, 1]} : vector<8x128xf32> to vector<8x32xf32>
      %734 = vector.extract_strided_slice %731 {offsets = [0, 64], sizes = [8, 32], strides = [1, 1]} : vector<8x128xf32> to vector<8x32xf32>
      %cst_201 = arith.constant 2.000000e+00 : f32
      %735 = vector.broadcast %cst_201 : f32 to vector<8x32xf32>
      %736 = arith.mulf %735, %734 : vector<8x32xf32>
      %cst_202 = arith.constant 1.000000e+00 : f32
      %737 = vector.broadcast %cst_202 : f32 to vector<8x32xf32>
      %738 = arith.subf %736, %737 : vector<8x32xf32>
      %739 = vector.extract_strided_slice %731 {offsets = [0, 96], sizes = [8, 32], strides = [1, 1]} : vector<8x128xf32> to vector<8x32xf32>
      %740 = arith.mulf %733, %695 : vector<8x32xf32>
      %741 = arith.mulf %732, %738 : vector<8x32xf32>
      %742 = arith.addf %740, %741 : vector<8x32xf32>
      %743 = math.tanh %742 : vector<8x32xf32>
      %744 = arith.mulf %739, %743 : vector<8x32xf32>
      %cst_203 = arith.constant dense<0.000000e+00> : vector<8x128xf32>
      %745 = tpu.matmul %744, %8, %cst_203 {dimension_numbers = #tpu.dot_dimension_numbers<[1], [0], [0], [1], [0, 0, 1, 1], [], []>} : vector<8x32xf32>, vector<32x128xf32>, vector<8x128xf32> -> vector<8x128xf32>
      %cst_204 = arith.constant dense<0.000000e+00> : vector<8x128xf32>
      %746 = tpu.matmul %720, %9, %cst_204 {dimension_numbers = #tpu.dot_dimension_numbers<[1], [0], [0], [1], [0, 0, 1, 1], [], []>} : vector<8x32xf32>, vector<32x128xf32>, vector<8x128xf32> -> vector<8x128xf32>
      %747 = arith.addf %745, %746 : vector<8x128xf32>
      %748 = vector.broadcast %10 : vector<1x128xf32> to vector<8x128xf32>
      %749 = arith.addf %747, %748 : vector<8x128xf32>
      %750 = arith.negf %749 : vector<8x128xf32>
      %751 = math.exp %750 : vector<8x128xf32>
      %cst_205 = arith.constant 1.000000e+00 : f32
      %752 = vector.broadcast %cst_205 : f32 to vector<8x128xf32>
      %753 = arith.addf %752, %751 : vector<8x128xf32>
      %754 = arith.divf %752, %753 : vector<8x128xf32>
      %755 = vector.extract_strided_slice %754 {offsets = [0, 0], sizes = [8, 32], strides = [1, 1]} : vector<8x128xf32> to vector<8x32xf32>
      %756 = vector.extract_strided_slice %754 {offsets = [0, 32], sizes = [8, 32], strides = [1, 1]} : vector<8x128xf32> to vector<8x32xf32>
      %757 = vector.extract_strided_slice %754 {offsets = [0, 64], sizes = [8, 32], strides = [1, 1]} : vector<8x128xf32> to vector<8x32xf32>
      %cst_206 = arith.constant 2.000000e+00 : f32
      %758 = vector.broadcast %cst_206 : f32 to vector<8x32xf32>
      %759 = arith.mulf %758, %757 : vector<8x32xf32>
      %cst_207 = arith.constant 1.000000e+00 : f32
      %760 = vector.broadcast %cst_207 : f32 to vector<8x32xf32>
      %761 = arith.subf %759, %760 : vector<8x32xf32>
      %762 = vector.extract_strided_slice %754 {offsets = [0, 96], sizes = [8, 32], strides = [1, 1]} : vector<8x128xf32> to vector<8x32xf32>
      %763 = arith.mulf %756, %718 : vector<8x32xf32>
      %764 = arith.mulf %755, %761 : vector<8x32xf32>
      %765 = arith.addf %763, %764 : vector<8x32xf32>
      %766 = math.tanh %765 : vector<8x32xf32>
      %767 = arith.mulf %762, %766 : vector<8x32xf32>
      %c8_i32_208 = arith.constant 8 : i32
      %cst_209 = arith.constant dense<0.000000e+00> : vector<8x128xf32>
      %768 = tpu.matmul %767, %11, %cst_209 {dimension_numbers = #tpu.dot_dimension_numbers<[1], [0], [0], [1], [0, 0, 1, 1], [], []>} : vector<8x32xf32>, vector<32x128xf32>, vector<8x128xf32> -> vector<8x128xf32>
      %769 = vector.broadcast %12 : vector<1x128xf32> to vector<8x128xf32>
      %770 = arith.addf %768, %769 : vector<8x128xf32>
      %771 = arith.index_cast %arg11 : i32 to index
      %c0_210 = arith.constant 0 : index
      %c0_211 = arith.constant 0 : index
      %772 = vector.load %arg9[%771, %c0_210, %c0_211] : memref<4x8x128xf32, #tpu.memory_space<vmem>>, vector<1x8x128xf32>
      %773 = vector.shape_cast %772 : vector<1x8x128xf32> to vector<8x128xf32>
      %774 = vector.shape_cast %770 : vector<8x128xf32> to vector<1x8x128xf32>
      tpu.vector_store %arg9[%771, %c0_210, %c0_211], %774 {strides = array<i32>} : memref<4x8x128xf32, #tpu.memory_space<vmem>>, vector<1x8x128xf32>,
      scf.yield %744, %767, %742, %765 : vector<8x32xf32>, vector<8x32xf32>, vector<8x32xf32>, vector<8x32xf32>
    }
    %c4_i32_111 = arith.constant 4 : i32
    return
  }
}

</mosaic_0001>

<bundles_post_ra>
// kernel: tpu_custom_call.1
= control target key start
LH: loop header
LB: loop body
LE: loop exit
PB: predicated region body
PF: predicated region fallthrough
CT: control target
= control target key end

     0   :  { %14 = vsyncpa [#allocation4], 0  ;;  %s7116_s0 = inlined_call_operand.vmem [shape: f32[64,8], index: 0, kind: input, shape index: {}]   ;;  %s7117_s1 = inlined_call_operand.vmem [shape: f32[8,128], index: 1, kind: input, shape index: {}]   ;;  %s7118_s2 = inlined_call_operand.vmem [shape: f32[32,128], index: 2, kind: input, shape index: {}]   ;;  %s7119_s3 = inlined_call_operand.vmem [shape: f32[1,128], index: 3, kind: input, shape index: {}]   ;;  %s7120_s4 = inlined_call_operand.vmem [shape: f32[32,128], index: 4, kind: input, shape index: {}]   ;;  %s7121_s5 = inlined_call_operand.hbm [shape: f32[32,128], index: 5, kind: input, shape index: {}]   ;;  %s7122_s6 = inlined_call_operand.vmem [shape: f32[1,128], index: 6, kind: input, shape index: {}]   ;;  %s7123_s7 = inlined_call_operand.hbm [shape: f32[32,128], index: 7, kind: input, shape index: {}]   ;;  %s7124_s8 = inlined_call_operand.vmem [shape: f32[1,128], index: 8, kind: input, shape index: {}]   ;;  %s7125_s9 = inlined_call_operand.hbm [shape: f32[4,8,128], index: 9, kind: output, shape index: {}]  }
   0x1   :  { %15 = vsyncpa [#allocation7], 0 }
   0x2   :  { %16 = vsyncpa [#allocation5], 0  ;;  %s6044_s30 = smov [#allocation3]  }
   0x3   :  { %s32_s10 = sshll.u32 %s6044_s30, 4  ;;  %s33_s10 = int_to_ptr.vmem [resolvable:$true] %s32_s10 }
   0x4   :  { %s5946_s11 = scalar_lea.vmem %s33_s10, 512  ;;  %p5951_p1 = scmp.lt.s32.totalorder %s33_s10, %s33_s10 }
   0x5   :  { %p5947_p0 = scmp.ne.s32.totalorder %s33_s10, %s5946_s11  ;;  %p5952_p2 = scmp.lt.s32.totalorder %s5946_s11, %s5946_s11 }
   0x7   :  { %p5953_p3 = por %p5952_p2, %p5951_p1 }
   0x9   :  { %p5954_p4 = pnand %p5953_p3, %p5947_p0 }
   0xb   :  { %5957 = shalt.err (!%p5954_p4)
}
   0xc   :  { %s6045_s12 = smov 128   ;;  %s6046_s13 = smov 8  }
   0xd   :  { %38 = dma.hbm_to_vmem [thread:$0]  %s7121_s5, 512, %s33_s10, [#allocation4], %s6045_s12, %s6045_s12, %s6046_s13  }
   0xe   :  { %s6047_s16 = smov [#allocation6]  }
   0xf   :  { %s46_s17 = sshll.u32 %s6047_s16, 4  ;;  %s47_s17 = int_to_ptr.vmem [resolvable:$true] %s46_s17 }
  0x10   :  { %s5966_s18 = scalar_lea.vmem %s47_s17, 512  ;;  %p5971_p6 = scmp.lt.s32.totalorder %s47_s17, %s47_s17 }
  0x11   :  { %p5967_p5 = scmp.ne.s32.totalorder %s47_s17, %s5966_s18  ;;  %p5972_p7 = scmp.lt.s32.totalorder %s5966_s18, %s5966_s18 }
  0x13   :  { %p5973_p8 = por %p5972_p7, %p5971_p6 }
  0x15   :  { %p5974_p9 = pnand %p5973_p8, %p5967_p5 }
  0x17   :  { %5977 = shalt.err (!%p5974_p9)
}
  0x18   :  { %52 = dma.hbm_to_vmem [thread:$0]  %s7123_s7, 512, %s47_s17, [#allocation7], %s6045_s12, %s6045_s12, %s6046_s13  }
  0x19   :  { %6018 = dma.done.wait [#allocation4], 512  }
  0x1a   :  { %6019 = vsyncadd [#allocation4], 4294966784 }
  0x1b   :  { %6020 = dma.done.wait [#allocation7], 512  }
  0x1c   :  { %6021 = vsyncadd [#allocation7], 4294966784  ;;  %v6048_v0 = vmov 0.0   ;;  %vm6049_vm0 = vmmov 0   ;;  %v6122_v1 = vld [vmem:[#allocation6] sm:$0xff]  ;;  %v6124_v2 = vld [vmem:[#allocation6 + $0x8] sm:$0xff] }
  0x1d   :  { %5140 = vmatprep.subr.mxu1 %v6048_v0  ;;  %5148 = vmatprep.mubr.msk.f32.mxu1 %vm6049_vm0, %v6048_v0  ;;  %v6126_v3 = vld [vmem:[#allocation6 + $0x10] sm:$0xff]  ;;  %vm77_vm1 = vcmask 64512   ;;  %v6128_v4 = vld [vmem:[#allocation6 + $0x18] sm:$0xff]  ;;  %v6133_v5 = vld [vmem:[%s7124_s8] ss:$0 sm:$0xff]  ;;  %s6051_s16 = smov 32  }
  0x1e   :  { %v69_v6 = vld [vmem:[%s7117_s1] sm:$0xff]  ;;  %v62_v8 = vld [vmem:[%s7116_s0 + $0x8] sm:$0xff]  ;;  %v6147_v9 = vld [vmem:[%s7118_s2 + $0x18] sm:$0xff]  ;;  %vm234_vm2 = vcmask 261120  }
  0x1f   :  { %5126 = vmatprep.subr.mxu0 %v69_v6  ;;  %v61_v7 = vld [vmem:[%s7116_s0] sm:$0xff]  ;;  %v6153_v10 = vld [vmem:[%s7118_s2 + $0x10] sm:$0xff]  ;;  %5141 = vmatpush3.msra.mxu1 %v6147_v9  ;;  %v6161_v11 = vld [vmem:[%s7118_s2 + $0x8] sm:$0xff] }
  0x20   :  { %5127 = vmatpush3.msra.mxu0 %v69_v6  ;;  %5128 = vmatprep.mubr.msk.f32.mxu0 %vm77_vm1, %v61_v7  ;;  %v6169_v12 = vld [vmem:[%s7118_s2] sm:$0xff]  ;;  %v6201_v32 = vld [vmem:[%s7120_s4 + $0x18] sm:$0xff]  ;;  %v63_v33 = vld [vmem:[%s7116_s0 + $0x10] sm:$0xff] }
  0x21   :  { %5129 = vmatmul.mubr.msk.f32.vlgmr.msra.gmra.mxu0 %vm77_vm1, %v62_v8  ;;  %5142 = vmatprep.subr.mxu1 %v6048_v0  ;;  %v6181_v13 = vld [vmem:[%s7119_s3] ss:$0 sm:$0xff]  ;;  %s6050_s3 = smov 64   ;;  %v6206_v34 = vld [vmem:[#allocation3 + $0x18] sm:$0xff]  ;;  %v6213_v36 = vld [vmem:[#allocation3 + $0x10] sm:$0xff] }
  0x22   :  { %5162 = vmatprep.subr.mxu0 %v6048_v0  ;;  %5143 = vmatpush3.msra.mxu1 %v6153_v10  ;;  %v64_v35 = vld [vmem:[%s7116_s0 + $0x18] sm:$0xff]  ;;  %v6218_v37 = vld [vmem:[%s7120_s4 + $0x10] sm:$0xff]  ;;  %v65_v38 = vld [vmem:[%s7116_s0 + $0x20] sm:$0xff] }
  0x23   :  { %5144 = vmatprep.subr.mxu1 %v6048_v0  ;;  %5163 = vmatpush3.msra.mxu0 %v6201_v32  ;;  %v6227_v39 = vld [vmem:[#allocation3 + $0x8] sm:$0xff]  ;;  %v6236_v41 = vld [vmem:[#allocation3] sm:$0xff]  ;;  %v67_v43 = vld [vmem:[%s7116_s0 + $0x30] sm:$0xff] }
  0x24   :  { %5145 = vmatpush3.msra.mxu1 %v6161_v11  ;;  %5131 = vmatprep.mubr.msk.f32.mxu0 %vm77_vm1, %v63_v33  ;;  %v66_v40 = vld [vmem:[%s7116_s0 + $0x28] sm:$0xff]  ;;  %v68_v44 = vld [vmem:[%s7116_s0 + $0x38] sm:$0xff]  ;;  %v6262_v46 = vld [vmem:[%s7120_s4] sm:$0xff] }
  0x25   :  { %5146 = vmatprep.subr.mxu1 %v6048_v0  ;;  %5132 = vmatmul.mubr.msk.f32.gmra.mxu0 %vm77_vm1, %v64_v35  ;;  %v6241_v42 = vld [vmem:[%s7120_s4 + $0x8] sm:$0xff]  ;;  %v6328_v6 = vld [vmem:[%s7122_s6] ss:$0 sm:$0xff] }
  0x26   :  { %5147 = vmatpush3.msra.mxu1 %v6169_v12  ;;  %5164 = vmatprep.subr.mxu0 %v6048_v0 }
  0x27   :  { %5149 = vmatmul.mubr.f32.vlgmr.msra.gmra.mxu1 %v6048_v0  ;;  %5151 = vmatprep.subr.mxu1 %v6048_v0 }
  0x28   :  { %5159 = vmatprep.mubr.msk.f32.mxu1 %vm6049_vm0, %v6048_v0  ;;  %5152 = vmatpush3.msra.mxu1 %v6206_v34 }
  0x29   :  { %5153 = vmatprep.subr.mxu1 %v6048_v0  ;;  %5165 = vmatpush3.msra.mxu0 %v6218_v37 }
  0x2a   :  { %5154 = vmatpush3.msra.mxu1 %v6213_v36  ;;  %5134 = vmatprep.mubr.msk.f32.mxu0 %vm77_vm1, %v65_v38 }
  0x2b   :  { %5155 = vmatprep.subr.mxu1 %v6048_v0  ;;  %5135 = vmatmul.mubr.msk.f32.gmra.mxu0 %vm77_vm1, %v66_v40 }
  0x2c   :  { %5156 = vmatpush3.msra.mxu1 %v6227_v39  ;;  %5166 = vmatprep.subr.mxu0 %v6048_v0 }
  0x2d   :  { %5157 = vmatprep.subr.mxu1 %v6048_v0  ;;  %5167 = vmatpush3.msra.mxu0 %v6241_v42 }
  0x2e   :  { %5158 = vmatpush3.msra.mxu1 %v6236_v41  ;;  %5137 = vmatprep.mubr.msk.f32.mxu0 %vm77_vm1, %v67_v43 }
  0x2f   :  { %5173 = vmatprep.subr.mxu1 %v6048_v0  ;;  %5160 = vmatmul.mubr.f32.vlgmr.msra.gmra.mxu1 %v6048_v0 }
  0x30   :  { %5138 = vmatmul.mubr.msk.f32.gmra.mxu0 %vm77_vm1, %v68_v44  ;;  %5174 = vmatpush3.msra.mxu1 %v6147_v9 }
  0x31   :  { %5175 = vmatprep.subr.mxu1 %v6048_v0  ;;  %5168 = vmatprep.subr.mxu0 %v6048_v0 }
  0x32   :  { %5176 = vmatpush3.msra.mxu1 %v6153_v10  ;;  %5169 = vmatpush3.msra.mxu0 %v6262_v46 }
  0x33   :  { %5177 = vmatprep.subr.mxu1 %v6048_v0  ;;  %5170 = vmatprep.mubr.msk.f32.mxu0 %vm6049_vm0, %v6048_v0 }
  0x34   :  { %5178 = vmatpush3.msra.mxu1 %v6161_v11  ;;  %5181 = vmatprep.mubr.msk.f32.mxu1 %vm6049_vm0, %v6048_v0 }
  0x35   :  { %5179 = vmatprep.subr.mxu1 %v6048_v0  ;;  %5184 = vmatprep.subr.mxu0 %v6048_v0 }
  0x36   :  { %5180 = vmatpush3.msra.mxu1 %v6169_v12 }
  0x37   :  { %5195 = vmatprep.subr.mxu1 %v6048_v0 }
  0xe1   :  { %v5130_v14 = vpop.f32.mrf.mxu0 }
  0xe2   :  { %v6184_v15 = vadd.f32 %v5130_v14, %v6181_v13 }
  0xe3   :  { %v168_v16 = vpop.f32.mrf.mxu0 }
  0xe4   :  { %208 = vst [vmem:[#allocation2] sm:$0xff] %v6184_v15  ;;  %v169_v17 = vadd.f32 %v6181_v13, %v168_v16 }
  0xe5   :  { %v5133_v49 = vpop.f32.mrf.mxu0 }
  0xe6   :  { %207 = vst [vmem:[#allocation2 + $0x30] sm:$0xff] %v169_v17  ;;  %v6283_v50 = vadd.f32 %v5133_v49, %v6181_v13 }
  0xe7   :  { %v304_v18 = vpop.f32.mrf.mxu1  ;;  %v178_v51 = vpop.f32.mrf.mxu0 }
  0xe8   :  { %v308_v19 = vadd.f32 %v304_v18, %v169_v17  ;;  %210 = vst [vmem:[#allocation2 + $0x10] sm:$0xff] %v6283_v50  ;;  %v6287_v52 = vadd.f32 %v6181_v13, %v178_v51 }
  0xe9   :  { %v5150_v20 = vpop.f32.mrf.mxu1 }
  0xea   :  { %v4758_v21 = vmul.f32 -1.442695, %v308_v19  ;;  %209 = vst [vmem:[#allocation2 + $0x18] sm:$0xff] %v6287_v52 }
  0xeb   :  { %v5136_v53 = vpop.f32.mrf.mxu0 }
  0xec   :  { %5732 = vpow2.f32 %v4758_v21  ;;  %v6291_v54 = vadd.f32 %v5136_v53, %v6181_v13 }
  0xed   :  { %v188_v55 = vpop.f32.mrf.mxu0 }
  0xee   :  { %212 = vst [vmem:[#allocation2 + $0x20] sm:$0xff] %v6291_v54  ;;  %v6295_v56 = vadd.f32 %v6181_v13, %v188_v55 }
  0xef   :  { %v400_v57 = vpop.f32.mrf.mxu1 }
  0xf0   :  { %v5139_v58 = vpop.f32.mrf.mxu0  ;;  %211 = vst [vmem:[#allocation2 + $0x8] sm:$0xff] %v6295_v56 }
  0xf1   :  { %v204_v59 = vadd.f32 %v5139_v58, %v6181_v13  ;;  %v5161_v60 = vpop.f32.mrf.mxu1 }
  0xf2   :  { %v198_v61 = vpop.f32.mrf.mxu0 }
  0xf3   :  { %214 = vst [vmem:[#allocation2 + $0x38] sm:$0xff] %v204_v59  ;;  %v6300_v62 = vadd.f32 %v6181_v13, %v198_v61 }
  0xf5   :  { %213 = vst [vmem:[#allocation2 + $0x28] sm:$0xff] %v6300_v62 }
  0xf9   :  { %v5733_v22 = vpop.eup %5732 }
  0xfa   :  { %v312_v23 = vadd.f32 1.0, %v5733_v22 }
  0xfc   :  { %5734 = vrcp.f32 %v312_v23 }
 0x109   :  { %v6188_v24 = vpop.eup %5734 }
 0x10a   :  { %v315_v25 = vmul.f32 2.0, %v6188_v24  ;;  %v317_v29 = vmul.f32 0.0, %v6188_v24 }
 0x10c   :  { %v4759_v26 = vadd.f32 -1.0, %v315_v25 }
 0x10e   :  { %319 = vrot.lane.b32.xlu0 %v4759_v26, %s6050_s3 }
 0x180   :  { %v320_v27 = vpop.permute.xlu0 %319 }
 0x181   :  { %v322_v28 = vmul.f32 %v6188_v24, %v320_v27 }
 0x183   :  { %324 = vrot.lane.b32.xlu0 %v322_v28, %s6051_s16 }
 0x1f5   :  { %v325_v30 = vpop.permute.xlu0 %324 }
 0x1f6   :  { %v6195_v31 = vadd.f32 %v325_v30, %v317_v29 }
 0x1f8   :  { %5736 = vtanh.f32 %v6195_v31 }
 0x205   :  { %v5737_v45 = vpop.eup %5736 }
 0x206   :  { %330 = vrot.lane.b32.xlu1 %v5737_v45, %s6050_s3 }
 0x278   :  { %v331_v47 = vpop.permute.xlu1 %330 }
 0x279   :  { %v333_v48 = vmul.f32 %v6188_v24, %v331_v47 }
 0x27b   :  { %405 = vrot.lane.b32.xlu1 %v333_v48, %s6051_s16 }
 0x2ed   :  { %v406_v63 = vpop.permute.xlu1 %405 }
 0x2ee   :  { %5171 = vmatmul.mubr.msk.f32.vlgmr.msra.gmra.mxu0 %vm234_vm2, %v406_v63  ;;  %5182 = vmatmul.mubr.msk.f32.vlgmr.msra.gmra.mxu1 %vm234_vm2, %v406_v63 }
 0x2ef   :  { %5196 = vmatpush3.msra.mxu1 %v6201_v32  ;;  %5185 = vmatpush3.msra.mxu0 %v6206_v34 }
 0x2f0   :  { %5197 = vmatprep.subr.mxu1 %v6048_v0  ;;  %5186 = vmatprep.subr.mxu0 %v6048_v0 }
 0x2f1   :  { %5198 = vmatpush3.msra.mxu1 %v6218_v37  ;;  %5187 = vmatpush3.msra.mxu0 %v6213_v36 }
 0x2f2   :  { %5199 = vmatprep.subr.mxu1 %v6048_v0  ;;  %5188 = vmatprep.subr.mxu0 %v6048_v0 }
 0x2f3   :  { %5200 = vmatpush3.msra.mxu1 %v6241_v42  ;;  %5189 = vmatpush3.msra.mxu0 %v6227_v39 }
 0x2f4   :  { %5201 = vmatprep.subr.mxu1 %v6048_v0  ;;  %5203 = vmatprep.mubr.msk.f32.mxu1 %vm6049_vm0, %v6048_v0 }
 0x2f5   :  { %5202 = vmatpush3.msra.mxu1 %v6262_v46  ;;  %5190 = vmatprep.subr.mxu0 %v6048_v0 }
 0x2f6   :  { %5191 = vmatpush3.msra.mxu0 %v6236_v41  ;;  %5192 = vmatprep.mubr.msk.f32.mxu0 %vm6049_vm0, %v6048_v0 }
 0x2f7   :  { %5206 = vmatprep.subr.mxu0 %v6048_v0  ;;  %5217 = vmatprep.subr.mxu1 %v6048_v0 }
 0x3ae   :  { %v475_v7 = vpop.f32.mrf.mxu0  ;;  %v579_v8 = vpop.f32.mrf.mxu1 }
 0x3af   :  { %v476_v13 = vadd.f32 %v475_v7, %v400_v57  ;;  %v583_v14 = vadd.f32 %v579_v8, %v6184_v15 }
 0x3b0   :  { %v5172_v16 = vpop.f32.mrf.mxu0  ;;  %v5183_v17 = vpop.f32.mrf.mxu1 }
 0x3b1   :  { %v485_v18 = vadd.f32 %v6328_v6, %v476_v13  ;;  %v4765_v19 = vmul.f32 -1.442695, %v583_v14 }
 0x3b3   :  { %v4762_v20 = vmul.f32 -1.442695, %v485_v18  ;;  %5738 = vpow2.f32 %v4765_v19 }
 0x3b5   :  { %5740 = vpow2.f32 %v4762_v20 }
 0x3c0   :  { %v5739_v21 = vpop.eup %5738 }
 0x3c1   :  { %v587_v22 = vadd.f32 1.0, %v5739_v21 }
 0x3c2   :  { %v5741_v23 = vpop.eup %5740 }
 0x3c3   :  { %v489_v24 = vadd.f32 1.0, %v5741_v23  ;;  %5742 = vrcp.f32 %v587_v22 }
 0x3c5   :  { %5744 = vrcp.f32 %v489_v24 }
 0x3d0   :  { %v5743_v25 = vpop.eup %5742 }
 0x3d1   :  { %v590_v26 = vmul.f32 2.0, %v5743_v25  ;;  %v592_v40 = vmul.f32 %v5743_v25, %v6195_v31 }
 0x3d2   :  { %v5745_v27 = vpop.eup %5744 }
 0x3d3   :  { %v4766_v28 = vadd.f32 -1.0, %v590_v26  ;;  %v492_v29 = vmul.f32 2.0, %v5745_v27  ;;  %v494_v45 = vmul.f32 0.0, %v5745_v27 }
 0x3d5   :  { %594 = vrot.lane.b32.xlu1 %v4766_v28, %s6050_s3  ;;  %v4763_v15 = vadd.f32 -1.0, %v492_v29 }
 0x3d7   :  { %496 = vrot.lane.b32.xlu0 %v4763_v15, %s6050_s3 }
 0x447   :  { %v595_v30 = vpop.permute.xlu1 %594 }
 0x448   :  { %v597_v33 = vmul.f32 %v5743_v25, %v595_v30 }
 0x449   :  { %v497_v35 = vpop.permute.xlu0 %496 }
 0x44a   :  { %v499_v38 = vmul.f32 %v5745_v27, %v497_v35  ;;  %599 = vrot.lane.b32.xlu1 %v597_v33, %s6051_s16 }
 0x44c   :  { %501 = vrot.lane.b32.xlu0 %v499_v38, %s6051_s16 }
 0x4bc   :  { %v600_v43 = vpop.permute.xlu1 %599 }
 0x4bd   :  { %v6337_v44 = vadd.f32 %v600_v43, %v592_v40 }
 0x4be   :  { %v502_v47 = vpop.permute.xlu0 %501 }
 0x4bf   :  { %5746 = vtanh.f32 %v6337_v44  ;;  %v6340_v48 = vadd.f32 %v502_v47, %v494_v45 }
 0x4c1   :  { %5748 = vtanh.f32 %v6340_v48 }
 0x4cc   :  { %v5747_v49 = vpop.eup %5746 }
 0x4cd   :  { %605 = vrot.lane.b32.xlu1 %v5747_v49, %s6050_s3 }
 0x4ce   :  { %v5749_v51 = vpop.eup %5748 }
 0x4cf   :  { %507 = vrot.lane.b32.xlu0 %v5749_v51, %s6050_s3 }
 0x53f   :  { %v606_v53 = vpop.permute.xlu1 %605 }
 0x540   :  { %v608_v55 = vmul.f32 %v5743_v25, %v606_v53 }
 0x541   :  { %v508_v31 = vpop.permute.xlu0 %507 }
 0x542   :  { %v510_v57 = vmul.f32 %v5745_v27, %v508_v31  ;;  %685 = vrot.lane.b32.xlu1 %v608_v55, %s6051_s16 }
 0x544   :  { %610 = vrot.lane.b32.xlu0 %v510_v57, %s6051_s16 }
 0x5b4   :  { %v686_v58 = vpop.permute.xlu1 %685 }
 0x5b5   :  { %5204 = vmatmul.mubr.msk.f32.vlgmr.msra.gmra.mxu1 %vm234_vm2, %v686_v58 }
 0x5b6   :  { %v611_v59 = vpop.permute.xlu0 %610  ;;  %5218 = vmatpush3.msra.mxu1 %v6206_v34  ;;  %5225 = vmatprep.mubr.msk.f32.mxu1 %vm6049_vm0, %v6048_v0 }
 0x5b7   :  { %5193 = vmatmul.mubr.msk.f32.vlgmr.msra.gmra.mxu0 %vm234_vm2, %v611_v59  ;;  %5219 = vmatprep.subr.mxu1 %v6048_v0 }
 0x5b8   :  { %5207 = vmatpush3.msra.mxu0 %v6147_v9  ;;  %5214 = vmatprep.mubr.msk.f32.mxu0 %vm6049_vm0, %v6048_v0 }
 0x5b9   :  { %5208 = vmatprep.subr.mxu0 %v6048_v0  ;;  %5220 = vmatpush3.msra.mxu1 %v6213_v36 }
 0x5ba   :  { %5209 = vmatpush3.msra.mxu0 %v6153_v10  ;;  %5221 = vmatprep.subr.mxu1 %v6048_v0 }
 0x5bb   :  { %5210 = vmatprep.subr.mxu0 %v6048_v0  ;;  %5222 = vmatpush3.msra.mxu1 %v6227_v39 }
 0x5bc   :  { %5211 = vmatpush3.msra.mxu0 %v6161_v11  ;;  %5223 = vmatprep.subr.mxu1 %v6048_v0 }
 0x5bd   :  { %5212 = vmatprep.subr.mxu0 %v6048_v0  ;;  %5224 = vmatpush3.msra.mxu1 %v6236_v41 }
 0x5be   :  { %5213 = vmatpush3.msra.mxu0 %v6169_v12  ;;  %5239 = vmatprep.subr.mxu1 %v6048_v0 }
 0x5bf   :  { %5215 = vmatmul.mubr.msk.f32.vlgmr.msra.gmra.mxu0 %vm234_vm2, %v686_v58  ;;  %5228 = vmatprep.subr.mxu0 %v6048_v0 }
 0x5c0   :  { %5229 = vmatpush3.msra.mxu0 %v6201_v32  ;;  %5236 = vmatprep.mubr.msk.f32.mxu0 %vm6049_vm0, %v6048_v0 }
 0x5c1   :  { %5230 = vmatprep.subr.mxu0 %v6048_v0 }
 0x5c2   :  { %5231 = vmatpush3.msra.mxu0 %v6218_v37 }
 0x5c3   :  { %5232 = vmatprep.subr.mxu0 %v6048_v0 }
 0x5c4   :  { %5233 = vmatpush3.msra.mxu0 %v6241_v42 }
 0x5c5   :  { %5234 = vmatprep.subr.mxu0 %v6048_v0 }
 0x5c6   :  { %5235 = vmatpush3.msra.mxu0 %v6262_v46 }
 0x5c7   :  { %5250 = vmatprep.subr.mxu0 %v6048_v0 }
 0x675   :  { %v755_v60 = vpop.f32.mrf.mxu1 }
 0x677   :  { %v680_v61 = vpop.f32.mrf.mxu0  ;;  %v5205_v63 = vpop.f32.mrf.mxu1 }
 0x678   :  { %v756_v7 = vadd.f32 %v755_v60, %v680_v61 }
 0x679   :  { %v5194_v8 = vpop.f32.mrf.mxu0 }
 0x67a   :  { %v759_v13 = vadd.f32 %v6328_v6, %v756_v7 }
 0x67c   :  { %v4769_v14 = vmul.f32 -1.442695, %v759_v13 }
 0x67e   :  { %5750 = vpow2.f32 %v4769_v14 }
 0x67f   :  { %v853_v16 = vpop.f32.mrf.mxu0 }
 0x680   :  { %v857_v17 = vadd.f32 %v853_v16, %v6287_v52 }
 0x681   :  { %v5216_v18 = vpop.f32.mrf.mxu0 }
 0x682   :  { %v4772_v19 = vmul.f32 -1.442695, %v857_v17 }
 0x684   :  { %5752 = vpow2.f32 %v4772_v19 }
 0x68b   :  { %v5751_v20 = vpop.eup %5750 }
 0x68c   :  { %v763_v21 = vadd.f32 1.0, %v5751_v20 }
 0x68e   :  { %5754 = vrcp.f32 %v763_v21 }
 0x691   :  { %v5753_v22 = vpop.eup %5752 }
 0x692   :  { %v861_v23 = vadd.f32 1.0, %v5753_v22 }
 0x694   :  { %5756 = vrcp.f32 %v861_v23 }
 0x69b   :  { %v5755_v24 = vpop.eup %5754 }
 0x69c   :  { %v766_v25 = vmul.f32 2.0, %v5755_v24  ;;  %v768_v35 = vmul.f32 %v5755_v24, %v6340_v48 }
 0x69e   :  { %v4770_v26 = vadd.f32 -1.0, %v766_v25 }
 0x6a0   :  { %770 = vrot.lane.b32.xlu0 %v4770_v26, %s6050_s3 }
 0x6a1   :  { %v5757_v27 = vpop.eup %5756 }
 0x6a2   :  { %v864_v28 = vmul.f32 2.0, %v5757_v27  ;;  %v866_v43 = vmul.f32 %v5757_v27, %v6337_v44 }
 0x6a4   :  { %v4773_v29 = vadd.f32 -1.0, %v864_v28 }
 0x6a6   :  { %868 = vrot.lane.b32.xlu1 %v4773_v29, %s6050_s3 }
 0x712   :  { %v771_v52 = vpop.permute.xlu0 %770 }
 0x713   :  { %v773_v15 = vmul.f32 %v5755_v24, %v771_v52 }
 0x715   :  { %775 = vrot.lane.b32.xlu0 %v773_v15, %s6051_s16 }
 0x718   :  { %v869_v30 = vpop.permute.xlu1 %868 }
 0x719   :  { %v871_v33 = vmul.f32 %v5757_v27, %v869_v30 }
 0x71b   :  { %873 = vrot.lane.b32.xlu1 %v871_v33, %s6051_s16 }
 0x787   :  { %v776_v38 = vpop.permute.xlu0 %775 }
 0x788   :  { %v6387_v40 = vadd.f32 %v776_v38, %v768_v35 }
 0x78a   :  { %5758 = vtanh.f32 %v6387_v40 }
 0x78d   :  { %v874_v45 = vpop.permute.xlu1 %873 }
 0x78e   :  { %v6391_v47 = vadd.f32 %v874_v45, %v866_v43 }
 0x790   :  { %5760 = vtanh.f32 %v6391_v47 }
 0x797   :  { %v5759_v49 = vpop.eup %5758 }
 0x798   :  { %781 = vrot.lane.b32.xlu0 %v5759_v49, %s6050_s3 }
 0x79d   :  { %v5761_v51 = vpop.eup %5760 }
 0x79e   :  { %879 = vrot.lane.b32.xlu1 %v5761_v51, %s6050_s3 }
 0x80a   :  { %v782_v53 = vpop.permute.xlu0 %781 }
 0x80b   :  { %v784_v48 = vmul.f32 %v5755_v24, %v782_v53 }
 0x80d   :  { %884 = vrot.lane.b32.xlu0 %v784_v48, %s6051_s16 }
 0x810   :  { %v880_v55 = vpop.permute.xlu1 %879 }
 0x811   :  { %v882_v31 = vmul.f32 %v5757_v27, %v880_v55 }
 0x813   :  { %959 = vrot.lane.b32.xlu1 %v882_v31, %s6051_s16 }
 0x87f   :  { %v885_v44 = vpop.permute.xlu0 %884 }
 0x880   :  { %5226 = vmatmul.mubr.msk.f32.vlgmr.msra.gmra.mxu1 %vm234_vm2, %v885_v44 }
 0x881   :  { %5240 = vmatpush3.msra.mxu1 %v6147_v9  ;;  %5247 = vmatprep.mubr.msk.f32.mxu1 %vm6049_vm0, %v6048_v0 }
 0x882   :  { %5241 = vmatprep.subr.mxu1 %v6048_v0 }
 0x883   :  { %5242 = vmatpush3.msra.mxu1 %v6153_v10 }
 0x884   :  { %5243 = vmatprep.subr.mxu1 %v6048_v0 }
 0x885   :  { %5244 = vmatpush3.msra.mxu1 %v6161_v11  ;;  %v960_v57 = vpop.permute.xlu1 %959 }
 0x886   :  { %5237 = vmatmul.mubr.msk.f32.vlgmr.msra.gmra.mxu0 %vm234_vm2, %v960_v57  ;;  %5245 = vmatprep.subr.mxu1 %v6048_v0 }
 0x887   :  { %5246 = vmatpush3.msra.mxu1 %v6169_v12  ;;  %5251 = vmatpush3.msra.mxu0 %v6206_v34 }
 0x888   :  { %5248 = vmatmul.mubr.msk.f32.vlgmr.msra.gmra.mxu1 %vm234_vm2, %v960_v57  ;;  %5261 = vmatprep.subr.mxu1 %v6048_v0 }
 0x889   :  { %5252 = vmatprep.subr.mxu0 %v6048_v0  ;;  %5262 = vmatpush3.msra.mxu1 %v6201_v32 }
 0x88a   :  { %5253 = vmatpush3.msra.mxu0 %v6213_v36  ;;  %5263 = vmatprep.subr.mxu1 %v6048_v0 }
 0x88b   :  { %5254 = vmatprep.subr.mxu0 %v6048_v0  ;;  %5264 = vmatpush3.msra.mxu1 %v6218_v37 }
 0x88c   :  { %5255 = vmatpush3.msra.mxu0 %v6227_v39  ;;  %5265 = vmatprep.subr.mxu1 %v6048_v0 }
 0x88d   :  { %5256 = vmatprep.subr.mxu0 %v6048_v0  ;;  %5266 = vmatpush3.msra.mxu1 %v6241_v42 }
 0x88e   :  { %5257 = vmatpush3.msra.mxu0 %v6236_v41  ;;  %5267 = vmatprep.subr.mxu1 %v6048_v0 }
 0x88f   :  { %5268 = vmatpush3.msra.mxu1 %v6262_v46  ;;  %5269 = vmatprep.mubr.msk.f32.mxu1 %vm6049_vm0, %v6048_v0 }
 0x890   :  { %5258 = vmatprep.mubr.msk.f32.mxu0 %vm6049_vm0, %v6048_v0  ;;  %5272 = vmatprep.subr.mxu0 %v6048_v0 }
 0x891   :  { %5283 = vmatprep.subr.mxu1 %v6048_v0 }
 0x940   :  { %v954_v58 = vpop.f32.mrf.mxu1 }
 0x942   :  { %v5227_v59 = vpop.f32.mrf.mxu1 }
 0x946   :  { %v1029_v60 = vpop.f32.mrf.mxu0 }
 0x947   :  { %v1030_v61 = vadd.f32 %v1029_v60, %v954_v58 }
 0x948   :  { %v5238_v63 = vpop.f32.mrf.mxu0  ;;  %v1127_v7 = vpop.f32.mrf.mxu1 }
 0x949   :  { %v1033_v8 = vadd.f32 %v6328_v6, %v1030_v61  ;;  %v1131_v13 = vadd.f32 %v1127_v7, %v6283_v50 }
 0x94a   :  { %v5249_v14 = vpop.f32.mrf.mxu1 }
 0x94b   :  { %v4776_v16 = vmul.f32 -1.442695, %v1033_v8  ;;  %v4779_v17 = vmul.f32 -1.442695, %v1131_v13 }
 0x94d   :  { %5762 = vpow2.f32 %v4776_v16 }
 0x94e   :  { %5764 = vpow2.f32 %v4779_v17 }
 0x95a   :  { %v5763_v18 = vpop.eup %5762 }
 0x95b   :  { %v5765_v19 = vpop.eup %5764  ;;  %v1037_v20 = vadd.f32 1.0, %v5763_v18 }
 0x95c   :  { %v1135_v21 = vadd.f32 1.0, %v5765_v19 }
 0x95d   :  { %5766 = vrcp.f32 %v1037_v20 }
 0x95e   :  { %5768 = vrcp.f32 %v1135_v21 }
 0x96a   :  { %v5767_v22 = vpop.eup %5766 }
 0x96b   :  { %v5769_v23 = vpop.eup %5768  ;;  %v1040_v24 = vmul.f32 2.0, %v5767_v22  ;;  %v1042_v15 = vmul.f32 %v5767_v22, %v6387_v40 }
 0x96c   :  { %v1138_v25 = vmul.f32 2.0, %v5769_v23  ;;  %v1140_v30 = vmul.f32 %v5769_v23, %v6391_v47 }
 0x96d   :  { %v4777_v26 = vadd.f32 -1.0, %v1040_v24 }
 0x96e   :  { %v4780_v27 = vadd.f32 -1.0, %v1138_v25 }
 0x96f   :  { %1044 = vrot.lane.b32.xlu0 %v4777_v26, %s6050_s3 }
 0x970   :  { %1142 = vrot.lane.b32.xlu1 %v4780_v27, %s6050_s3 }
 0x9e1   :  { %v1045_v50 = vpop.permute.xlu0 %1044 }
 0x9e2   :  { %v1143_v28 = vpop.permute.xlu1 %1142  ;;  %v1047_v29 = vmul.f32 %v5767_v22, %v1045_v50 }
 0x9e3   :  { %v1145_v52 = vmul.f32 %v5769_v23, %v1143_v28 }
 0x9e4   :  { %1049 = vrot.lane.b32.xlu0 %v1047_v29, %s6051_s16 }
 0x9e5   :  { %1147 = vrot.lane.b32.xlu1 %v1145_v52, %s6051_s16 }
 0xa56   :  { %v1050_v33 = vpop.permute.xlu0 %1049 }
 0xa57   :  { %v1148_v35 = vpop.permute.xlu1 %1147  ;;  %v6439_v38 = vadd.f32 %v1050_v33, %v1042_v15 }
 0xa58   :  { %v6441_v43 = vadd.f32 %v1148_v35, %v1140_v30 }
 0xa59   :  { %5770 = vtanh.f32 %v6439_v38 }
 0xa5a   :  { %5772 = vtanh.f32 %v6441_v43 }
 0xa66   :  { %v5771_v45 = vpop.eup %5770 }
 0xa67   :  { %v5773_v49 = vpop.eup %5772  ;;  %1055 = vrot.lane.b32.xlu0 %v5771_v45, %s6050_s3 }
 0xa68   :  { %1153 = vrot.lane.b32.xlu1 %v5773_v49, %s6050_s3 }
 0xad9   :  { %v1056_v51 = vpop.permute.xlu0 %1055 }
 0xada   :  { %v1154_v40 = vpop.permute.xlu1 %1153  ;;  %v1058_v53 = vmul.f32 %v5767_v22, %v1056_v51 }
 0xadb   :  { %v1156_v47 = vmul.f32 %v5769_v23, %v1154_v40 }
 0xadc   :  { %1158 = vrot.lane.b32.xlu0 %v1058_v53, %s6051_s16 }
 0xadd   :  { %1233 = vrot.lane.b32.xlu1 %v1156_v47, %s6051_s16 }
 0xb4e   :  { %v1159_v48 = vpop.permute.xlu0 %1158 }
 0xb4f   :  { %v1234_v55 = vpop.permute.xlu1 %1233  ;;  %5259 = vmatmul.mubr.msk.f32.vlgmr.msra.gmra.mxu0 %vm234_vm2, %v1159_v48 }
 0xb50   :  { %5270 = vmatmul.mubr.msk.f32.vlgmr.msra.gmra.mxu1 %vm234_vm2, %v1234_v55  ;;  %5273 = vmatpush3.msra.mxu0 %v6147_v9 }
 0xb51   :  { %5274 = vmatprep.subr.mxu0 %v6048_v0  ;;  %5280 = vmatprep.mubr.msk.f32.mxu0 %vm6049_vm0, %v6048_v0 }
 0xb52   :  { %5275 = vmatpush3.msra.mxu0 %v6153_v10  ;;  %5284 = vmatpush3.msra.mxu1 %v6206_v34 }
 0xb53   :  { %5276 = vmatprep.subr.mxu0 %v6048_v0  ;;  %5285 = vmatprep.subr.mxu1 %v6048_v0 }
 0xb54   :  { %5277 = vmatpush3.msra.mxu0 %v6161_v11  ;;  %5286 = vmatpush3.msra.mxu1 %v6213_v36 }
 0xb55   :  { %5278 = vmatprep.subr.mxu0 %v6048_v0  ;;  %5287 = vmatprep.subr.mxu1 %v6048_v0 }
 0xb56   :  { %5279 = vmatpush3.msra.mxu0 %v6169_v12  ;;  %5288 = vmatpush3.msra.mxu1 %v6227_v39 }
 0xb57   :  { %5281 = vmatmul.mubr.msk.f32.vlgmr.msra.gmra.mxu0 %vm234_vm2, %v1234_v55  ;;  %5289 = vmatprep.subr.mxu1 %v6048_v0 }
 0xb58   :  { %5294 = vmatprep.subr.mxu0 %v6048_v0  ;;  %5290 = vmatpush3.msra.mxu1 %v6236_v41 }
 0xb59   :  { %5295 = vmatpush3.msra.mxu0 %v6201_v32  ;;  %5291 = vmatprep.mubr.msk.f32.mxu1 %vm6049_vm0, %v6048_v0 }
 0xb5a   :  { %5296 = vmatprep.subr.mxu0 %v6048_v0  ;;  %5305 = vmatprep.subr.mxu1 %v6048_v0 }
 0xb5b   :  { %5297 = vmatpush3.msra.mxu0 %v6218_v37  ;;  %5302 = vmatprep.mubr.msk.f32.mxu0 %vm6049_vm0, %v6048_v0 }
 0xb5c   :  { %5298 = vmatprep.subr.mxu0 %v6048_v0 }
 0xb5d   :  { %5299 = vmatpush3.msra.mxu0 %v6241_v42 }
 0xb5e   :  { %5300 = vmatprep.subr.mxu0 %v6048_v0 }
 0xb5f   :  { %5301 = vmatpush3.msra.mxu0 %v6262_v46 }
 0xb60   :  { %5316 = vmatprep.subr.mxu0 %v6048_v0 }
 0xc0f   :  { %v1228_v31 = vpop.f32.mrf.mxu0 }
 0xc10   :  { %v1303_v44 = vpop.f32.mrf.mxu1 }
 0xc11   :  { %v1304_v57 = vadd.f32 %v1303_v44, %v1228_v31  ;;  %v5260_v58 = vpop.f32.mrf.mxu0 }
 0xc12   :  { %v5271_v59 = vpop.f32.mrf.mxu1 }
 0xc13   :  { %v1307_v60 = vadd.f32 %v6328_v6, %v1304_v57 }
 0xc15   :  { %v4783_v61 = vmul.f32 -1.442695, %v1307_v60 }
 0xc17   :  { %5774 = vpow2.f32 %v4783_v61  ;;  %v1401_v63 = vpop.f32.mrf.mxu0 }
 0xc18   :  { %v1405_v7 = vadd.f32 %v1401_v63, %v6295_v56 }
 0xc19   :  { %v5282_v8 = vpop.f32.mrf.mxu0 }
 0xc1a   :  { %v4786_v13 = vmul.f32 -1.442695, %v1405_v7 }
 0xc1c   :  { %5776 = vpow2.f32 %v4786_v13 }
 0xc24   :  { %v5775_v14 = vpop.eup %5774 }
 0xc25   :  { %v1311_v16 = vadd.f32 1.0, %v5775_v14 }
 0xc27   :  { %5778 = vrcp.f32 %v1311_v16 }
 0xc29   :  { %v5777_v17 = vpop.eup %5776 }
 0xc2a   :  { %v1409_v18 = vadd.f32 1.0, %v5777_v17 }
 0xc2c   :  { %5780 = vrcp.f32 %v1409_v18 }
 0xc34   :  { %v5779_v19 = vpop.eup %5778 }
 0xc35   :  { %v1314_v20 = vmul.f32 2.0, %v5779_v19  ;;  %v1316_v50 = vmul.f32 %v5779_v19, %v6439_v38 }
 0xc37   :  { %v4784_v21 = vadd.f32 -1.0, %v1314_v20 }
 0xc39   :  { %v5781_v22 = vpop.eup %5780  ;;  %1318 = vrot.lane.b32.xlu0 %v4784_v21, %s6050_s3 }
 0xc3a   :  { %v1412_v23 = vmul.f32 2.0, %v5781_v22  ;;  %v1414_v52 = vmul.f32 %v5781_v22, %v6441_v43 }
 0xc3c   :  { %v4787_v24 = vadd.f32 -1.0, %v1412_v23 }
 0xc3e   :  { %1416 = vrot.lane.b32.xlu1 %v4787_v24, %s6050_s3 }
 0xcab   :  { %v1319_v56 = vpop.permute.xlu0 %1318 }
 0xcac   :  { %v1321_v25 = vmul.f32 %v5779_v19, %v1319_v56 }
 0xcae   :  { %1323 = vrot.lane.b32.xlu0 %v1321_v25, %s6051_s16 }
 0xcb0   :  { %v1417_v26 = vpop.permute.xlu1 %1416 }
 0xcb1   :  { %v1419_v27 = vmul.f32 %v5781_v22, %v1417_v26 }
 0xcb3   :  { %1421 = vrot.lane.b32.xlu1 %v1419_v27, %s6051_s16 }
 0xd20   :  { %v1324_v28 = vpop.permute.xlu0 %1323 }
 0xd21   :  { %v6489_v29 = vadd.f32 %v1324_v28, %v1316_v50 }
 0xd23   :  { %5782 = vtanh.f32 %v6489_v29 }
 0xd25   :  { %v1422_v15 = vpop.permute.xlu1 %1421 }
 0xd26   :  { %v6493_v30 = vadd.f32 %v1422_v15, %v1414_v52 }
 0xd28   :  { %5784 = vtanh.f32 %v6493_v30 }
 0xd30   :  { %v5783_v33 = vpop.eup %5782 }
 0xd31   :  { %1329 = vrot.lane.b32.xlu0 %v5783_v33, %s6050_s3 }
 0xd35   :  { %v5785_v35 = vpop.eup %5784 }
 0xd36   :  { %1427 = vrot.lane.b32.xlu1 %v5785_v35, %s6050_s3 }
 0xda3   :  { %v1330_v45 = vpop.permute.xlu0 %1329 }
 0xda4   :  { %v1332_v38 = vmul.f32 %v5779_v19, %v1330_v45 }
 0xda6   :  { %1432 = vrot.lane.b32.xlu0 %v1332_v38, %s6051_s16  ;;  %v6556_v38 = vld [vmem:[%s7118_s2 + $0x18] sm:$0xff] }
 0xda8   :  { %v1428_v49 = vpop.permute.xlu1 %1427 }
 0xda9   :  { %v1430_v51 = vmul.f32 %v5781_v22, %v1428_v49  ;;  %v6565_v49 = vld [vmem:[%s7118_s2 + $0x10] sm:$0xff] }
 0xdab   :  { %1507 = vrot.lane.b32.xlu1 %v1430_v51, %s6051_s16  ;;  %v6574_v51 = vld [vmem:[%s7118_s2 + $0x8] sm:$0xff] }
 0xe18   :  { %v1433_v43 = vpop.permute.xlu0 %1432 }
 0xe19   :  { %5292 = vmatmul.mubr.msk.f32.vlgmr.msra.gmra.mxu1 %vm234_vm2, %v1433_v43  ;;  %v6583_v43 = vld [vmem:[%s7118_s2] sm:$0xff] }
 0xe1a   :  { %5306 = vmatpush3.msra.mxu1 %v6147_v9  ;;  %5313 = vmatprep.mubr.msk.f32.mxu1 %vm6049_vm0, %v6048_v0 }
 0xe1b   :  { %5307 = vmatprep.subr.mxu1 %v6048_v0 }
 0xe1c   :  { %5308 = vmatpush3.msra.mxu1 %v6153_v10 }
 0xe1d   :  { %5309 = vmatprep.subr.mxu1 %v6048_v0  ;;  %v1508_v40 = vpop.permute.xlu1 %1507 }
 0xe1e   :  { %5310 = vmatpush3.msra.mxu1 %v6161_v11  ;;  %5303 = vmatmul.mubr.msk.f32.vlgmr.msra.gmra.mxu0 %vm234_vm2, %v1508_v40 }
 0xe1f   :  { %5311 = vmatprep.subr.mxu1 %v6048_v0  ;;  %5317 = vmatpush3.msra.mxu0 %v6206_v34 }
 0xe20   :  { %5312 = vmatpush3.msra.mxu1 %v6169_v12  ;;  %5318 = vmatprep.subr.mxu0 %v6048_v0 }
 0xe21   :  { %5314 = vmatmul.mubr.msk.f32.vlgmr.msra.gmra.mxu1 %vm234_vm2, %v1508_v40  ;;  %5327 = vmatprep.subr.mxu1 %v6048_v0 }
 0xe22   :  { %5328 = vmatpush3.msra.mxu1 %v6201_v32  ;;  %5319 = vmatpush3.msra.mxu0 %v6213_v36 }
 0xe23   :  { %5329 = vmatprep.subr.mxu1 %v6048_v0  ;;  %5320 = vmatprep.subr.mxu0 %v6048_v0 }
 0xe24   :  { %5330 = vmatpush3.msra.mxu1 %v6218_v37  ;;  %5321 = vmatpush3.msra.mxu0 %v6227_v39 }
 0xe25   :  { %5331 = vmatprep.subr.mxu1 %v6048_v0  ;;  %5322 = vmatprep.subr.mxu0 %v6048_v0 }
 0xe26   :  { %5332 = vmatpush3.msra.mxu1 %v6241_v42  ;;  %5323 = vmatpush3.msra.mxu0 %v6236_v41 }
 0xe27   :  { %5333 = vmatprep.subr.mxu1 %v6048_v0  ;;  %5335 = vmatprep.mubr.msk.f32.mxu1 %vm6049_vm0, %v6048_v0 }
 0xe28   :  { %5334 = vmatpush3.msra.mxu1 %v6262_v46  ;;  %5324 = vmatprep.mubr.msk.f32.mxu0 %vm6049_vm0, %v6048_v0 }
 0xe29   :  { %5338 = vmatprep.subr.mxu0 %v6048_v0  ;;  %5349 = vmatprep.subr.mxu1 %v6048_v0 }
 0xed9   :  { %v1502_v53 = vpop.f32.mrf.mxu1 }
 0xedb   :  { %v5293_v47 = vpop.f32.mrf.mxu1 }
 0xede   :  { %v1577_v48 = vpop.f32.mrf.mxu0 }
 0xedf   :  { %v1578_v55 = vadd.f32 %v1577_v48, %v1502_v53 }
 0xee0   :  { %v5304_v31 = vpop.f32.mrf.mxu0 }
 0xee1   :  { %v1581_v44 = vadd.f32 %v6328_v6, %v1578_v55  ;;  %v1675_v57 = vpop.f32.mrf.mxu1 }
 0xee2   :  { %v1679_v58 = vadd.f32 %v1675_v57, %v6291_v54 }
 0xee3   :  { %v4790_v59 = vmul.f32 -1.442695, %v1581_v44  ;;  %v5315_v60 = vpop.f32.mrf.mxu1 }
 0xee4   :  { %v4793_v61 = vmul.f32 -1.442695, %v1679_v58 }
 0xee5   :  { %5786 = vpow2.f32 %v4790_v59 }
 0xee6   :  { %5788 = vpow2.f32 %v4793_v61 }
 0xef2   :  { %v5787_v63 = vpop.eup %5786 }
 0xef3   :  { %v5789_v7 = vpop.eup %5788  ;;  %v1585_v8 = vadd.f32 1.0, %v5787_v63 }
 0xef4   :  { %v1683_v13 = vadd.f32 1.0, %v5789_v7 }
 0xef5   :  { %5790 = vrcp.f32 %v1585_v8 }
 0xef6   :  { %5792 = vrcp.f32 %v1683_v13 }
 0xf02   :  { %v5791_v14 = vpop.eup %5790 }
 0xf03   :  { %v5793_v16 = vpop.eup %5792  ;;  %v1588_v17 = vmul.f32 2.0, %v5791_v14  ;;  %v1590_v24 = vmul.f32 %v5791_v14, %v6489_v29 }
 0xf04   :  { %v1686_v18 = vmul.f32 2.0, %v5793_v16  ;;  %v1688_v56 = vmul.f32 %v5793_v16, %v6493_v30 }
 0xf05   :  { %v4791_v19 = vadd.f32 -1.0, %v1588_v17 }
 0xf06   :  { %v4794_v20 = vadd.f32 -1.0, %v1686_v18 }
 0xf07   :  { %1592 = vrot.lane.b32.xlu0 %v4791_v19, %s6050_s3 }
 0xf08   :  { %1690 = vrot.lane.b32.xlu1 %v4794_v20, %s6050_s3 }
 0xf79   :  { %v1593_v54 = vpop.permute.xlu0 %1592 }
 0xf7a   :  { %v1691_v21 = vpop.permute.xlu1 %1690  ;;  %v1595_v22 = vmul.f32 %v5791_v14, %v1593_v54 }
 0xf7b   :  { %v1693_v23 = vmul.f32 %v5793_v16, %v1691_v21 }
 0xf7c   :  { %1597 = vrot.lane.b32.xlu0 %v1595_v22, %s6051_s16 }
 0xf7d   :  { %1695 = vrot.lane.b32.xlu1 %v1693_v23, %s6051_s16 }
 0xfee   :  { %v1598_v25 = vpop.permute.xlu0 %1597 }
 0xfef   :  { %v1696_v26 = vpop.permute.xlu1 %1695  ;;  %v6541_v27 = vadd.f32 %v1598_v25, %v1590_v24 }
 0xff0   :  { %v6543_v50 = vadd.f32 %v1696_v26, %v1688_v56 }
 0xff1   :  { %5794 = vtanh.f32 %v6541_v27 }
 0xff2   :  { %5796 = vtanh.f32 %v6543_v50 }
 0xffe   :  { %v5795_v28 = vpop.eup %5794 }
 0xfff   :  { %v5797_v52 = vpop.eup %5796  ;;  %1603 = vrot.lane.b32.xlu0 %v5795_v28, %s6050_s3 }
0x1000   :  { %1701 = vrot.lane.b32.xlu1 %v5797_v52, %s6050_s3 }
0x1071   :  { %v1604_v15 = vpop.permute.xlu0 %1603 }
0x1072   :  { %v1702_v29 = vpop.permute.xlu1 %1701  ;;  %v1606_v33 = vmul.f32 %v5791_v14, %v1604_v15 }
0x1073   :  { %v1704_v30 = vmul.f32 %v5793_v16, %v1702_v29 }
0x1074   :  { %1706 = vrot.lane.b32.xlu0 %v1606_v33, %s6051_s16 }
0x1075   :  { %1781 = vrot.lane.b32.xlu1 %v1704_v30, %s6051_s16 }
0x10e6   :  { %v1707_v35 = vpop.permute.xlu0 %1706 }
0x10e7   :  { %v1782_v45 = vpop.permute.xlu1 %1781  ;;  %5325 = vmatmul.mubr.msk.f32.vlgmr.msra.gmra.mxu0 %vm234_vm2, %v1707_v35  ;;  %v5832_v35 = vld [vmem:[#allocation3 + $0x18] sm:$0xff] }
0x10e8   :  { %5336 = vmatmul.mubr.msk.f32.vlgmr.msra.gmra.mxu1 %vm234_vm2, %v1782_v45  ;;  %5339 = vmatpush3.msra.mxu0 %v6556_v38 }
0x10e9   :  { %5340 = vmatprep.subr.mxu0 %v6048_v0  ;;  %5346 = vmatprep.mubr.msk.f32.mxu0 %vm6049_vm0, %v6048_v0 }
0x10ea   :  { %5341 = vmatpush3.msra.mxu0 %v6565_v49  ;;  %5350 = vmatpush3.msra.mxu1 %v6206_v34 }
0x10eb   :  { %5342 = vmatprep.subr.mxu0 %v6048_v0  ;;  %5351 = vmatprep.subr.mxu1 %v6048_v0 }
0x10ec   :  { %5343 = vmatpush3.msra.mxu0 %v6574_v51  ;;  %5352 = vmatpush3.msra.mxu1 %v6213_v36 }
0x10ed   :  { %5344 = vmatprep.subr.mxu0 %v6048_v0  ;;  %5353 = vmatprep.subr.mxu1 %v6048_v0 }
0x10ee   :  { %5345 = vmatpush3.msra.mxu0 %v6583_v43  ;;  %5354 = vmatpush3.msra.mxu1 %v6227_v39 }
0x10ef   :  { %5347 = vmatmul.mubr.msk.f32.vlgmr.msra.gmra.mxu0 %vm234_vm2, %v1782_v45  ;;  %5355 = vmatprep.subr.mxu1 %v6048_v0  ;;  %v5833_v45 = vld [vmem:[%s7120_s4 + $0x18] sm:$0xff] }
0x10f0   :  { %5360 = vmatprep.subr.mxu0 %v6048_v0  ;;  %5356 = vmatpush3.msra.mxu1 %v6236_v41 }
0x10f1   :  { %5361 = vmatpush3.msra.mxu0 %v6201_v32  ;;  %5357 = vmatprep.mubr.msk.f32.mxu1 %vm6049_vm0, %v6048_v0 }
0x10f2   :  { %5362 = vmatprep.subr.mxu0 %v6048_v0  ;;  %5371 = vmatprep.subr.mxu1 %v6048_v0 }
0x10f3   :  { %5363 = vmatpush3.msra.mxu0 %v6218_v37  ;;  %5368 = vmatprep.mubr.msk.f32.mxu0 %vm6049_vm0, %v6048_v0 }
0x10f4   :  { %5364 = vmatprep.subr.mxu0 %v6048_v0 }
0x10f5   :  { %5365 = vmatpush3.msra.mxu0 %v6241_v42 }
0x10f6   :  { %5366 = vmatprep.subr.mxu0 %v6048_v0 }
0x10f7   :  { %5367 = vmatpush3.msra.mxu0 %v6262_v46 }
0x10f8   :  { %5382 = vmatprep.subr.mxu0 %v6048_v0 }
0x11a7   :  { %v1776_v40 = vpop.f32.mrf.mxu0 }
0x11a8   :  { %v1851_v53 = vpop.f32.mrf.mxu1 }
0x11a9   :  { %v1852_v47 = vadd.f32 %v1851_v53, %v1776_v40  ;;  %v5326_v48 = vpop.f32.mrf.mxu0  ;;  %v5838_v40 = vld [vmem:[#allocation3] sm:$0xff] }
0x11aa   :  { %v5337_v55 = vpop.f32.mrf.mxu1  ;;  %v5839_v53 = vld [vmem:[%s7120_s4] sm:$0xff] }
0x11ab   :  { %v1855_v31 = vadd.f32 %v6328_v6, %v1852_v47 }
0x11ad   :  { %v4797_v44 = vmul.f32 -1.442695, %v1855_v31 }
0x11af   :  { %5798 = vpow2.f32 %v4797_v44  ;;  %v1949_v57 = vpop.f32.mrf.mxu0 }
0x11b0   :  { %v1953_v58 = vadd.f32 %v1949_v57, %v6300_v62 }
0x11b1   :  { %v5348_v59 = vpop.f32.mrf.mxu0 }
0x11b2   :  { %v4800_v60 = vmul.f32 -1.442695, %v1953_v58  ;;  %v5840_v59 = vld [vmem:[#allocation2 + $0x38] sm:$0xff] }
0x11b4   :  { %5800 = vpow2.f32 %v4800_v60 }
0x11bc   :  { %v5799_v61 = vpop.eup %5798 }
0x11bd   :  { %v1859_v63 = vadd.f32 1.0, %v5799_v61 }
0x11bf   :  { %5802 = vrcp.f32 %v1859_v63 }
0x11c1   :  { %v5801_v7 = vpop.eup %5800 }
0x11c2   :  { %v1957_v8 = vadd.f32 1.0, %v5801_v7 }
0x11c4   :  { %5804 = vrcp.f32 %v1957_v8 }
0x11cc   :  { %v5803_v13 = vpop.eup %5802 }
0x11cd   :  { %v1862_v14 = vmul.f32 2.0, %v5803_v13  ;;  %v1864_v22 = vmul.f32 %v5803_v13, %v6541_v27 }
0x11cf   :  { %v4798_v16 = vadd.f32 -1.0, %v1862_v14 }
0x11d1   :  { %v5805_v17 = vpop.eup %5804  ;;  %1866 = vrot.lane.b32.xlu0 %v4798_v16, %s6050_s3 }
0x11d2   :  { %v1960_v18 = vmul.f32 2.0, %v5805_v17  ;;  %v1962_v56 = vmul.f32 %v5805_v17, %v6543_v50 }
0x11d4   :  { %v4801_v19 = vadd.f32 -1.0, %v1960_v18 }
0x11d6   :  { %1964 = vrot.lane.b32.xlu1 %v4801_v19, %s6050_s3 }
0x1243   :  { %v1867_v62 = vpop.permute.xlu0 %1866 }
0x1244   :  { %v1869_v20 = vmul.f32 %v5803_v13, %v1867_v62 }
0x1246   :  { %1871 = vrot.lane.b32.xlu0 %v1869_v20, %s6051_s16 }
0x1248   :  { %v1965_v54 = vpop.permute.xlu1 %1964 }
0x1249   :  { %v1967_v21 = vmul.f32 %v5805_v17, %v1965_v54 }
0x124b   :  { %1969 = vrot.lane.b32.xlu1 %v1967_v21, %s6051_s16 }
0x12b8   :  { %v1872_v23 = vpop.permute.xlu0 %1871 }
0x12b9   :  { %v6611_v24 = vadd.f32 %v1872_v23, %v1864_v22 }
0x12bb   :  { %5806 = vtanh.f32 %v6611_v24 }
0x12bd   :  { %v1970_v25 = vpop.permute.xlu1 %1969 }
0x12be   :  { %v6615_v26 = vadd.f32 %v1970_v25, %v1962_v56 }
0x12c0   :  { %5808 = vtanh.f32 %v6615_v26 }
0x12c8   :  { %v5807_v28 = vpop.eup %5806 }
0x12c9   :  { %1877 = vrot.lane.b32.xlu0 %v5807_v28, %s6050_s3 }
0x12cd   :  { %v5809_v52 = vpop.eup %5808 }
0x12ce   :  { %1975 = vrot.lane.b32.xlu1 %v5809_v52, %s6050_s3 }
0x133b   :  { %v1878_v15 = vpop.permute.xlu0 %1877 }
0x133c   :  { %v1880_v27 = vmul.f32 %v5803_v13, %v1878_v15 }
0x133e   :  { %1980 = vrot.lane.b32.xlu0 %v1880_v27, %s6051_s16 }
0x1340   :  { %v1976_v29 = vpop.permute.xlu1 %1975 }
0x1341   :  { %v1978_v33 = vmul.f32 %v5805_v17, %v1976_v29 }
0x1343   :  { %2055 = vrot.lane.b32.xlu1 %v1978_v33, %s6051_s16 }
0x13b0   :  { %v1981_v50 = vpop.permute.xlu0 %1980 }
0x13b1   :  { %5358 = vmatmul.mubr.msk.f32.vlgmr.msra.gmra.mxu1 %vm234_vm2, %v1981_v50 }
0x13b2   :  { %5372 = vmatpush3.msra.mxu1 %v6556_v38  ;;  %5379 = vmatprep.mubr.msk.f32.mxu1 %vm6049_vm0, %v6048_v0  ;;  %v5834_v38 = vld [vmem:[#allocation3 + $0x10] sm:$0xff] }
0x13b3   :  { %5373 = vmatprep.subr.mxu1 %v6048_v0 }
0x13b4   :  { %5374 = vmatpush3.msra.mxu1 %v6565_v49  ;;  %v5835_v49 = vld [vmem:[%s7120_s4 + $0x10] sm:$0xff] }
0x13b5   :  { %5375 = vmatprep.subr.mxu1 %v6048_v0  ;;  %v2056_v30 = vpop.permute.xlu1 %2055 }
0x13b6   :  { %5376 = vmatpush3.msra.mxu1 %v6574_v51  ;;  %5369 = vmatmul.mubr.msk.f32.vlgmr.msra.gmra.mxu0 %vm234_vm2, %v2056_v30  ;;  %v5836_v51 = vld [vmem:[#allocation3 + $0x8] sm:$0xff] }
0x13b7   :  { %5377 = vmatprep.subr.mxu1 %v6048_v0  ;;  %5383 = vmatpush3.msra.mxu0 %v5832_v35 }
0x13b8   :  { %5378 = vmatpush3.msra.mxu1 %v6583_v43  ;;  %5384 = vmatprep.subr.mxu0 %v6048_v0  ;;  %v5837_v43 = vld [vmem:[%s7120_s4 + $0x8] sm:$0xff] }
0x13b9   :  { %5380 = vmatmul.mubr.msk.f32.vlgmr.msra.gmra.mxu1 %vm234_vm2, %v2056_v30  ;;  %5393 = vmatprep.subr.mxu1 %v6048_v0 }
0x13ba   :  { %5394 = vmatpush3.msra.mxu1 %v5833_v45  ;;  %5385 = vmatpush3.msra.mxu0 %v5834_v38 }
0x13bb   :  { %5395 = vmatprep.subr.mxu1 %v6048_v0  ;;  %5386 = vmatprep.subr.mxu0 %v6048_v0 }
0x13bc   :  { %5396 = vmatpush3.msra.mxu1 %v5835_v49  ;;  %5387 = vmatpush3.msra.mxu0 %v5836_v51 }
0x13bd   :  { %5397 = vmatprep.subr.mxu1 %v6048_v0  ;;  %5388 = vmatprep.subr.mxu0 %v6048_v0 }
0x13be   :  { %5398 = vmatpush3.msra.mxu1 %v5837_v43  ;;  %5401 = vmatprep.mubr.msk.f32.mxu1 %vm6049_vm0, %v6048_v0 }
0x13bf   :  { %5399 = vmatprep.subr.mxu1 %v6048_v0  ;;  %5389 = vmatpush3.msra.mxu0 %v5838_v40 }
0x13c0   :  { %5400 = vmatpush3.msra.mxu1 %v5839_v53  ;;  %5390 = vmatprep.mubr.msk.f32.mxu0 %vm6049_vm0, %v6048_v0  ;;  %v5841_v53 = vld [vmem:[%s7122_s6] ss:$0 sm:$0xff]  ;;  %s6684_s6 = smov 0  }
0x1471   :  { %v2050_v47 = vpop.f32.mrf.mxu1 }
0x1473   :  { %v5359_v48 = vpop.f32.mrf.mxu1 }
0x1476   :  { %v2125_v55 = vpop.f32.mrf.mxu0 }
0x1477   :  { %v2126_v31 = vadd.f32 %v2125_v55, %v2050_v47 }
0x1478   :  { %v5370_v44 = vpop.f32.mrf.mxu0 }
0x1479   :  { %v2129_v57 = vadd.f32 %v6328_v6, %v2126_v31  ;;  %v2223_v58 = vpop.f32.mrf.mxu1 }
0x147a   :  { %v2227_v60 = vadd.f32 %v5840_v59, %v2223_v58 }
0x147b   :  { %v4804_v61 = vmul.f32 -1.442695, %v2129_v57  ;;  %v5381_v63 = vpop.f32.mrf.mxu1 }
0x147c   :  { %v4807_v7 = vmul.f32 -1.442695, %v2227_v60 }
0x147d   :  { %5810 = vpow2.f32 %v4804_v61 }
0x147e   :  { %5812 = vpow2.f32 %v4807_v7 }
0x148a   :  { %v5811_v8 = vpop.eup %5810 }
0x148b   :  { %v5813_v13 = vpop.eup %5812  ;;  %v2133_v14 = vadd.f32 1.0, %v5811_v8 }
0x148c   :  { %v2231_v16 = vadd.f32 1.0, %v5813_v13 }
0x148d   :  { %5814 = vrcp.f32 %v2133_v14 }
0x148e   :  { %5816 = vrcp.f32 %v2231_v16 }
0x149a   :  { %v5815_v0 = vpop.eup %5814 }
0x149b   :  { %v5817_v17 = vpop.eup %5816  ;;  %v2136_v18 = vmul.f32 2.0, %v5815_v0  ;;  %v2138_v56 = vmul.f32 %v5815_v0, %v6611_v24 }
0x149c   :  { %v2234_v19 = vmul.f32 2.0, %v5817_v17  ;;  %v2236_v25 = vmul.f32 %v5817_v17, %v6615_v26 }
0x149d   :  { %v4805_v62 = vadd.f32 -1.0, %v2136_v18 }
0x149e   :  { %v4808_v20 = vadd.f32 -1.0, %v2234_v19 }
0x149f   :  { %2140 = vrot.lane.b32.xlu0 %v4805_v62, %s6050_s3 }
0x14a0   :  { %2238 = vrot.lane.b32.xlu1 %v4808_v20, %s6050_s3 }
0x1511   :  { %v2141_v54 = vpop.permute.xlu0 %2140 }
0x1512   :  { %v2239_v21 = vpop.permute.xlu1 %2238  ;;  %v2143_v22 = vmul.f32 %v5815_v0, %v2141_v54 }
0x1513   :  { %v2241_v23 = vmul.f32 %v5817_v17, %v2239_v21 }
0x1514   :  { %2145 = vrot.lane.b32.xlu0 %v2143_v22, %s6051_s16 }
0x1515   :  { %2243 = vrot.lane.b32.xlu1 %v2241_v23, %s6051_s16 }
0x1586   :  { %v2146_v28 = vpop.permute.xlu0 %2145 }
0x1587   :  { %v2244_v52 = vpop.permute.xlu1 %2243  ;;  %v2148_v15 = vadd.f32 %v2146_v28, %v2138_v56 }
0x1588   :  { %v2246_v27 = vadd.f32 %v2244_v52, %v2236_v25  }
0x1589   :  { %5818 = vtanh.f32 %v2148_v15 }
0x158a   :  { %5820 = vtanh.f32 %v2246_v27 }
0x1596   :  { %v5819_v29 = vpop.eup %5818 }
0x1597   :  { %v5821_v33 = vpop.eup %5820  ;;  %2151 = vrot.lane.b32.xlu0 %v5819_v29, %s6050_s3 }
0x1598   :  { %2249 = vrot.lane.b32.xlu1 %v5821_v33, %s6050_s3 }
0x1609   :  { %v2152_v50 = vpop.permute.xlu0 %2151 }
0x160a   :  { %v2250_v30 = vpop.permute.xlu1 %2249  ;;  %v2154_v35 = vmul.f32 %v5815_v0, %v2152_v50 }
0x160b   :  { %v2252_v45 = vmul.f32 %v5817_v17, %v2250_v30  }
0x160c   :  { %2254 = vrot.lane.b32.xlu0 %v2154_v35, %s6051_s16 }
0x160d   :  { %2329 = vrot.lane.b32.xlu1 %v2252_v45, %s6051_s16 }
0x167e   :  { %v2255_v24 = vpop.permute.xlu0 %2254 }
0x167f   :  { %v2330_v26 = vpop.permute.xlu1 %2329  ;;  %5391 = vmatmul.mubr.msk.f32.vlgmr.msra.gmra.mxu0 %vm234_vm2, %v2255_v24 }
0x1680   :  { %5402 = vmatmul.mubr.msk.f32.vlgmr.msra.gmra.mxu1 %vm234_vm2, %v2330_v26 }
0x173f   :  { %v2324_v38 = vpop.f32.mrf.mxu0 }
0x1740   :  { %v2399_v49 = vpop.f32.mrf.mxu1 }
0x1741   :  { %v2400_v51 = vadd.f32 %v2399_v49, %v2324_v38  ;;  %v5392_v43 = vpop.f32.mrf.mxu0 }
0x1742   :  { %v5403_v40 = vpop.f32.mrf.mxu1 }
0x1743   :  { %v2403_v47 = vadd.f32 %v5841_v53, %v2400_v51 }
0x1745   :  { %v4811_v48 = vmul.f32 -1.442695, %v2403_v47 }
0x1747   :  { %5822 = vpow2.f32 %v4811_v48 }
0x1754   :  { %v5823_v55 = vpop.eup %5822 }
0x1755   :  { %v2407_v31 = vadd.f32 1.0, %v5823_v55 }
0x1757   :  { %5824 = vrcp.f32 %v2407_v31 }
0x1764   :  { %v5825_v44 = vpop.eup %5824 }
0x1765   :  { %v2410_v57 = vmul.f32 2.0, %v5825_v44  ;;  %v2412_v61 = vmul.f32 %v5825_v44, %v2148_v15 }
0x1767   :  { %v4812_v58 = vadd.f32 -1.0, %v2410_v57 }
0x1769   :  { %2414 = vrot.lane.b32.xlu0 %v4812_v58, %s6050_s3 }
0x17db   :  { %v2415_v59 = vpop.permute.xlu0 %2414 }
0x17dc   :  { %v2417_v60 = vmul.f32 %v5825_v44, %v2415_v59 }
0x17de   :  { %2419 = vrot.lane.b32.xlu1 %v2417_v60, %s6051_s16 }
0x1850   :  { %v2420_v63 = vpop.permute.xlu1 %2419 }
0x1851   :  { %v2422_v7 = vadd.f32 %v2420_v63, %v2412_v61  }
0x1853   :  { %5826 = vtanh.f32 %v2422_v7 }
0x1860   :  { %v5827_v8 = vpop.eup %5826 }
0x1861   :  { %2425 = vrot.lane.b32.xlu0 %v5827_v8, %s6050_s3 }
0x18d3   :  { %v2426_v13 = vpop.permute.xlu0 %2425 }
0x18d4   :  { %v2428_v14 = vmul.f32 %v5825_v44, %v2426_v13  }
0x18d5 LB: > { %v6052_v16 = vmov 0.0   ;;  %vm6053_vm3 = vmmov 0   ;;  %s6054_s3 = smov 32   ;;  %v2439_v17 = vld [vmem:[#allocation2 + $0x30] sm:$0xff]  ;;  %s6055_s16 = smov 64   ;;  %v2717_v26 = vld [vmem:[#allocation2] sm:$0xff]  ;;  %s6042_s6 = sphi %s6684_s6, %s2434_s6   ;;  %v6038_v45 = vphi %v2252_v45, %v7126_v45   ;;  %v6034_v14 = vphi %v2428_v14, %v4627_v14   ;;  %v6030_v27 = vphi %v2246_v27, %v4445_v27   ;;  %v6026_v7 = vphi %v2422_v7, %v4621_v7  }
0x18d6   : > { %5404 = vmatprep.subr.mxu0 %v6052_v16  ;;  %5412 = vmatprep.mubr.msk.f32.mxu0 %vm6053_vm3, %v6052_v16  ;;  %s4871_s29 = sshll.u32 %s6042_s6, 3  ;;  %s2434_s6 = sadd.s32 1, %s6042_s6  }
0x18d7   : > { %2441 = vrot.lane.b32.xlu0 %v6038_v45, %s6054_s3  ;;  %5405 = vmatpush3.msra.mxu0 %v6147_v9  ;;  %s4710_s1 = scalar_lea.vmem [#allocation8], %s4871_s29  ;;  %p2431_p10 = scmp.ge.s32.totalorder %s2434_s6, 4  }
0x18d8   : > { %5406 = vmatprep.subr.mxu0 %v6052_v16  ;;  %5415 = vmatprep.subr.mxu1 %v6052_v16  ;;  %s6056_s30 = smov (%p2431_p10), [#allocation8]  }
0x18d9   : > { %5407 = vmatpush3.msra.mxu0 %v6153_v10  ;;  %5416 = vmatpush3.msra.mxu1 %v6206_v34  ;;  %s4717_s10 = sshll.u32 (%p2431_p10), %s6056_s30, 4  ;;  %s4718_s10 = int_to_ptr.vmem [resolvable:$true] %s4717_s10 }
0x18da   : > { %5408 = vmatprep.subr.mxu0 %v6052_v16  ;;  %5417 = vmatprep.subr.mxu1 %v6052_v16  ;;  %s5978_s11 = scalar_lea.vmem (%p2431_p10), %s4718_s10, 512  ;;  %p5983_p12 = scmp.lt.s32.totalorder (%p2431_p10), %s4718_s10, %s4718_s10 }
0x18db   : > { %5409 = vmatpush3.msra.mxu0 %v6161_v11  ;;  %5418 = vmatpush3.msra.mxu1 %v6213_v36  ;;  %p5979_p11 = scmp.ne.s32.totalorder (%p2431_p10), %s4718_s10, %s5978_s11  ;;  %p5984_p13 = scmp.lt.s32.totalorder (%p2431_p10), %s5978_s11, %s5978_s11 }
0x18dc   : > { %5410 = vmatprep.subr.mxu0 %v6052_v16  ;;  %5419 = vmatprep.subr.mxu1 %v6052_v16 }
0x18dd   : > { %5411 = vmatpush3.msra.mxu0 %v6169_v12  ;;  %5420 = vmatpush3.msra.mxu1 %v6227_v39  ;;  %p5985_p0 = por (%p2431_p10), %p5984_p13, %p5983_p12 }
0x18de   : > { %5421 = vmatprep.subr.mxu1 %v6052_v16  ;;  %5423 = vmatprep.mubr.msk.f32.mxu1 %vm6053_vm3, %v6052_v16 }
0x18df   : > { %5422 = vmatpush3.msra.mxu1 %v6236_v41  ;;  %5426 = vmatprep.subr.mxu0 %v6052_v16  ;;  %p5986_p1 = pnand (%p2431_p10), %p5985_p0, %p5979_p11 }
0x18e0   : > { %5437 = vmatprep.subr.mxu1 %v6052_v16 }
0x1949   : > { %v2442_v0 = vpop.permute.xlu0 %2441 }
0x194a   : > { %5413 = vmatmul.mubr.msk.f32.vlgmr.msra.gmra.mxu0 %vm234_vm2, %v2442_v0 }
0x194b   : > { %5427 = vmatpush3.msra.mxu0 %v6201_v32  ;;  %5434 = vmatprep.mubr.msk.f32.mxu0 %vm6053_vm3, %v6052_v16 }
0x194c   : > { %5428 = vmatprep.subr.mxu0 %v6052_v16 }
0x194d   : > { %5429 = vmatpush3.msra.mxu0 %v6218_v37 }
0x194e   : > { %5430 = vmatprep.subr.mxu0 %v6052_v16 }
0x194f   : > { %5431 = vmatpush3.msra.mxu0 %v6241_v42 }
0x1950   : > { %5432 = vmatprep.subr.mxu0 %v6052_v16 }
0x1951   : > { %5433 = vmatpush3.msra.mxu0 %v6262_v46 }
0x1952   : > { %5448 = vmatprep.subr.mxu0 %v6052_v16 }
0x1a0a   : > { %v2511_v18 = vpop.f32.mrf.mxu0 }
0x1a0b   : > { %v2515_v19 = vadd.f32 %v2511_v18, %v2439_v17 }
0x1a0c   : > { %v5414_v62 = vpop.f32.mrf.mxu0 }
0x1a0d   : > { %v4814_v20 = vmul.f32 -1.442695, %v2515_v19 }
0x1a0f   : > { %5842 = vpow2.f32 %v4814_v20 }
0x1a1c   : > { %v5843_v54 = vpop.eup %5842 }
0x1a1d   : > { %v2519_v21 = vadd.f32 1.0, %v5843_v54 }
0x1a1f   : > { %5844 = vrcp.f32 %v2519_v21 }
0x1a2c   : > { %v5845_v22 = vpop.eup %5844 }
0x1a2d   : > { %v2522_v23 = vmul.f32 2.0, %v5845_v22  ;;  %v2524_v52 = vmul.f32 %v6030_v27, %v5845_v22 }
0x1a2f   : > { %v4815_v56 = vadd.f32 -1.0, %v2522_v23 }
0x1a31   : > { %2526 = vrot.lane.b32.xlu0 %v4815_v56, %s6055_s16 }
0x1a35   : > { %2542 = vrot.lane.b32.xlu0 %v6034_v14, %s6054_s3 }
0x1aa3   : > { %v2527_v25 = vpop.permute.xlu0 %2526 }
0x1aa4   : > { %v2529_v28 = vmul.f32 %v5845_v22, %v2527_v25 }
0x1aa6   : > { %2531 = vrot.lane.b32.xlu1 %v2529_v28, %s6054_s3 }
0x1aa7   : > { %v2543_v33 = vpop.permute.xlu0 %2542 }
0x1aa8   : > { %5424 = vmatmul.mubr.msk.f32.vlgmr.msra.gmra.mxu1 %vm234_vm2, %v2543_v33 }
0x1aa9   : > { %5438 = vmatpush3.msra.mxu1 %v6147_v9  ;;  %5445 = vmatprep.mubr.msk.f32.mxu1 %vm6053_vm3, %v6052_v16 }
0x1aaa   : > { %5439 = vmatprep.subr.mxu1 %v6052_v16 }
0x1aab   : > { %5440 = vmatpush3.msra.mxu1 %v6153_v10 }
0x1aac   : > { %5441 = vmatprep.subr.mxu1 %v6052_v16 }
0x1aad   : > { %5442 = vmatpush3.msra.mxu1 %v6161_v11 }
0x1aae   : > { %5443 = vmatprep.subr.mxu1 %v6052_v16 }
0x1aaf   : > { %5444 = vmatpush3.msra.mxu1 %v6169_v12 }
0x1ab0   : > { %5459 = vmatprep.subr.mxu1 %v6052_v16 }
0x1b18   : > { %v2532_v15 = vpop.permute.xlu1 %2531 }
0x1b19   : > { %v6732_v29 = vadd.f32 %v2532_v15, %v2524_v52 }
0x1b1b   : > { %5846 = vtanh.f32 %v6732_v29 }
0x1b28   : > { %v5847_v27 = vpop.eup %5846 }
0x1b29   : > { %2537 = vrot.lane.b32.xlu1 %v5847_v27, %s6055_s16 }
0x1b68   : > { %v2612_v35 = vpop.f32.mrf.mxu1 }
0x1b6a   : > { %v5425_v45 = vpop.f32.mrf.mxu1 }
0x1b9b   : > { %v2538_v50 = vpop.permute.xlu1 %2537 }
0x1b9c   : > { %v2540_v30 = vmul.f32 %v5845_v22, %v2538_v50 }
0x1b9e   : > { %2617 = vrot.lane.b32.xlu1 %v2540_v30, %s6054_s3 }
0x1c10   : > { %v2618_v24 = vpop.permute.xlu1 %2617 }
0x1c11   : > { %5435 = vmatmul.mubr.msk.f32.vlgmr.msra.gmra.mxu0 %vm234_vm2, %v2618_v24  ;;  %5446 = vmatmul.mubr.msk.f32.vlgmr.msra.gmra.mxu1 %vm234_vm2, %v2618_v24 }
0x1c12   : > { %5460 = vmatpush3.msra.mxu1 %v6201_v32  ;;  %5449 = vmatpush3.msra.mxu0 %v6206_v34 }
0x1c13   : > { %5461 = vmatprep.subr.mxu1 %v6052_v16  ;;  %5450 = vmatprep.subr.mxu0 %v6052_v16 }
0x1c14   : > { %5462 = vmatpush3.msra.mxu1 %v6218_v37  ;;  %5451 = vmatpush3.msra.mxu0 %v6213_v36 }
0x1c15   : > { %5463 = vmatprep.subr.mxu1 %v6052_v16  ;;  %5452 = vmatprep.subr.mxu0 %v6052_v16 }
0x1c16   : > { %5464 = vmatpush3.msra.mxu1 %v6241_v42  ;;  %5453 = vmatpush3.msra.mxu0 %v6227_v39 }
0x1c17   : > { %5465 = vmatprep.subr.mxu1 %v6052_v16  ;;  %5467 = vmatprep.mubr.msk.f32.mxu1 %vm6053_vm3, %v6052_v16 }
0x1c18   : > { %5466 = vmatpush3.msra.mxu1 %v6262_v46  ;;  %5454 = vmatprep.subr.mxu0 %v6052_v16 }
0x1c19   : > { %5455 = vmatpush3.msra.mxu0 %v6236_v41  ;;  %5456 = vmatprep.mubr.msk.f32.mxu0 %vm6053_vm3, %v6052_v16 }
0x1c1a   : > { %5470 = vmatprep.subr.mxu0 %v6052_v16  ;;  %5481 = vmatprep.subr.mxu1 %v6052_v16 }
0x1cd1   : > { %v2687_v38 = vpop.f32.mrf.mxu0  ;;  %v2784_v49 = vpop.f32.mrf.mxu1 }
0x1cd2   : > { %v2688_v51 = vadd.f32 %v2687_v38, %v2612_v35  ;;  %v2788_v43 = vadd.f32 %v2784_v49, %v2717_v26  ;;  %v2990_v26 = vld [vmem:[#allocation2 + $0x18] sm:$0xff] }
0x1cd3   : > { %v5436_v40 = vpop.f32.mrf.mxu0  ;;  %v5447_v53 = vpop.f32.mrf.mxu1 }
0x1cd4   : > { %v2691_v47 = vadd.f32 %v6328_v6, %v2688_v51  ;;  %v4821_v48 = vmul.f32 -1.442695, %v2788_v43 }
0x1cd6   : > { %v4818_v55 = vmul.f32 -1.442695, %v2691_v47  ;;  %5848 = vpow2.f32 %v4821_v48 }
0x1cd8   : > { %5850 = vpow2.f32 %v4818_v55 }
0x1ce3   : > { %v5849_v31 = vpop.eup %5848 }
0x1ce4   : > { %v2792_v44 = vadd.f32 1.0, %v5849_v31 }
0x1ce5   : > { %v5851_v57 = vpop.eup %5850 }
0x1ce6   : > { %v2695_v58 = vadd.f32 1.0, %v5851_v57  ;;  %5852 = vrcp.f32 %v2792_v44 }
0x1ce8   : > { %5854 = vrcp.f32 %v2695_v58 }
0x1cf3   : > { %v5853_v59 = vpop.eup %5852 }
0x1cf4   : > { %v2795_v60 = vmul.f32 2.0, %v5853_v59  ;;  %v2797_v19 = vmul.f32 %v5853_v59, %v6732_v29 }
0x1cf5   : > { %v5855_v61 = vpop.eup %5854 }
0x1cf6   : > { %v4822_v63 = vadd.f32 -1.0, %v2795_v60  ;;  %v2698_v8 = vmul.f32 2.0, %v5855_v61  ;;  %v2700_v54 = vmul.f32 %v6026_v7, %v5855_v61 }
0x1cf8   : > { %2799 = vrot.lane.b32.xlu1 %v4822_v63, %s6055_s16  ;;  %v4819_v13 = vadd.f32 -1.0, %v2698_v8 }
0x1cfa   : > { %2702 = vrot.lane.b32.xlu0 %v4819_v13, %s6055_s16 }
0x1d6a   : > { %v2800_v14 = vpop.permute.xlu1 %2799 }
0x1d6b   : > { %v2802_v0 = vmul.f32 %v5853_v59, %v2800_v14 }
0x1d6c   : > { %v2703_v17 = vpop.permute.xlu0 %2702 }
0x1d6d   : > { %v2705_v18 = vmul.f32 %v5855_v61, %v2703_v17  ;;  %2804 = vrot.lane.b32.xlu1 %v2802_v0, %s6054_s3 }
0x1d6f   : > { %2707 = vrot.lane.b32.xlu0 %v2705_v18, %s6054_s3 }
0x1ddf   : > { %v2805_v62 = vpop.permute.xlu1 %2804 }
0x1de0   : > { %v6776_v20 = vadd.f32 %v2805_v62, %v2797_v19 }
0x1de1   : > { %v2708_v21 = vpop.permute.xlu0 %2707 }
0x1de2   : > { %5856 = vtanh.f32 %v6776_v20  ;;  %v6780_v22 = vadd.f32 %v2708_v21, %v2700_v54 }
0x1de4   : > { %5858 = vtanh.f32 %v6780_v22 }
0x1def   : > { %v5857_v23 = vpop.eup %5856 }
0x1df0   : > { %2810 = vrot.lane.b32.xlu1 %v5857_v23, %s6055_s16 }
0x1df1   : > { %v5859_v56 = vpop.eup %5858 }
0x1df2   : > { %2713 = vrot.lane.b32.xlu0 %v5859_v56, %s6055_s16 }
0x1e62   : > { %v2811_v25 = vpop.permute.xlu1 %2810 }
0x1e63   : > { %v2813_v28 = vmul.f32 %v5853_v59, %v2811_v25 }
0x1e64   : > { %v2714_v52 = vpop.permute.xlu0 %2713 }
0x1e65   : > { %v2716_v15 = vmul.f32 %v5855_v61, %v2714_v52  ;;  %2890 = vrot.lane.b32.xlu1 %v2813_v28, %s6054_s3 }
0x1e67   : > { %2815 = vrot.lane.b32.xlu0 %v2716_v15, %s6054_s3 }
0x1ed7   : > { %v2891_v7 = vpop.permute.xlu1 %2890 }
0x1ed8   : > { %5468 = vmatmul.mubr.msk.f32.vlgmr.msra.gmra.mxu1 %vm234_vm2, %v2891_v7 }
0x1ed9   : > { %v2816_v29 = vpop.permute.xlu0 %2815  ;;  %5482 = vmatpush3.msra.mxu1 %v6206_v34  ;;  %5489 = vmatprep.mubr.msk.f32.mxu1 %vm6053_vm3, %v6052_v16 }
0x1eda   : > { %5457 = vmatmul.mubr.msk.f32.vlgmr.msra.gmra.mxu0 %vm234_vm2, %v2816_v29  ;;  %5483 = vmatprep.subr.mxu1 %v6052_v16 }
0x1edb   : > { %5471 = vmatpush3.msra.mxu0 %v6147_v9  ;;  %5478 = vmatprep.mubr.msk.f32.mxu0 %vm6053_vm3, %v6052_v16 }
0x1edc   : > { %5472 = vmatprep.subr.mxu0 %v6052_v16  ;;  %5484 = vmatpush3.msra.mxu1 %v6213_v36 }
0x1edd   : > { %5473 = vmatpush3.msra.mxu0 %v6153_v10  ;;  %5485 = vmatprep.subr.mxu1 %v6052_v16 }
0x1ede   : > { %5474 = vmatprep.subr.mxu0 %v6052_v16  ;;  %5486 = vmatpush3.msra.mxu1 %v6227_v39 }
0x1edf   : > { %5475 = vmatpush3.msra.mxu0 %v6161_v11  ;;  %5487 = vmatprep.subr.mxu1 %v6052_v16 }
0x1ee0   : > { %5476 = vmatprep.subr.mxu0 %v6052_v16  ;;  %5488 = vmatpush3.msra.mxu1 %v6236_v41 }
0x1ee1   : > { %5477 = vmatpush3.msra.mxu0 %v6169_v12  ;;  %5503 = vmatprep.subr.mxu1 %v6052_v16 }
0x1ee2   : > { %5479 = vmatmul.mubr.msk.f32.vlgmr.msra.gmra.mxu0 %vm234_vm2, %v2891_v7  ;;  %5492 = vmatprep.subr.mxu0 %v6052_v16  ;;  %v3263_v7 = vld [vmem:[#allocation2 + $0x10] sm:$0xff] }
0x1ee3   : > { %5493 = vmatpush3.msra.mxu0 %v6201_v32  ;;  %5500 = vmatprep.mubr.msk.f32.mxu0 %vm6053_vm3, %v6052_v16 }
0x1ee4   : > { %5494 = vmatprep.subr.mxu0 %v6052_v16 }
0x1ee5   : > { %5495 = vmatpush3.msra.mxu0 %v6218_v37 }
0x1ee6   : > { %5496 = vmatprep.subr.mxu0 %v6052_v16 }
0x1ee7   : > { %5497 = vmatpush3.msra.mxu0 %v6241_v42 }
0x1ee8   : > { %5498 = vmatprep.subr.mxu0 %v6052_v16 }
0x1ee9   : > { %5499 = vmatpush3.msra.mxu0 %v6262_v46 }
0x1eea   : > { %5514 = vmatprep.subr.mxu0 %v6052_v16 }
0x1f98   : > { %v2960_v33 = vpop.f32.mrf.mxu1 }
0x1f9a   : > { %v2885_v27 = vpop.f32.mrf.mxu0  ;;  %v5469_v50 = vpop.f32.mrf.mxu1 }
0x1f9b   : > { %v2961_v30 = vadd.f32 %v2960_v33, %v2885_v27 }
0x1f9c   : > { %v5458_v35 = vpop.f32.mrf.mxu0 }
0x1f9d   : > { %v2964_v45 = vadd.f32 %v6328_v6, %v2961_v30 }
0x1f9f   : > { %v4825_v24 = vmul.f32 -1.442695, %v2964_v45 }
0x1fa1   : > { %5860 = vpow2.f32 %v4825_v24 }
0x1fa2   : > { %v3057_v38 = vpop.f32.mrf.mxu0 }
0x1fa3   : > { %v3061_v49 = vadd.f32 %v3057_v38, %v2990_v26 }
0x1fa4   : > { %v5480_v51 = vpop.f32.mrf.mxu0 }
0x1fa5   : > { %v4828_v43 = vmul.f32 -1.442695, %v3061_v49 }
0x1fa7   : > { %5862 = vpow2.f32 %v4828_v43 }
0x1fae   : > { %v5861_v40 = vpop.eup %5860 }
0x1faf   : > { %v2968_v53 = vadd.f32 1.0, %v5861_v40 }
0x1fb1   : > { %5864 = vrcp.f32 %v2968_v53 }
0x1fb4   : > { %v5863_v47 = vpop.eup %5862 }
0x1fb5   : > { %v3065_v48 = vadd.f32 1.0, %v5863_v47 }
0x1fb7   : > { %5866 = vrcp.f32 %v3065_v48 }
0x1fbe   : > { %v5865_v55 = vpop.eup %5864 }
0x1fbf   : > { %v2971_v31 = vmul.f32 2.0, %v5865_v55  ;;  %v2973_v13 = vmul.f32 %v5865_v55, %v6780_v22 }
0x1fc1   : > { %v4826_v44 = vadd.f32 -1.0, %v2971_v31 }
0x1fc3   : > { %2975 = vrot.lane.b32.xlu0 %v4826_v44, %s6055_s16 }
0x1fc4   : > { %v5867_v57 = vpop.eup %5866 }
0x1fc5   : > { %v3068_v58 = vmul.f32 2.0, %v5867_v57  ;;  %v3070_v17 = vmul.f32 %v5867_v57, %v6776_v20 }
0x1fc7   : > { %v4829_v59 = vadd.f32 -1.0, %v3068_v58 }
0x1fc9   : > { %3072 = vrot.lane.b32.xlu1 %v4829_v59, %s6055_s16 }
0x2035   : > { %v2976_v60 = vpop.permute.xlu0 %2975 }
0x2036   : > { %v2978_v61 = vmul.f32 %v5865_v55, %v2976_v60 }
0x2038   : > { %2980 = vrot.lane.b32.xlu0 %v2978_v61, %s6054_s3 }
0x203b   : > { %v3073_v63 = vpop.permute.xlu1 %3072 }
0x203c   : > { %v3075_v8 = vmul.f32 %v5867_v57, %v3073_v63 }
0x203e   : > { %3077 = vrot.lane.b32.xlu1 %v3075_v8, %s6054_s3 }
0x20aa   : > { %v2981_v14 = vpop.permute.xlu0 %2980 }
0x20ab   : > { %v6826_v0 = vadd.f32 %v2981_v14, %v2973_v13 }
0x20ad   : > { %5868 = vtanh.f32 %v6826_v0 }
0x20b0   : > { %v3078_v18 = vpop.permute.xlu1 %3077 }
0x20b1   : > { %v6830_v19 = vadd.f32 %v3078_v18, %v3070_v17 }
0x20b3   : > { %5870 = vtanh.f32 %v6830_v19 }
0x20ba   : > { %v5869_v62 = vpop.eup %5868 }
0x20bb   : > { %2986 = vrot.lane.b32.xlu0 %v5869_v62, %s6055_s16 }
0x20c0   : > { %v5871_v54 = vpop.eup %5870 }
0x20c1   : > { %3083 = vrot.lane.b32.xlu1 %v5871_v54, %s6055_s16 }
0x212d   : > { %v2987_v21 = vpop.permute.xlu0 %2986 }
0x212e   : > { %v2989_v22 = vmul.f32 %v5865_v55, %v2987_v21 }
0x2130   : > { %3088 = vrot.lane.b32.xlu0 %v2989_v22, %s6054_s3 }
0x2133   : > { %v3084_v23 = vpop.permute.xlu1 %3083 }
0x2134   : > { %v3086_v56 = vmul.f32 %v5867_v57, %v3084_v23 }
0x2136   : > { %3163 = vrot.lane.b32.xlu1 %v3086_v56, %s6054_s3 }
0x21a2   : > { %v3089_v20 = vpop.permute.xlu0 %3088 }
0x21a3   : > { %5490 = vmatmul.mubr.msk.f32.vlgmr.msra.gmra.mxu1 %vm234_vm2, %v3089_v20 }
0x21a4   : > { %5504 = vmatpush3.msra.mxu1 %v6147_v9  ;;  %5511 = vmatprep.mubr.msk.f32.mxu1 %vm6053_vm3, %v6052_v16 }
0x21a5   : > { %5505 = vmatprep.subr.mxu1 %v6052_v16 }
0x21a6   : > { %5506 = vmatpush3.msra.mxu1 %v6153_v10 }
0x21a7   : > { %5507 = vmatprep.subr.mxu1 %v6052_v16 }
0x21a8   : > { %5508 = vmatpush3.msra.mxu1 %v6161_v11  ;;  %v3164_v25 = vpop.permute.xlu1 %3163 }
0x21a9   : > { %5501 = vmatmul.mubr.msk.f32.vlgmr.msra.gmra.mxu0 %vm234_vm2, %v3164_v25  ;;  %5509 = vmatprep.subr.mxu1 %v6052_v16 }
0x21aa   : > { %5510 = vmatpush3.msra.mxu1 %v6169_v12  ;;  %5515 = vmatpush3.msra.mxu0 %v6206_v34 }
0x21ab   : > { %5512 = vmatmul.mubr.msk.f32.vlgmr.msra.gmra.mxu1 %vm234_vm2, %v3164_v25  ;;  %5525 = vmatprep.subr.mxu1 %v6052_v16 }
0x21ac   : > { %5516 = vmatprep.subr.mxu0 %v6052_v16  ;;  %5526 = vmatpush3.msra.mxu1 %v6201_v32 }
0x21ad   : > { %5517 = vmatpush3.msra.mxu0 %v6213_v36  ;;  %5527 = vmatprep.subr.mxu1 %v6052_v16 }
0x21ae   : > { %5518 = vmatprep.subr.mxu0 %v6052_v16  ;;  %5528 = vmatpush3.msra.mxu1 %v6218_v37 }
0x21af   : > { %5519 = vmatpush3.msra.mxu0 %v6227_v39  ;;  %5529 = vmatprep.subr.mxu1 %v6052_v16 }
0x21b0   : > { %5520 = vmatprep.subr.mxu0 %v6052_v16  ;;  %5530 = vmatpush3.msra.mxu1 %v6241_v42 }
0x21b1   : > { %5521 = vmatpush3.msra.mxu0 %v6236_v41  ;;  %5531 = vmatprep.subr.mxu1 %v6052_v16 }
0x21b2   : > { %5532 = vmatpush3.msra.mxu1 %v6262_v46  ;;  %5533 = vmatprep.mubr.msk.f32.mxu1 %vm6053_vm3, %v6052_v16 }
0x21b3   : > { %5522 = vmatprep.mubr.msk.f32.mxu0 %vm6053_vm3, %v6052_v16  ;;  %5536 = vmatprep.subr.mxu0 %v6052_v16 }
0x21b4   : > { %5547 = vmatprep.subr.mxu1 %v6052_v16 }
0x2263   : > { %v3158_v28 = vpop.f32.mrf.mxu1 }
0x2265   : > { %v5491_v52 = vpop.f32.mrf.mxu1 }
0x2269   : > { %v3233_v15 = vpop.f32.mrf.mxu0 }
0x226a   : > { %v3234_v29 = vadd.f32 %v3233_v15, %v3158_v28  ;;  %v3536_v15 = vld [vmem:[#allocation2 + $0x8] sm:$0xff] }
0x226b   : > { %v5502_v33 = vpop.f32.mrf.mxu0  ;;  %v3330_v27 = vpop.f32.mrf.mxu1 }
0x226c   : > { %v3237_v50 = vadd.f32 %v6328_v6, %v3234_v29  ;;  %v3334_v30 = vadd.f32 %v3330_v27, %v3263_v7 }
0x226d   : > { %v5513_v35 = vpop.f32.mrf.mxu1 }
0x226e   : > { %v4832_v45 = vmul.f32 -1.442695, %v3237_v50  ;;  %v4835_v24 = vmul.f32 -1.442695, %v3334_v30 }
0x2270   : > { %5872 = vpow2.f32 %v4832_v45 }
0x2271   : > { %5874 = vpow2.f32 %v4835_v24 }
0x227d   : > { %v5873_v26 = vpop.eup %5872 }
0x227e   : > { %v5875_v38 = vpop.eup %5874  ;;  %v3241_v49 = vadd.f32 1.0, %v5873_v26 }
0x227f   : > { %v3338_v51 = vadd.f32 1.0, %v5875_v38 }
0x2280   : > { %5876 = vrcp.f32 %v3241_v49 }
0x2281   : > { %5878 = vrcp.f32 %v3338_v51 }
0x228d   : > { %v5877_v43 = vpop.eup %5876 }
0x228e   : > { %v5879_v40 = vpop.eup %5878  ;;  %v3244_v53 = vmul.f32 2.0, %v5877_v43  ;;  %v3246_v59 = vmul.f32 %v5877_v43, %v6826_v0 }
0x228f   : > { %v3341_v47 = vmul.f32 2.0, %v5879_v40  ;;  %v3343_v60 = vmul.f32 %v5879_v40, %v6830_v19 }
0x2290   : > { %v4833_v48 = vadd.f32 -1.0, %v3244_v53 }
0x2291   : > { %v4836_v55 = vadd.f32 -1.0, %v3341_v47 }
0x2292   : > { %3248 = vrot.lane.b32.xlu0 %v4833_v48, %s6055_s16 }
0x2293   : > { %3345 = vrot.lane.b32.xlu1 %v4836_v55, %s6055_s16 }
0x2304   : > { %v3249_v31 = vpop.permute.xlu0 %3248 }
0x2305   : > { %v3346_v44 = vpop.permute.xlu1 %3345  ;;  %v3251_v57 = vmul.f32 %v5877_v43, %v3249_v31 }
0x2306   : > { %v3348_v58 = vmul.f32 %v5879_v40, %v3346_v44 }
0x2307   : > { %3253 = vrot.lane.b32.xlu0 %v3251_v57, %s6054_s3 }
0x2308   : > { %3350 = vrot.lane.b32.xlu1 %v3348_v58, %s6054_s3 }
0x2379   : > { %v3254_v61 = vpop.permute.xlu0 %3253 }
0x237a   : > { %v3351_v63 = vpop.permute.xlu1 %3350  ;;  %v6877_v8 = vadd.f32 %v3254_v61, %v3246_v59 }
0x237b   : > { %v6879_v13 = vadd.f32 %v3351_v63, %v3343_v60 }
0x237c   : > { %5880 = vtanh.f32 %v6877_v8 }
0x237d   : > { %5882 = vtanh.f32 %v6879_v13 }
0x2389   : > { %v5881_v14 = vpop.eup %5880 }
0x238a   : > { %v5883_v17 = vpop.eup %5882  ;;  %3259 = vrot.lane.b32.xlu0 %v5881_v14, %s6055_s16 }
0x238b   : > { %3356 = vrot.lane.b32.xlu1 %v5883_v17, %s6055_s16 }
0x23fc   : > { %v3260_v18 = vpop.permute.xlu0 %3259 }
0x23fd   : > { %v3357_v0 = vpop.permute.xlu1 %3356  ;;  %v3262_v62 = vmul.f32 %v5877_v43, %v3260_v18 }
0x23fe   : > { %v3359_v19 = vmul.f32 %v5879_v40, %v3357_v0 }
0x23ff   : > { %3361 = vrot.lane.b32.xlu0 %v3262_v62, %s6054_s3 }
0x2400   : > { %3436 = vrot.lane.b32.xlu1 %v3359_v19, %s6054_s3 }
0x2471   : > { %v3362_v54 = vpop.permute.xlu0 %3361 }
0x2472   : > { %v3437_v21 = vpop.permute.xlu1 %3436  ;;  %5523 = vmatmul.mubr.msk.f32.vlgmr.msra.gmra.mxu0 %vm234_vm2, %v3362_v54 }
0x2473   : > { %5534 = vmatmul.mubr.msk.f32.vlgmr.msra.gmra.mxu1 %vm234_vm2, %v3437_v21  ;;  %5537 = vmatpush3.msra.mxu0 %v6147_v9 }
0x2474   : > { %5538 = vmatprep.subr.mxu0 %v6052_v16  ;;  %5544 = vmatprep.mubr.msk.f32.mxu0 %vm6053_vm3, %v6052_v16 }
0x2475   : > { %5539 = vmatpush3.msra.mxu0 %v6153_v10  ;;  %5548 = vmatpush3.msra.mxu1 %v6206_v34 }
0x2476   : > { %5540 = vmatprep.subr.mxu0 %v6052_v16  ;;  %5549 = vmatprep.subr.mxu1 %v6052_v16 }
0x2477   : > { %5541 = vmatpush3.msra.mxu0 %v6161_v11  ;;  %5550 = vmatpush3.msra.mxu1 %v6213_v36 }
0x2478   : > { %5542 = vmatprep.subr.mxu0 %v6052_v16  ;;  %5551 = vmatprep.subr.mxu1 %v6052_v16 }
0x2479   : > { %5543 = vmatpush3.msra.mxu0 %v6169_v12  ;;  %5552 = vmatpush3.msra.mxu1 %v6227_v39 }
0x247a   : > { %5545 = vmatmul.mubr.msk.f32.vlgmr.msra.gmra.mxu0 %vm234_vm2, %v3437_v21  ;;  %5553 = vmatprep.subr.mxu1 %v6052_v16  ;;  %v3809_v21 = vld [vmem:[#allocation2 + $0x20] sm:$0xff] }
0x247b   : > { %5558 = vmatprep.subr.mxu0 %v6052_v16  ;;  %5554 = vmatpush3.msra.mxu1 %v6236_v41 }
0x247c   : > { %5559 = vmatpush3.msra.mxu0 %v6201_v32  ;;  %5555 = vmatprep.mubr.msk.f32.mxu1 %vm6053_vm3, %v6052_v16 }
0x247d   : > { %5560 = vmatprep.subr.mxu0 %v6052_v16  ;;  %5569 = vmatprep.subr.mxu1 %v6052_v16 }
0x247e   : > { %5561 = vmatpush3.msra.mxu0 %v6218_v37  ;;  %5566 = vmatprep.mubr.msk.f32.mxu0 %vm6053_vm3, %v6052_v16 }
0x247f   : > { %5562 = vmatprep.subr.mxu0 %v6052_v16 }
0x2480   : > { %5563 = vmatpush3.msra.mxu0 %v6241_v42 }
0x2481   : > { %5564 = vmatprep.subr.mxu0 %v6052_v16 }
0x2482   : > { %5565 = vmatpush3.msra.mxu0 %v6262_v46 }
0x2483   : > { %5580 = vmatprep.subr.mxu0 %v6052_v16 }
0x2532   : > { %v3431_v22 = vpop.f32.mrf.mxu0 }
0x2533   : > { %v3506_v23 = vpop.f32.mrf.mxu1 }
0x2534   : > { %v3507_v56 = vadd.f32 %v3506_v23, %v3431_v22  ;;  %v5524_v20 = vpop.f32.mrf.mxu0 }
0x2535   : > { %v5535_v25 = vpop.f32.mrf.mxu1 }
0x2536   : > { %v3510_v28 = vadd.f32 %v6328_v6, %v3507_v56 }
0x2538   : > { %v4839_v52 = vmul.f32 -1.442695, %v3510_v28 }
0x253a   : > { %5884 = vpow2.f32 %v4839_v52  ;;  %v3603_v7 = vpop.f32.mrf.mxu0 }
0x253b   : > { %v3607_v29 = vadd.f32 %v3603_v7, %v3536_v15 }
0x253c   : > { %v5546_v33 = vpop.f32.mrf.mxu0 }
0x253d   : > { %v4842_v27 = vmul.f32 -1.442695, %v3607_v29 }
0x253f   : > { %5886 = vpow2.f32 %v4842_v27 }
0x2547   : > { %v5885_v50 = vpop.eup %5884 }
0x2548   : > { %v3514_v30 = vadd.f32 1.0, %v5885_v50 }
0x254a   : > { %5888 = vrcp.f32 %v3514_v30 }
0x254c   : > { %v5887_v35 = vpop.eup %5886 }
0x254d   : > { %v3611_v45 = vadd.f32 1.0, %v5887_v35 }
0x254f   : > { %5890 = vrcp.f32 %v3611_v45 }
0x2557   : > { %v5889_v24 = vpop.eup %5888 }
0x2558   : > { %v3517_v26 = vmul.f32 2.0, %v5889_v24  ;;  %v3519_v55 = vmul.f32 %v5889_v24, %v6877_v8 }
0x255a   : > { %v4840_v38 = vadd.f32 -1.0, %v3517_v26 }
0x255c   : > { %v5891_v49 = vpop.eup %5890  ;;  %3521 = vrot.lane.b32.xlu0 %v4840_v38, %s6055_s16 }
0x255d   : > { %v3614_v51 = vmul.f32 2.0, %v5891_v49  ;;  %v3616_v57 = vmul.f32 %v5891_v49, %v6879_v13 }
0x255f   : > { %v4843_v43 = vadd.f32 -1.0, %v3614_v51 }
0x2561   : > { %3618 = vrot.lane.b32.xlu1 %v4843_v43, %s6055_s16 }
0x25ce   : > { %v3522_v40 = vpop.permute.xlu0 %3521 }
0x25cf   : > { %v3524_v53 = vmul.f32 %v5889_v24, %v3522_v40 }
0x25d1   : > { %3526 = vrot.lane.b32.xlu0 %v3524_v53, %s6054_s3 }
0x25d3   : > { %v3619_v47 = vpop.permute.xlu1 %3618 }
0x25d4   : > { %v3621_v48 = vmul.f32 %v5891_v49, %v3619_v47 }
0x25d6   : > { %3623 = vrot.lane.b32.xlu1 %v3621_v48, %s6054_s3 }
0x2643   : > { %v3527_v31 = vpop.permute.xlu0 %3526 }
0x2644   : > { %v6926_v44 = vadd.f32 %v3527_v31, %v3519_v55 }
0x2646   : > { %5892 = vtanh.f32 %v6926_v44 }
0x2648   : > { %v3624_v58 = vpop.permute.xlu1 %3623 }
0x2649   : > { %v6930_v59 = vadd.f32 %v3624_v58, %v3616_v57 }
0x264b   : > { %5894 = vtanh.f32 %v6930_v59 }
0x2653   : > { %v5893_v60 = vpop.eup %5892 }
0x2654   : > { %3532 = vrot.lane.b32.xlu0 %v5893_v60, %s6055_s16 }
0x2658   : > { %v5895_v61 = vpop.eup %5894 }
0x2659   : > { %3629 = vrot.lane.b32.xlu1 %v5895_v61, %s6055_s16 }
0x26c6   : > { %v3533_v63 = vpop.permute.xlu0 %3532 }
0x26c7   : > { %v3535_v8 = vmul.f32 %v5889_v24, %v3533_v63 }
0x26c9   : > { %3634 = vrot.lane.b32.xlu0 %v3535_v8, %s6054_s3 }
0x26cb   : > { %v3630_v14 = vpop.permute.xlu1 %3629 }
0x26cc   : > { %v3632_v17 = vmul.f32 %v5891_v49, %v3630_v14 }
0x26ce   : > { %3709 = vrot.lane.b32.xlu1 %v3632_v17, %s6054_s3 }
0x273b   : > { %v3635_v13 = vpop.permute.xlu0 %3634 }
0x273c   : > { %5556 = vmatmul.mubr.msk.f32.vlgmr.msra.gmra.mxu1 %vm234_vm2, %v3635_v13 }
0x273d   : > { %5570 = vmatpush3.msra.mxu1 %v6147_v9  ;;  %5577 = vmatprep.mubr.msk.f32.mxu1 %vm6053_vm3, %v6052_v16 }
0x273e   : > { %5571 = vmatprep.subr.mxu1 %v6052_v16 }
0x273f   : > { %5572 = vmatpush3.msra.mxu1 %v6153_v10 }
0x2740   : > { %5573 = vmatprep.subr.mxu1 %v6052_v16  ;;  %v3710_v18 = vpop.permute.xlu1 %3709 }
0x2741   : > { %5574 = vmatpush3.msra.mxu1 %v6161_v11  ;;  %5567 = vmatmul.mubr.msk.f32.vlgmr.msra.gmra.mxu0 %vm234_vm2, %v3710_v18 }
0x2742   : > { %5575 = vmatprep.subr.mxu1 %v6052_v16  ;;  %5581 = vmatpush3.msra.mxu0 %v6206_v34 }
0x2743   : > { %5576 = vmatpush3.msra.mxu1 %v6169_v12  ;;  %5582 = vmatprep.subr.mxu0 %v6052_v16 }
0x2744   : > { %5578 = vmatmul.mubr.msk.f32.vlgmr.msra.gmra.mxu1 %vm234_vm2, %v3710_v18  ;;  %5591 = vmatprep.subr.mxu1 %v6052_v16 }
0x2745   : > { %5592 = vmatpush3.msra.mxu1 %v6201_v32  ;;  %5583 = vmatpush3.msra.mxu0 %v6213_v36 }
0x2746   : > { %5593 = vmatprep.subr.mxu1 %v6052_v16  ;;  %5584 = vmatprep.subr.mxu0 %v6052_v16 }
0x2747   : > { %5594 = vmatpush3.msra.mxu1 %v6218_v37  ;;  %5585 = vmatpush3.msra.mxu0 %v6227_v39 }
0x2748   : > { %5595 = vmatprep.subr.mxu1 %v6052_v16  ;;  %5586 = vmatprep.subr.mxu0 %v6052_v16 }
0x2749   : > { %5596 = vmatpush3.msra.mxu1 %v6241_v42  ;;  %5587 = vmatpush3.msra.mxu0 %v6236_v41 }
0x274a   : > { %5597 = vmatprep.subr.mxu1 %v6052_v16  ;;  %5599 = vmatprep.mubr.msk.f32.mxu1 %vm6053_vm3, %v6052_v16 }
0x274b   : > { %5598 = vmatpush3.msra.mxu1 %v6262_v46  ;;  %5588 = vmatprep.mubr.msk.f32.mxu0 %vm6053_vm3, %v6052_v16 }
0x274c   : > { %5602 = vmatprep.subr.mxu0 %v6052_v16  ;;  %5613 = vmatprep.subr.mxu1 %v6052_v16 }
0x27fc   : > { %v3704_v0 = vpop.f32.mrf.mxu1 }
0x27fe   : > { %v5557_v62 = vpop.f32.mrf.mxu1 }
0x2801   : > { %v3779_v19 = vpop.f32.mrf.mxu0 }
0x2802   : > { %v3780_v54 = vadd.f32 %v3779_v19, %v3704_v0  ;;  %v4082_v19 = vld [vmem:[#allocation2 + $0x28] sm:$0xff] }
0x2803   : > { %v5568_v22 = vpop.f32.mrf.mxu0 }
0x2804   : > { %v3783_v23 = vadd.f32 %v6328_v6, %v3780_v54  ;;  %v3876_v56 = vpop.f32.mrf.mxu1 }
0x2805   : > { %v3880_v20 = vadd.f32 %v3876_v56, %v3809_v21 }
0x2806   : > { %v4846_v25 = vmul.f32 -1.442695, %v3783_v23  ;;  %v5579_v28 = vpop.f32.mrf.mxu1 }
0x2807   : > { %v4849_v52 = vmul.f32 -1.442695, %v3880_v20 }
0x2808   : > { %5896 = vpow2.f32 %v4846_v25 }
0x2809   : > { %5898 = vpow2.f32 %v4849_v52 }
0x2815   : > { %v5897_v15 = vpop.eup %5896 }
0x2816   : > { %v5899_v7 = vpop.eup %5898  ;;  %v3787_v29 = vadd.f32 1.0, %v5897_v15 }
0x2817   : > { %v3884_v33 = vadd.f32 1.0, %v5899_v7 }
0x2818   : > { %5900 = vrcp.f32 %v3787_v29 }
0x2819   : > { %5902 = vrcp.f32 %v3884_v33 }
0x2825   : > { %v5901_v27 = vpop.eup %5900 }
0x2826   : > { %v5903_v50 = vpop.eup %5902  ;;  %v3790_v30 = vmul.f32 2.0, %v5901_v27  ;;  %v3792_v43 = vmul.f32 %v5901_v27, %v6926_v44 }
0x2827   : > { %v3887_v35 = vmul.f32 2.0, %v5903_v50  ;;  %v3889_v40 = vmul.f32 %v5903_v50, %v6930_v59 }
0x2828   : > { %v4847_v45 = vadd.f32 -1.0, %v3790_v30 }
0x2829   : > { %v4850_v24 = vadd.f32 -1.0, %v3887_v35 }
0x282a   : > { %3794 = vrot.lane.b32.xlu0 %v4847_v45, %s6055_s16 }
0x282b   : > { %3891 = vrot.lane.b32.xlu1 %v4850_v24, %s6055_s16 }
0x289c   : > { %v3795_v26 = vpop.permute.xlu0 %3794 }
0x289d   : > { %v3892_v38 = vpop.permute.xlu1 %3891  ;;  %v3797_v49 = vmul.f32 %v5901_v27, %v3795_v26 }
0x289e   : > { %v3894_v51 = vmul.f32 %v5903_v50, %v3892_v38 }
0x289f   : > { %3799 = vrot.lane.b32.xlu0 %v3797_v49, %s6054_s3 }
0x28a0   : > { %3896 = vrot.lane.b32.xlu1 %v3894_v51, %s6054_s3 }
0x2911   : > { %v3800_v53 = vpop.permute.xlu0 %3799 }
0x2912   : > { %v3897_v47 = vpop.permute.xlu1 %3896  ;;  %v6977_v48 = vadd.f32 %v3800_v53, %v3792_v43 }
0x2913   : > { %v6979_v55 = vadd.f32 %v3897_v47, %v3889_v40 }
0x2914   : > { %5904 = vtanh.f32 %v6977_v48 }
0x2915   : > { %5906 = vtanh.f32 %v6979_v55 }
0x2921   : > { %v5905_v31 = vpop.eup %5904 }
0x2922   : > { %v5907_v57 = vpop.eup %5906  ;;  %3805 = vrot.lane.b32.xlu0 %v5905_v31, %s6055_s16 }
0x2923   : > { %3902 = vrot.lane.b32.xlu1 %v5907_v57, %s6055_s16 }
0x2994   : > { %v3806_v58 = vpop.permute.xlu0 %3805 }
0x2995   : > { %v3903_v44 = vpop.permute.xlu1 %3902  ;;  %v3808_v60 = vmul.f32 %v5901_v27, %v3806_v58 }
0x2996   : > { %v3905_v59 = vmul.f32 %v5903_v50, %v3903_v44 }
0x2997   : > { %3907 = vrot.lane.b32.xlu0 %v3808_v60, %s6054_s3 }
0x2998   : > { %3982 = vrot.lane.b32.xlu1 %v3905_v59, %s6054_s3 }
0x2a09   : > { %v3908_v61 = vpop.permute.xlu0 %3907 }
0x2a0a   : > { %v3983_v63 = vpop.permute.xlu1 %3982  ;;  %5589 = vmatmul.mubr.msk.f32.vlgmr.msra.gmra.mxu0 %vm234_vm2, %v3908_v61 }
0x2a0b   : > { %5600 = vmatmul.mubr.msk.f32.vlgmr.msra.gmra.mxu1 %vm234_vm2, %v3983_v63  ;;  %5603 = vmatpush3.msra.mxu0 %v6147_v9 }
0x2a0c   : > { %5604 = vmatprep.subr.mxu0 %v6052_v16  ;;  %5610 = vmatprep.mubr.msk.f32.mxu0 %vm6053_vm3, %v6052_v16 }
0x2a0d   : > { %5605 = vmatpush3.msra.mxu0 %v6153_v10  ;;  %5614 = vmatpush3.msra.mxu1 %v6206_v34 }
0x2a0e   : > { %5606 = vmatprep.subr.mxu0 %v6052_v16  ;;  %5615 = vmatprep.subr.mxu1 %v6052_v16 }
0x2a0f   : > { %5607 = vmatpush3.msra.mxu0 %v6161_v11  ;;  %5616 = vmatpush3.msra.mxu1 %v6213_v36 }
0x2a10   : > { %5608 = vmatprep.subr.mxu0 %v6052_v16  ;;  %5617 = vmatprep.subr.mxu1 %v6052_v16 }
0x2a11   : > { %5609 = vmatpush3.msra.mxu0 %v6169_v12  ;;  %5618 = vmatpush3.msra.mxu1 %v6227_v39 }
0x2a12   : > { %5611 = vmatmul.mubr.msk.f32.vlgmr.msra.gmra.mxu0 %vm234_vm2, %v3983_v63  ;;  %5619 = vmatprep.subr.mxu1 %v6052_v16  ;;  %v4355_v63 = vld [vmem:[#allocation2 + $0x38] sm:$0xff] }
0x2a13   : > { %5624 = vmatprep.subr.mxu0 %v6052_v16  ;;  %5620 = vmatpush3.msra.mxu1 %v6236_v41 }
0x2a14   : > { %5625 = vmatpush3.msra.mxu0 %v6201_v32  ;;  %5621 = vmatprep.mubr.msk.f32.mxu1 %vm6053_vm3, %v6052_v16 }
0x2a15   : > { %5626 = vmatprep.subr.mxu0 %v6052_v16  ;;  %5635 = vmatprep.subr.mxu1 %v6052_v16 }
0x2a16   : > { %5627 = vmatpush3.msra.mxu0 %v6218_v37  ;;  %5632 = vmatprep.mubr.msk.f32.mxu0 %vm6053_vm3, %v6052_v16 }
0x2a17   : > { %5628 = vmatprep.subr.mxu0 %v6052_v16 }
0x2a18   : > { %5629 = vmatpush3.msra.mxu0 %v6241_v42 }
0x2a19   : > { %5630 = vmatprep.subr.mxu0 %v6052_v16 }
0x2a1a   : > { %5631 = vmatpush3.msra.mxu0 %v6262_v46 }
0x2a1b   : > { %5646 = vmatprep.subr.mxu0 %v6052_v16 }
0x2aca   : > { %v3977_v8 = vpop.f32.mrf.mxu0 }
0x2acb   : > { %v4052_v14 = vpop.f32.mrf.mxu1 }
0x2acc   : > { %v4053_v17 = vadd.f32 %v4052_v14, %v3977_v8  ;;  %v5590_v13 = vpop.f32.mrf.mxu0 }
0x2acd   : > { %v5601_v18 = vpop.f32.mrf.mxu1 }
0x2ace   : > { %v4056_v0 = vadd.f32 %v6328_v6, %v4053_v17 }
0x2ad0   : > { %v4853_v62 = vmul.f32 -1.442695, %v4056_v0 }
0x2ad2   : > { %5908 = vpow2.f32 %v4853_v62  ;;  %v4149_v54 = vpop.f32.mrf.mxu0 }
0x2ad3   : > { %v4153_v21 = vadd.f32 %v4149_v54, %v4082_v19 }
0x2ad4   : > { %v5612_v22 = vpop.f32.mrf.mxu0 }
0x2ad5   : > { %v4856_v23 = vmul.f32 -1.442695, %v4153_v21 }
0x2ad7   : > { %5910 = vpow2.f32 %v4856_v23 }
0x2adf   : > { %v5909_v56 = vpop.eup %5908 }
0x2ae0   : > { %v4060_v20 = vadd.f32 1.0, %v5909_v56 }
0x2ae2   : > { %5912 = vrcp.f32 %v4060_v20 }
0x2ae4   : > { %v5911_v25 = vpop.eup %5910 }
0x2ae5   : > { %v4157_v28 = vadd.f32 1.0, %v5911_v25 }
0x2ae7   : > { %5914 = vrcp.f32 %v4157_v28 }
0x2aef   : > { %v5913_v52 = vpop.eup %5912 }
0x2af0   : > { %v4063_v15 = vmul.f32 2.0, %v5913_v52  ;;  %v4065_v24 = vmul.f32 %v5913_v52, %v6977_v48 }
0x2af2   : > { %v4854_v7 = vadd.f32 -1.0, %v4063_v15 }
0x2af4   : > { %v5915_v29 = vpop.eup %5914  ;;  %4067 = vrot.lane.b32.xlu0 %v4854_v7, %s6055_s16 }
0x2af5   : > { %v4160_v33 = vmul.f32 2.0, %v5915_v29  ;;  %v4162_v49 = vmul.f32 %v5915_v29, %v6979_v55 }
0x2af7   : > { %v4857_v27 = vadd.f32 -1.0, %v4160_v33 }
0x2af9   : > { %4164 = vrot.lane.b32.xlu1 %v4857_v27, %s6055_s16 }
0x2b66   : > { %v4068_v50 = vpop.permute.xlu0 %4067 }
0x2b67   : > { %v4070_v30 = vmul.f32 %v5913_v52, %v4068_v50 }
0x2b69   : > { %4072 = vrot.lane.b32.xlu0 %v4070_v30, %s6054_s3 }
0x2b6b   : > { %v4165_v35 = vpop.permute.xlu1 %4164 }
0x2b6c   : > { %v4167_v45 = vmul.f32 %v5915_v29, %v4165_v35 }
0x2b6e   : > { %4169 = vrot.lane.b32.xlu1 %v4167_v45, %s6054_s3 }
0x2bdb   : > { %v4073_v26 = vpop.permute.xlu0 %4072 }
0x2bdc   : > { %v7026_v38 = vadd.f32 %v4073_v26, %v4065_v24 }
0x2bde   : > { %5916 = vtanh.f32 %v7026_v38 }
0x2be0   : > { %v4170_v51 = vpop.permute.xlu1 %4169 }
0x2be1   : > { %v7030_v43 = vadd.f32 %v4170_v51, %v4162_v49 }
0x2be3   : > { %5918 = vtanh.f32 %v7030_v43 }
0x2beb   : > { %v5917_v40 = vpop.eup %5916 }
0x2bec   : > { %4078 = vrot.lane.b32.xlu0 %v5917_v40, %s6055_s16 }
0x2bf0   : > { %v5919_v53 = vpop.eup %5918 }
0x2bf1   : > { %4175 = vrot.lane.b32.xlu1 %v5919_v53, %s6055_s16 }
0x2c5e   : > { %v4079_v47 = vpop.permute.xlu0 %4078 }
0x2c5f   : > { %v4081_v48 = vmul.f32 %v5913_v52, %v4079_v47 }
0x2c61   : > { %4180 = vrot.lane.b32.xlu0 %v4081_v48, %s6054_s3 }
0x2c63   : > { %v4176_v31 = vpop.permute.xlu1 %4175 }
0x2c64   : > { %v4178_v57 = vmul.f32 %v5915_v29, %v4176_v31 }
0x2c66   : > { %4255 = vrot.lane.b32.xlu1 %v4178_v57, %s6054_s3 }
0x2cd3   : > { %v4181_v55 = vpop.permute.xlu0 %4180 }
0x2cd4   : > { %5622 = vmatmul.mubr.msk.f32.vlgmr.msra.gmra.mxu1 %vm234_vm2, %v4181_v55 }
0x2cd5   : > { %5636 = vmatpush3.msra.mxu1 %v6147_v9  ;;  %5643 = vmatprep.mubr.msk.f32.mxu1 %vm6053_vm3, %v6052_v16 }
0x2cd6   : > { %5637 = vmatprep.subr.mxu1 %v6052_v16 }
0x2cd7   : > { %5638 = vmatpush3.msra.mxu1 %v6153_v10 }
0x2cd8   : > { %5639 = vmatprep.subr.mxu1 %v6052_v16  ;;  %v4256_v58 = vpop.permute.xlu1 %4255 }
0x2cd9   : > { %5640 = vmatpush3.msra.mxu1 %v6161_v11  ;;  %5633 = vmatmul.mubr.msk.f32.vlgmr.msra.gmra.mxu0 %vm234_vm2, %v4256_v58 }
0x2cda   : > { %5641 = vmatprep.subr.mxu1 %v6052_v16  ;;  %5647 = vmatpush3.msra.mxu0 %v6206_v34 }
0x2cdb   : > { %5642 = vmatpush3.msra.mxu1 %v6169_v12  ;;  %5648 = vmatprep.subr.mxu0 %v6052_v16 }
0x2cdc   : > { %5644 = vmatmul.mubr.msk.f32.vlgmr.msra.gmra.mxu1 %vm234_vm2, %v4256_v58  ;;  %5657 = vmatprep.subr.mxu1 %v6052_v16 }
0x2cdd   : > { %5658 = vmatpush3.msra.mxu1 %v6201_v32  ;;  %5649 = vmatpush3.msra.mxu0 %v6213_v36 }
0x2cde   : > { %5659 = vmatprep.subr.mxu1 %v6052_v16  ;;  %5650 = vmatprep.subr.mxu0 %v6052_v16 }
0x2cdf   : > { %5660 = vmatpush3.msra.mxu1 %v6218_v37  ;;  %5651 = vmatpush3.msra.mxu0 %v6227_v39 }
0x2ce0   : > { %5661 = vmatprep.subr.mxu1 %v6052_v16  ;;  %5652 = vmatprep.subr.mxu0 %v6052_v16 }
0x2ce1   : > { %5662 = vmatpush3.msra.mxu1 %v6241_v42  ;;  %5665 = vmatprep.mubr.msk.f32.mxu1 %vm6053_vm3, %v6052_v16 }
0x2ce2   : > { %5663 = vmatprep.subr.mxu1 %v6052_v16  ;;  %5653 = vmatpush3.msra.mxu0 %v6236_v41 }
0x2ce3   : > { %5664 = vmatpush3.msra.mxu1 %v6262_v46  ;;  %5654 = vmatprep.mubr.msk.f32.mxu0 %vm6053_vm3, %v6052_v16 }
0x2ce4   : > { %5668 = vmatprep.subr.mxu0 %v6052_v16 }
0x2d94   : > { %v4250_v44 = vpop.f32.mrf.mxu1 }
0x2d96   : > { %v5623_v60 = vpop.f32.mrf.mxu1 }
0x2d99   : > { %v4325_v59 = vpop.f32.mrf.mxu0 }
0x2d9a   : > { %v4326_v61 = vadd.f32 %v4325_v59, %v4250_v44 }
0x2d9b   : > { %v5634_v8 = vpop.f32.mrf.mxu0 }
0x2d9c   : > { %v4329_v14 = vadd.f32 %v6328_v6, %v4326_v61  ;;  %v4422_v17 = vpop.f32.mrf.mxu1 }
0x2d9d   : > { %v4426_v13 = vadd.f32 %v4422_v17, %v4355_v63 }
0x2d9e   : > { %v4860_v18 = vmul.f32 -1.442695, %v4329_v14  ;;  %v5645_v0 = vpop.f32.mrf.mxu1 }
0x2d9f   : > { %v4863_v62 = vmul.f32 -1.442695, %v4426_v13 }
0x2da0   : > { %5920 = vpow2.f32 %v4860_v18 }
0x2da1   : > { %5922 = vpow2.f32 %v4863_v62 }
0x2dad   : > { %v5921_v19 = vpop.eup %5920 }
0x2dae   : > { %v5923_v54 = vpop.eup %5922  ;;  %v4333_v21 = vadd.f32 1.0, %v5921_v19 }
0x2daf   : > { %v4430_v22 = vadd.f32 1.0, %v5923_v54 }
0x2db0   : > { %5924 = vrcp.f32 %v4333_v21 }
0x2db1   : > { %5926 = vrcp.f32 %v4430_v22 }
0x2dbd   : > { %v5925_v23 = vpop.eup %5924 }
0x2dbe   : > { %v5927_v56 = vpop.eup %5926  ;;  %v4336_v20 = vmul.f32 2.0, %v5925_v23  ;;  %v4338_v27 = vmul.f32 %v5925_v23, %v7026_v38 }
0x2dbf   : > { %v4433_v25 = vmul.f32 2.0, %v5927_v56  ;;  %v4435_v50 = vmul.f32 %v5927_v56, %v7030_v43 }
0x2dc0   : > { %v4861_v28 = vadd.f32 -1.0, %v4336_v20 }
0x2dc1   : > { %v4864_v52 = vadd.f32 -1.0, %v4433_v25 }
0x2dc2   : > { %4340 = vrot.lane.b32.xlu0 %v4861_v28, %s6055_s16 }
0x2dc3   : > { %4437 = vrot.lane.b32.xlu1 %v4864_v52, %s6055_s16 }
0x2e34   : > { %v4341_v15 = vpop.permute.xlu0 %4340 }
0x2e35   : > { %v4438_v7 = vpop.permute.xlu1 %4437  ;;  %v4343_v29 = vmul.f32 %v5925_v23, %v4341_v15 }
0x2e36   : > { %v4440_v33 = vmul.f32 %v5927_v56, %v4438_v7 }
0x2e37   : > { %4345 = vrot.lane.b32.xlu0 %v4343_v29, %s6054_s3 }
0x2e38   : > { %4442 = vrot.lane.b32.xlu1 %v4440_v33, %s6054_s3 }
0x2ea9   : > { %v4346_v30 = vpop.permute.xlu0 %4345 }
0x2eaa   : > { %v4443_v35 = vpop.permute.xlu1 %4442  ;;  %v4348_v45 = vadd.f32 %v4346_v30, %v4338_v27 }
0x2eab   : > { %v4445_v27 = vadd.f32 %v4443_v35, %v4435_v50  }
0x2eac   : > { %5928 = vtanh.f32 %v4348_v45 }
0x2ead   : > { %5930 = vtanh.f32 %v4445_v27 }
0x2eb9   : > { %v5929_v24 = vpop.eup %5928 }
0x2eba   : > { %v5931_v26 = vpop.eup %5930  ;;  %4351 = vrot.lane.b32.xlu0 %v5929_v24, %s6055_s16 }
0x2ebb   : > { %4448 = vrot.lane.b32.xlu1 %v5931_v26, %s6055_s16 }
0x2f2c   : > { %v4352_v49 = vpop.permute.xlu0 %4351 }
0x2f2d   : > { %v4449_v51 = vpop.permute.xlu1 %4448  ;;  %v4354_v40 = vmul.f32 %v5925_v23, %v4352_v49 }
0x2f2e   : > { %v4451_v53 = vmul.f32 %v5927_v56, %v4449_v51  }
0x2f2f   : > { %4453 = vrot.lane.b32.xlu0 %v4354_v40, %s6054_s3 }
0x2f30   : > { %4528 = vrot.lane.b32.xlu1 %v4451_v53, %s6054_s3 }
0x2fa1   : > { %v4454_v38 = vpop.permute.xlu0 %4453 }
0x2fa2   : > { %v4529_v43 = vpop.permute.xlu1 %4528  ;;  %5655 = vmatmul.mubr.msk.f32.vlgmr.msra.gmra.mxu0 %vm234_vm2, %v4454_v38 }
0x2fa3   : > { %5666 = vmatmul.mubr.msk.f32.vlgmr.msra.gmra.mxu1 %vm234_vm2, %v4529_v43  ;;  %5669 = vmatpush3.msra.mxu0 %v6128_v4 }
0x2fa4   : > { %5670 = vmatprep.subr.mxu0 %v6052_v16  ;;  %5676 = vmatprep.mubr.msk.f32.mxu0 %vm6053_vm3, %v6052_v16 }
0x2fa5   : > { %5671 = vmatpush3.msra.mxu0 %v6126_v3 }
0x2fa6   : > { %5672 = vmatprep.subr.mxu0 %v6052_v16 }
0x2fa7   : > { %5673 = vmatpush3.msra.mxu0 %v6124_v2 }
0x2fa8   : > { %5674 = vmatprep.subr.mxu0 %v6052_v16 }
0x2fa9   : > { %5675 = vmatpush3.msra.mxu0 %v6122_v1 }
0x3062   : > { %v4523_v47 = vpop.f32.mrf.mxu0 }
0x3063   : > { %v4598_v48 = vpop.f32.mrf.mxu1 }
0x3064   : > { %v4599_v31 = vadd.f32 %v4598_v48, %v4523_v47  ;;  %v5656_v57 = vpop.f32.mrf.mxu0 }
0x3065   : > { %v5667_v55 = vpop.f32.mrf.mxu1 }
0x3066   : > { %v4602_v58 = vadd.f32 %v6328_v6, %v4599_v31 }
0x3068   : > { %v4867_v44 = vmul.f32 -1.442695, %v4602_v58 }
0x306a   : > { %5932 = vpow2.f32 %v4867_v44 }
0x3077   : > { %v5933_v60 = vpop.eup %5932 }
0x3078   : > { %v4606_v59 = vadd.f32 1.0, %v5933_v60 }
0x307a   : > { %5934 = vrcp.f32 %v4606_v59 }
0x3087   : > { %v5935_v61 = vpop.eup %5934 }
0x3088   : > { %v4609_v63 = vmul.f32 2.0, %v5935_v61  ;;  %v4611_v17 = vmul.f32 %v5935_v61, %v4348_v45  ;;  %v7126_v45 = vmov %v4451_v53 }
0x308a   : > { %v4868_v8 = vadd.f32 -1.0, %v4609_v63 }
0x308c   : > { %4613 = vrot.lane.b32.xlu0 %v4868_v8, %s6055_s16 }
0x30fe   : > { %v4614_v16 = vpop.permute.xlu0 %4613 }
0x30ff   : > { %v4616_v14 = vmul.f32 %v5935_v61, %v4614_v16 }
0x3101   : > { %4618 = vrot.lane.b32.xlu1 %v4616_v14, %s6054_s3 }
0x3173   : > { %v4619_v13 = vpop.permute.xlu1 %4618 }
0x3174   : > { %v4621_v7 = vadd.f32 %v4619_v13, %v4611_v17  }
0x3176   : > { %5936 = vtanh.f32 %v4621_v7 }
0x3183   : > { %v5937_v18 = vpop.eup %5936 }
0x3184   : > { %4624 = vrot.lane.b32.xlu0 %v5937_v18, %s6055_s16 }
0x31f6   : > { %v4625_v0 = vpop.permute.xlu0 %4624 }
0x31f7   : > { %v4627_v14 = vmul.f32 %v5935_v61, %v4625_v0  }
0x31f9   : > { %4635 = vrot.lane.b32.xlu1 %v4627_v14, %s6054_s3 }
0x326b   : > { %v4636_v62 = vpop.permute.xlu1 %4635 }
0x326c   : > { %5677 = vmatmul.mubr.msk.f32.vlgmr.msra.gmra.mxu0 %vm234_vm2, %v4636_v62 }
0x332b   :  { %2433 = sbr.rel (!%p2431_p10) target bundleno = 6357 (0x18d5), region = 79 }
0x332c   : > { %v4705_v19 = vpop.f32.mrf.mxu0 }
0x332d   : > { %v4706_v54 = vadd.f32 %v6133_v5, %v4705_v19 }
0x332e   : > { %v5678_v21 = vpop.f32.mrf.mxu0 }
0x332f   : > { %4711 = vst [vmem:[%s4710_s1] sm:$0xff] %v4706_v54 }
0x3330   :  { %5989 = shalt.err (!%p5986_p1)
}
0x3331   :  { %4723 = dma.vmem_to_hbm [thread:$0]  %s4718_s10, 512, %s7125_s9, [#allocation5], %s6045_s12, %s6045_s12, %s6046_s13  }
0x3332   :  { %6022 = dma.done.wait [#allocation5], 512  }
0x3333   :  { %6023 = vsyncadd [#allocation5], 4294966784 }
0x3334   :  { %4727 = vsyncpa [#allocation4], 1 }
0x3335   :  { %4728 = vsyncpa [#allocation7], 1 }
0x3336   :  { %4729 = vsyncpa [#allocation5], 1 }

</bundles_post_ra>
